<compile_context>
chip_gen: v6e
topology: v6e:2x2x1
jax: 0.10.0
libtpu: 0.0.40
codegen_flags: <defaults>
</compile_context>

<pallas_src>
import numpy as np
import jax
import jax.numpy as jnp
from jax.experimental import pallas as pl
from jax.experimental.pallas import tpu as pltpu

C1P = 16   # conv1 out-channels padded 10 -> 16
C2P = 32   # conv2 out-channels padded 20 -> 32
F1P = 64   # fc1   out-features  padded 50 -> 64
KSZ = 5


# ---------------------------------------------------------------------------
# The fused kernel: one batch tile per grid step, everything VMEM-resident.
# ---------------------------------------------------------------------------
def _fused_forward_kernel(x_ref, m1_ref, b1_ref, m2_ref, b2_ref,
                          wfc1_ref, bfc1_ref, wfc2_ref, bfc2_ref, out_ref):
    f32 = jnp.float32
    tb = x_ref.shape[0]

    # ---- conv1: 5 banded matmuls along W; 2x2 W-pool baked into the columns --
    x = x_ref[...]                                               # (tb, 28, 28)
    acc1 = jnp.zeros((tb * 24, 2 * 12 * C1P), f32)               # [even | odd]
    for di in range(KSZ):
        xs = x[:, di:di + 24, :].reshape(tb * 24, 28)
        acc1 = acc1 + jnp.dot(xs, m1_ref[di], preferred_element_type=f32)
    wpool1 = jnp.maximum(acc1[:, :12 * C1P], acc1[:, 12 * C1P:])  # (tb*24, 192)
    r1 = wpool1.reshape(tb * 12, 2, 12 * C1P)
    pool1 = jnp.maximum(r1[:, 0, :], r1[:, 1, :])                 # H-pool
    a1 = jnp.maximum(pool1 + b1_ref[...], 0.0)                    # bias + ReLU
    # a1: rows (b, h in 12), lanes (w in 12, c1 in C1P); padded channels are 0.

    # ---- conv2: contract the (w, c1) lane dim with banded matrices ----------
    a1_3d = a1.reshape(tb, 12, 12 * C1P)
    acc2 = jnp.zeros((tb * 8, 2 * 4 * C2P), f32)
    for di in range(KSZ):
        s = a1_3d[:, di:di + 8, :].reshape(tb * 8, 12 * C1P)
        acc2 = acc2 + jnp.dot(s, m2_ref[di], preferred_element_type=f32)
    wpool2 = jnp.maximum(acc2[:, :4 * C2P], acc2[:, 4 * C2P:])    # (tb*8, 128)
    r2 = wpool2.reshape(tb * 4, 2, 4 * C2P)
    pool2 = jnp.maximum(r2[:, 0, :], r2[:, 1, :])                 # (tb*4, 128)
    a2 = jnp.maximum(pool2 + b2_ref[...], 0.0)
    # a2: rows (b, h in 4), lanes (w in 4, c2 in C2P)  == x.view(-1, 320) data.
    # Dropout2d / F.dropout are identity in eval mode (no-op here).

    # ---- fc1 (+ReLU): flatten permutation folded into per-row weight slabs --
    a2_3d = a2.reshape(tb, 4, 4 * C2P)
    acc3 = jnp.zeros((tb, F1P), f32)
    for h in range(4):
        acc3 = acc3 + jnp.dot(a2_3d[:, h, :], wfc1_ref[h],
                              preferred_element_type=f32)
    hid = jnp.maximum(acc3 + bfc1_ref[...], 0.0)                  # (tb, F1P)

    # ---- fc2 + numerically-stable log_softmax (kept at N=10, unpadded) ------
    z = jnp.dot(hid, wfc2_ref[...], preferred_element_type=f32) + bfc2_ref[...]
    m = jnp.max(z, axis=-1, keepdims=True)
    lse = jnp.log(jnp.sum(jnp.exp(z - m), axis=-1, keepdims=True)) + m
    out_ref[...] = z - lse


# ---------------------------------------------------------------------------
# Weight preprocessing (one-time, at init): banded conv matrices with the
# 2x2 W-pool selection baked in, padded channels, folded flatten permutation.
# ---------------------------------------------------------------------------
def _build_conv_band(w, cin, cout, cin_p, cout_p, in_w):
    """w: (cout, cin, 5, 5) PyTorch-layout conv weight (numpy).
    Returns m: (5, in_w*cin_p, 2*half*cout_p), half = (in_w-4)//2.  For kernel
    row `di`, columns [0 : half*cout_p) produce conv outputs at even output
    columns and [half*cout_p :) at odd output columns (channel-minor)."""
    out_w = in_w - KSZ + 1
    half = out_w // 2
    m = np.zeros((KSZ, in_w * cin_p, 2 * half * cout_p), np.float32)
    for di in range(KSZ):
        for parity in range(2):
            base = parity * half * cout_p
            for j2 in range(half):
                for dj in range(KSZ):
                    w_in = 2 * j2 + parity + dj
                    m[di,
                      w_in * cin_p: w_in * cin_p + cin,
                      base + j2 * cout_p: base + j2 * cout_p + cout] = \
                        w[:, :, di, dj].T
    return m


def init_params(key):
    """PyTorch-default init (U(+-1/sqrt(fan_in))) reshaped into the kernel's
    padded / pool-fused / permutation-folded layouts."""
    def uni(k, shape, fan_in):
        bound = 1.0 / np.sqrt(np.float32(fan_in))
        return np.asarray(jax.random.uniform(k, shape, jnp.float32, -bound, bound))

    ks = jax.random.split(key, 8)
    w1 = uni(ks[0], (10, 1, 5, 5), 25)
    b1 = uni(ks[1], (10,), 25)
    w2 = uni(ks[2], (20, 10, 5, 5), 250)
    b2 = uni(ks[3], (20,), 250)
    fc1w = uni(ks[4], (50, 320), 320)
    fc1b = uni(ks[5], (50,), 320)
    fc2w = uni(ks[6], (10, 50), 50)
    fc2b = uni(ks[7], (10,), 50)

    # conv1: input lanes = W (28), no channel interleave (cin_p = 1)
    m1 = _build_conv_band(w1, 1, 10, 1, C1P, 28)        # (5, 28, 384)
    # conv2: input lanes = (w in 12, c1 in C1P)
    m2 = _build_conv_band(w2, 10, 20, C1P, C2P, 12)     # (5, 192, 256)

    b1p = np.zeros(C1P, np.float32); b1p[:10] = b1
    b2p = np.zeros(C2P, np.float32); b2p[:20] = b2
    b1row = np.tile(b1p, 12)[None, :]                   # (1, 192)
    b2row = np.tile(b2p, 4)[None, :]                    # (1, 128)

    # fc1: fold the NCHW x.view(-1, 320) permutation into per-H weight slabs.
    wfc1 = np.zeros((4, 4 * C2P, F1P), np.float32)
    for h in range(4):
        for w in range(4):
            cols = np.arange(20) * 16 + h * 4 + w       # PyTorch flat index c*16+h*4+w
            wfc1[h, w * C2P: w * C2P + 20, :50] = fc1w[:, cols].T
    bfc1 = np.zeros((1, F1P), np.float32); bfc1[0, :50] = fc1b

    wfc2 = np.zeros((F1P, 10), np.float32); wfc2[:50, :] = fc2w.T
    bfc2 = fc2b[None, :].astype(np.float32)             # (1, 10)

    as_j = lambda a: jnp.asarray(a, dtype=jnp.float32)
    return {"m1": as_j(m1), "b1row": as_j(b1row),
            "m2": as_j(m2), "b2row": as_j(b2row),
            "wfc1": as_j(wfc1), "bfc1": as_j(bfc1),
            "wfc2": as_j(wfc2), "bfc2": as_j(bfc2)}


# ---------------------------------------------------------------------------
# Forward: one gridded pallas_call over batch tiles.
# ---------------------------------------------------------------------------
def neural_net_forward(x, params, batch_tile=8):
    """x: (B, 1, 28, 28) float32 NCHW -> (B, 10) log-probabilities."""
    B = x.shape[0]
    x = x.reshape(B, 28, 28).astype(jnp.float32)        # C == 1: free reshape
    tb = min(batch_tile, B)
    b_pad = ((B + tb - 1) // tb) * tb
    if b_pad != B:
        x = jnp.concatenate([x, jnp.zeros((b_pad - B, 28, 28), jnp.float32)], 0)

    out = pl.pallas_call(
        _fused_forward_kernel,
        out_shape=jax.ShapeDtypeStruct((b_pad, 10), jnp.float32),
        grid_spec=pltpu.PrefetchScalarGridSpec(
            num_scalar_prefetch=0,
            grid=(b_pad // tb,),
            in_specs=[
                pl.BlockSpec((tb, 28, 28), lambda i: (i, 0, 0)),          # x tile
                pl.BlockSpec((KSZ, 28, 2 * 12 * C1P), lambda i: (0, 0, 0)),   # m1
                pl.BlockSpec((1, 12 * C1P), lambda i: (0, 0)),                # b1row
                pl.BlockSpec((KSZ, 12 * C1P, 2 * 4 * C2P), lambda i: (0, 0, 0)),  # m2
                pl.BlockSpec((1, 4 * C2P), lambda i: (0, 0)),                 # b2row
                pl.BlockSpec((4, 4 * C2P, F1P), lambda i: (0, 0, 0)),         # wfc1
                pl.BlockSpec((1, F1P), lambda i: (0, 0)),                     # bfc1
                pl.BlockSpec((F1P, 10), lambda i: (0, 0)),                    # wfc2
                pl.BlockSpec((1, 10), lambda i: (0, 0)),                      # bfc2
            ],
            out_specs=pl.BlockSpec((tb, 10), lambda i: (i, 0)),
        ),
        compiler_params=pltpu.CompilerParams(
            dimension_semantics=("parallel",)),
    )(x, params["m1"], params["b1row"], params["m2"], params["b2row"],
      params["wfc1"], params["bfc1"], params["wfc2"], params["bfc2"])
    return out[:B]


if __name__ == "__main__":
    key = jax.random.PRNGKey(0)
    k_param, k_input = jax.random.split(key)
    params = init_params(k_param)

    # MNIST-style input: batch=2, 1 channel, 28x28 (required so view(-1, 320) holds)
    x = jax.random.normal(k_input, (2, 1, 28, 28), dtype=jnp.float32)

    out = jax.jit(neural_net_forward)(x, params)
    out = jax.block_until_ready(out)

    assert out.shape == (2, 10)
    assert bool(jnp.all(jnp.isfinite(out)))
    # log_softmax rows should (approximately) exponentiate-sum to 1
    assert bool(jnp.allclose(jnp.sum(jnp.exp(out), axis=-1), 1.0, atol=1e-4))
    print("KERNEL_OK")
</pallas_src>

<mosaic_0001>
module attributes {stable_mosaic.version = 11 : i64} {
  func.func @_fused_forward_kernel(%arg0: i32, %arg1: memref<2x28x28xf32, #tpu.memory_space<vmem>>, %arg2: memref<5x28x384xf32, #tpu.memory_space<vmem>>, %arg3: memref<1x192xf32, #tpu.memory_space<vmem>>, %arg4: memref<5x192x256xf32, #tpu.memory_space<vmem>>, %arg5: memref<1x128xf32, #tpu.memory_space<vmem>>, %arg6: memref<4x128x64xf32, #tpu.memory_space<vmem>>, %arg7: memref<1x64xf32, #tpu.memory_space<vmem>>, %arg8: memref<64x10xf32, #tpu.memory_space<vmem>>, %arg9: memref<1x10xf32, #tpu.memory_space<vmem>>, %arg10: memref<2x10xf32, #tpu.memory_space<vmem>>) attributes {dimension_semantics = [#tpu.dimension_semantics<parallel>], iteration_bounds = array<i64: 1>, scalar_prefetch = 0 : i64, scratch_operands = 0 : i64, tpu.core_type = #tpu.core_type<tc>, window_params = [{transform_indices = @transform_0, window_bounds = array<i64: 2, 28, 28>}, {pipeline_mode = #tpu.pipeline_mode<synchronous>, transform_indices = @transform_1, window_bounds = array<i64: 5, 28, 384>}, {pipeline_mode = #tpu.pipeline_mode<synchronous>, transform_indices = @transform_2, window_bounds = array<i64: 1, 192>}, {pipeline_mode = #tpu.pipeline_mode<synchronous>, transform_indices = @transform_3, window_bounds = array<i64: 5, 192, 256>}, {pipeline_mode = #tpu.pipeline_mode<synchronous>, transform_indices = @transform_4, window_bounds = array<i64: 1, 128>}, {pipeline_mode = #tpu.pipeline_mode<synchronous>, transform_indices = @transform_5, window_bounds = array<i64: 4, 128, 64>}, {pipeline_mode = #tpu.pipeline_mode<synchronous>, transform_indices = @transform_6, window_bounds = array<i64: 1, 64>}, {pipeline_mode = #tpu.pipeline_mode<synchronous>, transform_indices = @transform_7, window_bounds = array<i64: 64, 10>}, {pipeline_mode = #tpu.pipeline_mode<synchronous>, transform_indices = @transform_8, window_bounds = array<i64: 1, 10>}, {transform_indices = @transform_9, window_bounds = array<i64: 2, 10>}]} {
    %c0 = arith.constant 0 : index
    %c0_0 = arith.constant 0 : index
    %c0_1 = arith.constant 0 : index
    %0 = vector.load %arg1[%c0, %c0_0, %c0_1] : memref<2x28x28xf32, #tpu.memory_space<vmem>>, vector<2x28x28xf32>
    %cst = arith.constant 0.000000e+00 : f32
    %1 = vector.broadcast %cst : f32 to vector<48x384xf32>
    %2 = vector.extract_strided_slice %0 {offsets = [0, 0, 0], sizes = [2, 24, 28], strides = [1, 1, 1]} : vector<2x28x28xf32> to vector<2x24x28xf32>
    %3 = vector.shape_cast %2 : vector<2x24x28xf32> to vector<48x28xf32>
    %c0_2 = arith.constant 0 : index
    %c0_3 = arith.constant 0 : index
    %c0_4 = arith.constant 0 : index
    %4 = vector.load %arg2[%c0_2, %c0_3, %c0_4] : memref<5x28x384xf32, #tpu.memory_space<vmem>>, vector<1x28x384xf32>
    %5 = vector.shape_cast %4 : vector<1x28x384xf32> to vector<28x384xf32>
    %cst_5 = arith.constant dense<0.000000e+00> : vector<48x384xf32>
    %6 = tpu.matmul %3, %5, %cst_5 {dimension_numbers = #tpu.dot_dimension_numbers<[1], [0], [0], [1], [0, 0, 1, 1], [], []>} : vector<48x28xf32>, vector<28x384xf32>, vector<48x384xf32> -> vector<48x384xf32>
    %7 = arith.addf %1, %6 : vector<48x384xf32>
    %8 = vector.extract_strided_slice %0 {offsets = [0, 1, 0], sizes = [2, 24, 28], strides = [1, 1, 1]} : vector<2x28x28xf32> to vector<2x24x28xf32>
    %9 = vector.shape_cast %8 : vector<2x24x28xf32> to vector<48x28xf32>
    %c1 = arith.constant 1 : index
    %c0_6 = arith.constant 0 : index
    %c0_7 = arith.constant 0 : index
    %10 = vector.load %arg2[%c1, %c0_6, %c0_7] : memref<5x28x384xf32, #tpu.memory_space<vmem>>, vector<1x28x384xf32>
    %11 = vector.shape_cast %10 : vector<1x28x384xf32> to vector<28x384xf32>
    %cst_8 = arith.constant dense<0.000000e+00> : vector<48x384xf32>
    %12 = tpu.matmul %9, %11, %cst_8 {dimension_numbers = #tpu.dot_dimension_numbers<[1], [0], [0], [1], [0, 0, 1, 1], [], []>} : vector<48x28xf32>, vector<28x384xf32>, vector<48x384xf32> -> vector<48x384xf32>
    %13 = arith.addf %7, %12 : vector<48x384xf32>
    %14 = vector.extract_strided_slice %0 {offsets = [0, 2, 0], sizes = [2, 24, 28], strides = [1, 1, 1]} : vector<2x28x28xf32> to vector<2x24x28xf32>
    %15 = vector.shape_cast %14 : vector<2x24x28xf32> to vector<48x28xf32>
    %c2 = arith.constant 2 : index
    %c0_9 = arith.constant 0 : index
    %c0_10 = arith.constant 0 : index
    %16 = vector.load %arg2[%c2, %c0_9, %c0_10] : memref<5x28x384xf32, #tpu.memory_space<vmem>>, vector<1x28x384xf32>
    %17 = vector.shape_cast %16 : vector<1x28x384xf32> to vector<28x384xf32>
    %cst_11 = arith.constant dense<0.000000e+00> : vector<48x384xf32>
    %18 = tpu.matmul %15, %17, %cst_11 {dimension_numbers = #tpu.dot_dimension_numbers<[1], [0], [0], [1], [0, 0, 1, 1], [], []>} : vector<48x28xf32>, vector<28x384xf32>, vector<48x384xf32> -> vector<48x384xf32>
    %19 = arith.addf %13, %18 : vector<48x384xf32>
    %20 = vector.extract_strided_slice %0 {offsets = [0, 3, 0], sizes = [2, 24, 28], strides = [1, 1, 1]} : vector<2x28x28xf32> to vector<2x24x28xf32>
    %21 = vector.shape_cast %20 : vector<2x24x28xf32> to vector<48x28xf32>
    %c3 = arith.constant 3 : index
    %c0_12 = arith.constant 0 : index
    %c0_13 = arith.constant 0 : index
    %22 = vector.load %arg2[%c3, %c0_12, %c0_13] : memref<5x28x384xf32, #tpu.memory_space<vmem>>, vector<1x28x384xf32>
    %23 = vector.shape_cast %22 : vector<1x28x384xf32> to vector<28x384xf32>
    %cst_14 = arith.constant dense<0.000000e+00> : vector<48x384xf32>
    %24 = tpu.matmul %21, %23, %cst_14 {dimension_numbers = #tpu.dot_dimension_numbers<[1], [0], [0], [1], [0, 0, 1, 1], [], []>} : vector<48x28xf32>, vector<28x384xf32>, vector<48x384xf32> -> vector<48x384xf32>
    %25 = arith.addf %19, %24 : vector<48x384xf32>
    %26 = vector.extract_strided_slice %0 {offsets = [0, 4, 0], sizes = [2, 24, 28], strides = [1, 1, 1]} : vector<2x28x28xf32> to vector<2x24x28xf32>
    %27 = vector.shape_cast %26 : vector<2x24x28xf32> to vector<48x28xf32>
    %c4 = arith.constant 4 : index
    %c0_15 = arith.constant 0 : index
    %c0_16 = arith.constant 0 : index
    %28 = vector.load %arg2[%c4, %c0_15, %c0_16] : memref<5x28x384xf32, #tpu.memory_space<vmem>>, vector<1x28x384xf32>
    %29 = vector.shape_cast %28 : vector<1x28x384xf32> to vector<28x384xf32>
    %cst_17 = arith.constant dense<0.000000e+00> : vector<48x384xf32>
    %30 = tpu.matmul %27, %29, %cst_17 {dimension_numbers = #tpu.dot_dimension_numbers<[1], [0], [0], [1], [0, 0, 1, 1], [], []>} : vector<48x28xf32>, vector<28x384xf32>, vector<48x384xf32> -> vector<48x384xf32>
    %31 = arith.addf %25, %30 : vector<48x384xf32>
    %32 = vector.extract_strided_slice %31 {offsets = [0, 0], sizes = [48, 192], strides = [1, 1]} : vector<48x384xf32> to vector<48x192xf32>
    %33 = vector.extract_strided_slice %31 {offsets = [0, 192], sizes = [48, 192], strides = [1, 1]} : vector<48x384xf32> to vector<48x192xf32>
    %34 = arith.maximumf %32, %33 : vector<48x192xf32>
    %35 = vector.shape_cast %34 : vector<48x192xf32> to vector<24x2x192xf32>
    %36 = vector.extract_strided_slice %35 {offsets = [0, 0, 0], sizes = [24, 1, 192], strides = [1, 1, 1]} : vector<24x2x192xf32> to vector<24x1x192xf32>
    %37 = vector.shape_cast %36 : vector<24x1x192xf32> to vector<24x192xf32>
    %38 = vector.extract_strided_slice %35 {offsets = [0, 1, 0], sizes = [24, 1, 192], strides = [1, 1, 1]} : vector<24x2x192xf32> to vector<24x1x192xf32>
    %39 = vector.shape_cast %38 : vector<24x1x192xf32> to vector<24x192xf32>
    %40 = arith.maximumf %37, %39 : vector<24x192xf32>
    %c0_18 = arith.constant 0 : index
    %c0_19 = arith.constant 0 : index
    %41 = vector.load %arg3[%c0_18, %c0_19] : memref<1x192xf32, #tpu.memory_space<vmem>>, vector<1x192xf32>
    %42 = vector.broadcast %41 : vector<1x192xf32> to vector<24x192xf32>
    %43 = arith.addf %40, %42 : vector<24x192xf32>
    %cst_20 = arith.constant 0.000000e+00 : f32
    %44 = vector.broadcast %cst_20 : f32 to vector<24x192xf32>
    %45 = arith.maximumf %43, %44 : vector<24x192xf32>
    %46 = vector.shape_cast %45 : vector<24x192xf32> to vector<2x12x192xf32>
    %cst_21 = arith.constant 0.000000e+00 : f32
    %47 = vector.broadcast %cst_21 : f32 to vector<16x256xf32>
    %48 = vector.extract_strided_slice %46 {offsets = [0, 0, 0], sizes = [2, 8, 192], strides = [1, 1, 1]} : vector<2x12x192xf32> to vector<2x8x192xf32>
    %49 = vector.shape_cast %48 : vector<2x8x192xf32> to vector<16x192xf32>
    %c0_22 = arith.constant 0 : index
    %c0_23 = arith.constant 0 : index
    %c0_24 = arith.constant 0 : index
    %50 = vector.load %arg4[%c0_22, %c0_23, %c0_24] : memref<5x192x256xf32, #tpu.memory_space<vmem>>, vector<1x192x256xf32>
    %51 = vector.shape_cast %50 : vector<1x192x256xf32> to vector<192x256xf32>
    %cst_25 = arith.constant dense<0.000000e+00> : vector<16x256xf32>
    %52 = tpu.matmul %49, %51, %cst_25 {dimension_numbers = #tpu.dot_dimension_numbers<[1], [0], [0], [1], [0, 0, 1, 1], [], []>} : vector<16x192xf32>, vector<192x256xf32>, vector<16x256xf32> -> vector<16x256xf32>
    %53 = arith.addf %47, %52 : vector<16x256xf32>
    %54 = vector.extract_strided_slice %46 {offsets = [0, 1, 0], sizes = [2, 8, 192], strides = [1, 1, 1]} : vector<2x12x192xf32> to vector<2x8x192xf32>
    %55 = vector.shape_cast %54 : vector<2x8x192xf32> to vector<16x192xf32>
    %c1_26 = arith.constant 1 : index
    %c0_27 = arith.constant 0 : index
    %c0_28 = arith.constant 0 : index
    %56 = vector.load %arg4[%c1_26, %c0_27, %c0_28] : memref<5x192x256xf32, #tpu.memory_space<vmem>>, vector<1x192x256xf32>
    %57 = vector.shape_cast %56 : vector<1x192x256xf32> to vector<192x256xf32>
    %cst_29 = arith.constant dense<0.000000e+00> : vector<16x256xf32>
    %58 = tpu.matmul %55, %57, %cst_29 {dimension_numbers = #tpu.dot_dimension_numbers<[1], [0], [0], [1], [0, 0, 1, 1], [], []>} : vector<16x192xf32>, vector<192x256xf32>, vector<16x256xf32> -> vector<16x256xf32>
    %59 = arith.addf %53, %58 : vector<16x256xf32>
    %60 = vector.extract_strided_slice %46 {offsets = [0, 2, 0], sizes = [2, 8, 192], strides = [1, 1, 1]} : vector<2x12x192xf32> to vector<2x8x192xf32>
    %61 = vector.shape_cast %60 : vector<2x8x192xf32> to vector<16x192xf32>
    %c2_30 = arith.constant 2 : index
    %c0_31 = arith.constant 0 : index
    %c0_32 = arith.constant 0 : index
    %62 = vector.load %arg4[%c2_30, %c0_31, %c0_32] : memref<5x192x256xf32, #tpu.memory_space<vmem>>, vector<1x192x256xf32>
    %63 = vector.shape_cast %62 : vector<1x192x256xf32> to vector<192x256xf32>
    %cst_33 = arith.constant dense<0.000000e+00> : vector<16x256xf32>
    %64 = tpu.matmul %61, %63, %cst_33 {dimension_numbers = #tpu.dot_dimension_numbers<[1], [0], [0], [1], [0, 0, 1, 1], [], []>} : vector<16x192xf32>, vector<192x256xf32>, vector<16x256xf32> -> vector<16x256xf32>
    %65 = arith.addf %59, %64 : vector<16x256xf32>
    %66 = vector.extract_strided_slice %46 {offsets = [0, 3, 0], sizes = [2, 8, 192], strides = [1, 1, 1]} : vector<2x12x192xf32> to vector<2x8x192xf32>
    %67 = vector.shape_cast %66 : vector<2x8x192xf32> to vector<16x192xf32>
    %c3_34 = arith.constant 3 : index
    %c0_35 = arith.constant 0 : index
    %c0_36 = arith.constant 0 : index
    %68 = vector.load %arg4[%c3_34, %c0_35, %c0_36] : memref<5x192x256xf32, #tpu.memory_space<vmem>>, vector<1x192x256xf32>
    %69 = vector.shape_cast %68 : vector<1x192x256xf32> to vector<192x256xf32>
    %cst_37 = arith.constant dense<0.000000e+00> : vector<16x256xf32>
    %70 = tpu.matmul %67, %69, %cst_37 {dimension_numbers = #tpu.dot_dimension_numbers<[1], [0], [0], [1], [0, 0, 1, 1], [], []>} : vector<16x192xf32>, vector<192x256xf32>, vector<16x256xf32> -> vector<16x256xf32>
    %71 = arith.addf %65, %70 : vector<16x256xf32>
    %72 = vector.extract_strided_slice %46 {offsets = [0, 4, 0], sizes = [2, 8, 192], strides = [1, 1, 1]} : vector<2x12x192xf32> to vector<2x8x192xf32>
    %73 = vector.shape_cast %72 : vector<2x8x192xf32> to vector<16x192xf32>
    %c4_38 = arith.constant 4 : index
    %c0_39 = arith.constant 0 : index
    %c0_40 = arith.constant 0 : index
    %74 = vector.load %arg4[%c4_38, %c0_39, %c0_40] : memref<5x192x256xf32, #tpu.memory_space<vmem>>, vector<1x192x256xf32>
    %75 = vector.shape_cast %74 : vector<1x192x256xf32> to vector<192x256xf32>
    %cst_41 = arith.constant dense<0.000000e+00> : vector<16x256xf32>
    %76 = tpu.matmul %73, %75, %cst_41 {dimension_numbers = #tpu.dot_dimension_numbers<[1], [0], [0], [1], [0, 0, 1, 1], [], []>} : vector<16x192xf32>, vector<192x256xf32>, vector<16x256xf32> -> vector<16x256xf32>
    %77 = arith.addf %71, %76 : vector<16x256xf32>
    %78 = vector.extract_strided_slice %77 {offsets = [0, 0], sizes = [16, 128], strides = [1, 1]} : vector<16x256xf32> to vector<16x128xf32>
    %79 = vector.extract_strided_slice %77 {offsets = [0, 128], sizes = [16, 128], strides = [1, 1]} : vector<16x256xf32> to vector<16x128xf32>
    %80 = arith.maximumf %78, %79 : vector<16x128xf32>
    %81 = vector.shape_cast %80 : vector<16x128xf32> to vector<8x2x128xf32>
    %82 = vector.extract_strided_slice %81 {offsets = [0, 0, 0], sizes = [8, 1, 128], strides = [1, 1, 1]} : vector<8x2x128xf32> to vector<8x1x128xf32>
    %83 = vector.shape_cast %82 : vector<8x1x128xf32> to vector<8x128xf32>
    %84 = vector.extract_strided_slice %81 {offsets = [0, 1, 0], sizes = [8, 1, 128], strides = [1, 1, 1]} : vector<8x2x128xf32> to vector<8x1x128xf32>
    %85 = vector.shape_cast %84 : vector<8x1x128xf32> to vector<8x128xf32>
    %86 = arith.maximumf %83, %85 : vector<8x128xf32>
    %c0_42 = arith.constant 0 : index
    %c0_43 = arith.constant 0 : index
    %87 = vector.load %arg5[%c0_42, %c0_43] : memref<1x128xf32, #tpu.memory_space<vmem>>, vector<1x128xf32>
    %88 = vector.broadcast %87 : vector<1x128xf32> to vector<8x128xf32>
    %89 = arith.addf %86, %88 : vector<8x128xf32>
    %cst_44 = arith.constant 0.000000e+00 : f32
    %90 = vector.broadcast %cst_44 : f32 to vector<8x128xf32>
    %91 = arith.maximumf %89, %90 : vector<8x128xf32>
    %92 = vector.shape_cast %91 : vector<8x128xf32> to vector<2x4x128xf32>
    %cst_45 = arith.constant 0.000000e+00 : f32
    %93 = vector.broadcast %cst_45 : f32 to vector<2x64xf32>
    %94 = vector.extract_strided_slice %92 {offsets = [0, 0, 0], sizes = [2, 1, 128], strides = [1, 1, 1]} : vector<2x4x128xf32> to vector<2x1x128xf32>
    %95 = vector.shape_cast %94 : vector<2x1x128xf32> to vector<2x128xf32>
    %c0_46 = arith.constant 0 : index
    %c0_47 = arith.constant 0 : index
    %c0_48 = arith.constant 0 : index
    %96 = vector.load %arg6[%c0_46, %c0_47, %c0_48] : memref<4x128x64xf32, #tpu.memory_space<vmem>>, vector<1x128x64xf32>
    %97 = vector.shape_cast %96 : vector<1x128x64xf32> to vector<128x64xf32>
    %cst_49 = arith.constant dense<0.000000e+00> : vector<2x64xf32>
    %98 = tpu.matmul %95, %97, %cst_49 {dimension_numbers = #tpu.dot_dimension_numbers<[1], [0], [0], [1], [0, 0, 1, 1], [], []>} : vector<2x128xf32>, vector<128x64xf32>, vector<2x64xf32> -> vector<2x64xf32>
    %99 = arith.addf %93, %98 : vector<2x64xf32>
    %100 = vector.extract_strided_slice %92 {offsets = [0, 1, 0], sizes = [2, 1, 128], strides = [1, 1, 1]} : vector<2x4x128xf32> to vector<2x1x128xf32>
    %101 = vector.shape_cast %100 : vector<2x1x128xf32> to vector<2x128xf32>
    %c1_50 = arith.constant 1 : index
    %c0_51 = arith.constant 0 : index
    %c0_52 = arith.constant 0 : index
    %102 = vector.load %arg6[%c1_50, %c0_51, %c0_52] : memref<4x128x64xf32, #tpu.memory_space<vmem>>, vector<1x128x64xf32>
    %103 = vector.shape_cast %102 : vector<1x128x64xf32> to vector<128x64xf32>
    %cst_53 = arith.constant dense<0.000000e+00> : vector<2x64xf32>
    %104 = tpu.matmul %101, %103, %cst_53 {dimension_numbers = #tpu.dot_dimension_numbers<[1], [0], [0], [1], [0, 0, 1, 1], [], []>} : vector<2x128xf32>, vector<128x64xf32>, vector<2x64xf32> -> vector<2x64xf32>
    %105 = arith.addf %99, %104 : vector<2x64xf32>
    %106 = vector.extract_strided_slice %92 {offsets = [0, 2, 0], sizes = [2, 1, 128], strides = [1, 1, 1]} : vector<2x4x128xf32> to vector<2x1x128xf32>
    %107 = vector.shape_cast %106 : vector<2x1x128xf32> to vector<2x128xf32>
    %c2_54 = arith.constant 2 : index
    %c0_55 = arith.constant 0 : index
    %c0_56 = arith.constant 0 : index
    %108 = vector.load %arg6[%c2_54, %c0_55, %c0_56] : memref<4x128x64xf32, #tpu.memory_space<vmem>>, vector<1x128x64xf32>
    %109 = vector.shape_cast %108 : vector<1x128x64xf32> to vector<128x64xf32>
    %cst_57 = arith.constant dense<0.000000e+00> : vector<2x64xf32>
    %110 = tpu.matmul %107, %109, %cst_57 {dimension_numbers = #tpu.dot_dimension_numbers<[1], [0], [0], [1], [0, 0, 1, 1], [], []>} : vector<2x128xf32>, vector<128x64xf32>, vector<2x64xf32> -> vector<2x64xf32>
    %111 = arith.addf %105, %110 : vector<2x64xf32>
    %112 = vector.extract_strided_slice %92 {offsets = [0, 3, 0], sizes = [2, 1, 128], strides = [1, 1, 1]} : vector<2x4x128xf32> to vector<2x1x128xf32>
    %113 = vector.shape_cast %112 : vector<2x1x128xf32> to vector<2x128xf32>
    %c3_58 = arith.constant 3 : index
    %c0_59 = arith.constant 0 : index
    %c0_60 = arith.constant 0 : index
    %114 = vector.load %arg6[%c3_58, %c0_59, %c0_60] : memref<4x128x64xf32, #tpu.memory_space<vmem>>, vector<1x128x64xf32>
    %115 = vector.shape_cast %114 : vector<1x128x64xf32> to vector<128x64xf32>
    %cst_61 = arith.constant dense<0.000000e+00> : vector<2x64xf32>
    %116 = tpu.matmul %113, %115, %cst_61 {dimension_numbers = #tpu.dot_dimension_numbers<[1], [0], [0], [1], [0, 0, 1, 1], [], []>} : vector<2x128xf32>, vector<128x64xf32>, vector<2x64xf32> -> vector<2x64xf32>
    %117 = arith.addf %111, %116 : vector<2x64xf32>
    %c0_62 = arith.constant 0 : index
    %c0_63 = arith.constant 0 : index
    %118 = vector.load %arg7[%c0_62, %c0_63] : memref<1x64xf32, #tpu.memory_space<vmem>>, vector<1x64xf32>
    %119 = vector.broadcast %118 : vector<1x64xf32> to vector<2x64xf32>
    %120 = arith.addf %117, %119 : vector<2x64xf32>
    %cst_64 = arith.constant 0.000000e+00 : f32
    %121 = vector.broadcast %cst_64 : f32 to vector<2x64xf32>
    %122 = arith.maximumf %120, %121 : vector<2x64xf32>
    %c0_65 = arith.constant 0 : index
    %c0_66 = arith.constant 0 : index
    %123 = vector.load %arg8[%c0_65, %c0_66] : memref<64x10xf32, #tpu.memory_space<vmem>>, vector<64x10xf32>
    %cst_67 = arith.constant dense<0.000000e+00> : vector<2x10xf32>
    %124 = tpu.matmul %122, %123, %cst_67 {dimension_numbers = #tpu.dot_dimension_numbers<[1], [0], [0], [1], [0, 0, 1, 1], [], []>} : vector<2x64xf32>, vector<64x10xf32>, vector<2x10xf32> -> vector<2x10xf32>
    %c0_68 = arith.constant 0 : index
    %c0_69 = arith.constant 0 : index
    %125 = vector.load %arg9[%c0_68, %c0_69] : memref<1x10xf32, #tpu.memory_space<vmem>>, vector<1x10xf32>
    %126 = vector.broadcast %125 : vector<1x10xf32> to vector<2x10xf32>
    %127 = arith.addf %124, %126 : vector<2x10xf32>
    %cst_70 = arith.constant dense<0xFF800000> : vector<2xf32>
    %128 = vector.multi_reduction <maximumf>, %127, %cst_70 [1] : vector<2x10xf32> to vector<2xf32>
    %129 = vector.shape_cast %128 : vector<2xf32> to vector<2x1xf32>
    %130 = vector.broadcast %129 : vector<2x1xf32> to vector<2x10xf32>
    %131 = arith.subf %127, %130 : vector<2x10xf32>
    %132 = math.exp %131 : vector<2x10xf32>
    %cst_71 = arith.constant dense<0.000000e+00> : vector<2xf32>
    %133 = vector.multi_reduction <add>, %132, %cst_71 [1] : vector<2x10xf32> to vector<2xf32>
    %134 = vector.shape_cast %133 : vector<2xf32> to vector<2x1xf32>
    %135 = math.log %134 : vector<2x1xf32>
    %136 = arith.addf %135, %129 : vector<2x1xf32>
    %137 = vector.broadcast %136 : vector<2x1xf32> to vector<2x10xf32>
    %138 = arith.subf %127, %137 : vector<2x10xf32>
    %c0_72 = arith.constant 0 : index
    %c0_73 = arith.constant 0 : index
    %139 = vector.load %arg10[%c0_72, %c0_73] : memref<2x10xf32, #tpu.memory_space<vmem>>, vector<2x10xf32>
    tpu.vector_store %arg10[%c0_72, %c0_73], %138 {strides = array<i32>} : memref<2x10xf32, #tpu.memory_space<vmem>>, vector<2x10xf32>,
    return
  }
  func.func @transform_0(%arg0: i32) -> (i32, i32, i32) {
    %c0_i32 = arith.constant 0 : i32
    %c0_i32_0 = arith.constant 0 : i32
    %c0_i32_1 = arith.constant 0 : i32
    return %arg0, %c0_i32, %c0_i32_0 : i32, i32, i32
  }
  func.func @transform_1(%arg0: i32) -> (i32, i32, i32) {
    %c0_i32 = arith.constant 0 : i32
    %c0_i32_0 = arith.constant 0 : i32
    %c0_i32_1 = arith.constant 0 : i32
    %c0_i32_2 = arith.constant 0 : i32
    return %c0_i32, %c0_i32_0, %c0_i32_1 : i32, i32, i32
  }
  func.func @transform_2(%arg0: i32) -> (i32, i32) {
    %c0_i32 = arith.constant 0 : i32
    %c0_i32_0 = arith.constant 0 : i32
    %c0_i32_1 = arith.constant 0 : i32
    return %c0_i32, %c0_i32_0 : i32, i32
  }
  func.func @transform_3(%arg0: i32) -> (i32, i32, i32) {
    %c0_i32 = arith.constant 0 : i32
    %c0_i32_0 = arith.constant 0 : i32
    %c0_i32_1 = arith.constant 0 : i32
    %c0_i32_2 = arith.constant 0 : i32
    return %c0_i32, %c0_i32_0, %c0_i32_1 : i32, i32, i32
  }
  func.func @transform_4(%arg0: i32) -> (i32, i32) {
    %c0_i32 = arith.constant 0 : i32
    %c0_i32_0 = arith.constant 0 : i32
    %c0_i32_1 = arith.constant 0 : i32
    return %c0_i32, %c0_i32_0 : i32, i32
  }
  func.func @transform_5(%arg0: i32) -> (i32, i32, i32) {
    %c0_i32 = arith.constant 0 : i32
    %c0_i32_0 = arith.constant 0 : i32
    %c0_i32_1 = arith.constant 0 : i32
    %c0_i32_2 = arith.constant 0 : i32
    return %c0_i32, %c0_i32_0, %c0_i32_1 : i32, i32, i32
  }
  func.func @transform_6(%arg0: i32) -> (i32, i32) {
    %c0_i32 = arith.constant 0 : i32
    %c0_i32_0 = arith.constant 0 : i32
    %c0_i32_1 = arith.constant 0 : i32
    return %c0_i32, %c0_i32_0 : i32, i32
  }
  func.func @transform_7(%arg0: i32) -> (i32, i32) {
    %c0_i32 = arith.constant 0 : i32
    %c0_i32_0 = arith.constant 0 : i32
    %c0_i32_1 = arith.constant 0 : i32
    return %c0_i32, %c0_i32_0 : i32, i32
  }
  func.func @transform_8(%arg0: i32) -> (i32, i32) {
    %c0_i32 = arith.constant 0 : i32
    %c0_i32_0 = arith.constant 0 : i32
    %c0_i32_1 = arith.constant 0 : i32
    return %c0_i32, %c0_i32_0 : i32, i32
  }
  func.func @transform_9(%arg0: i32) -> (i32, i32) {
    %c0_i32 = arith.constant 0 : i32
    %c0_i32_0 = arith.constant 0 : i32
    return %arg0, %c0_i32 : i32, i32
  }
}

</mosaic_0001>

<bundles_post_ra>
// kernel: neural_net_forward.1
= control target key start
LH: loop header
LB: loop body
LE: loop exit
PB: predicated region body
PF: predicated region fallthrough
CT: control target
= control target key end

     0   :  { %14 = vsyncpa [#allocation3], 0  ;;  %s5714_s0 = inlined_call_operand.vmem [shape: f32[2,28,28], index: 0, kind: input, shape index: {}]   ;;  %s5715_s1 = inlined_call_operand.vmem [shape: f32[5,28,384], index: 1, kind: input, shape index: {}]   ;;  %s5716_s2 = inlined_call_operand.vmem [shape: f32[1,192], index: 2, kind: input, shape index: {}]   ;;  %s5717_s3 = inlined_call_operand.hbm [shape: f32[5,192,256], index: 3, kind: input, shape index: {}]   ;;  %s5718_s4 = inlined_call_operand.vmem [shape: f32[1,128], index: 4, kind: input, shape index: {}]   ;;  %s5719_s5 = inlined_call_operand.vmem [shape: f32[4,128,64], index: 5, kind: input, shape index: {}]   ;;  %s5720_s6 = inlined_call_operand.vmem [shape: f32[1,64], index: 6, kind: input, shape index: {}]   ;;  %s5721_s7 = inlined_call_operand.vmem [shape: f32[64,10], index: 7, kind: input, shape index: {}]   ;;  %s5722_s8 = inlined_call_operand.vmem [shape: f32[1,10], index: 8, kind: input, shape index: {}]   ;;  %s5723_s9 = inlined_call_operand.hbm [shape: f32[2,10], index: 9, kind: output, shape index: {}]  }
   0x1   :  { %15 = vsyncpa [#allocation4], 0  ;;  %s4053_s30 = smov [#allocation2]  }
   0x2   :  { %s27_s10 = sshll.u32 %s4053_s30, 4  ;;  %s28_s10 = int_to_ptr.vmem [resolvable:$true] %s27_s10 }
   0x3   :  { %s4017_s11 = scalar_lea.vmem %s28_s10, 30720  ;;  %p4022_p1 = scmp.lt.s32.totalorder %s28_s10, %s28_s10 }
   0x4   :  { %p4018_p0 = scmp.ne.s32.totalorder %s28_s10, %s4017_s11  ;;  %p4023_p2 = scmp.lt.s32.totalorder %s4017_s11, %s4017_s11 }
   0x6   :  { %p4024_p3 = por %p4023_p2, %p4022_p1 }
   0x8   :  { %p4025_p4 = pnand %p4024_p3, %p4018_p0 }
   0xa   :  { %4028 = shalt.err (!%p4025_p4)
}
   0xb   :  { %s4054_s12 = smov 256   ;;  %s4055_s13 = smov 16  }
   0xc   :  { %33 = dma.hbm_to_vmem [thread:$0]  %s5717_s3, 30720, %s28_s10, [#allocation3], %s4054_s12, %s4054_s12, %s4055_s13  }
   0xd   :  { %4049 = dma.done.wait [#allocation3], 30720  }
   0xe   :  { %4050 = vsyncadd [#allocation3], 4294936576  ;;  %v5724_v0 = vmov 0.0   ;;  %vm116_vm0 = vcmask 1043456   ;;  %v3419_v1 = vld [vmem:[%s5715_s1 + $0xb0] sm:$0xf] }
   0xf   :  { %190 = vmatprep.mubr.f32.mxu0 %v5724_v0  ;;  %v3420_v2 = vld [vmem:[%s5715_s1 + $0xb8] sm:$0xf]  ;;  %v3418_v3 = vld [vmem:[%s5715_s1 + $0xa8] sm:$0xf]  ;;  %3421 = vmatprep.subr.msk.mxu0 %vm116_vm0, %v3419_v1  ;;  %v3417_v5 = vld [vmem:[%s5715_s1 + $0xa0] sm:$0xff]  ;;  %vm75_vm1 = vcmask 1046528  }
  0x10   :  { %3753 = vmatprep.subr.msk.mxu1 %vm116_vm0, %v3420_v2  ;;  %v3416_v4 = vld [vmem:[%s5715_s1 + $0x98] sm:$0xff]  ;;  %v3415_v6 = vld [vmem:[%s5715_s1 + $0x90] sm:$0xff]  ;;  %3422 = vmatpush1.msk.msra.mxu0 %vm116_vm0, %v3418_v3  ;;  %v3413_v7 = vld [vmem:[%s5715_s1 + $0x80] sm:$0xff]  ;;  %vm103_vm2 = vcmask 228352   ;;  %vm539_vm3 = vcmask 1045504   ;;  %vm802_vm4 = vcmask 1044480  }
  0x11   :  { %3754 = vmatpush3.msk.msra.mxu1 %vm116_vm0, %v3420_v2  ;;  %v3414_v8 = vld [vmem:[%s5715_s1 + $0x88] sm:$0xff]  ;;  %152 = vmatprep.subr.mxu0 %v3416_v4  ;;  %v3412_v9 = vld [vmem:[%s5715_s1 + $0x78] sm:$0xff]  ;;  %v3411_v11 = vld [vmem:[%s5715_s1 + $0x70] sm:$0xff]  ;;  %vm1363_vm5 = vcmask 523264   ;;  %vm1963_vm6 = vcmask 1041409   ;;  %vm1965_vm7 = vcmask 1042434  }
  0x12   :  { %3755 = vmatprep.subr.mxu1 %v3417_v5  ;;  %v3410_v10 = vld [vmem:[%s5715_s1 + $0x68] sm:$0xff]  ;;  %153 = vmatpush1.msra.mxu0 %v3415_v6  ;;  %v4155_v12 = vld [vmem:[%s5714_s0] sm:$0xff]  ;;  %v4165_v14 = vld [vmem:[%s5714_s0 + $0x10] sm:$0xff]  ;;  %vm1967_vm8 = vcmask 1043459   ;;  %vm1969_vm9 = vcmask 1044484   ;;  %vm1971_vm10 = vcmask 1045509  }
  0x13   :  { %3756 = vmatpush3.msra.mxu1 %v3417_v5  ;;  %v4160_v13 = vld [vmem:[%s5714_s0 + $0x8] sm:$0xff]  ;;  %154 = vmatprep.subr.mxu0 %v3413_v7  ;;  %v3409_v15 = vld [vmem:[%s5715_s1 + $0x60] sm:$0xff]  ;;  %v76_v16 = vrot.slane %v4155_v12, 1  ;;  %v79_v18 = vrot.slane %v4165_v14, 1  ;;  %v4181_v20 = vld [vmem:[%s5714_s0 + $0x18] sm:$0xf] }
  0x14   :  { %3757 = vmatprep.subr.mxu1 %v3414_v8  ;;  %v77_v17 = vrot.slane %v4160_v13, 1  ;;  %v4176_v19 = vld [vmem:[%s5714_s0 + $0x20] sm:$0xff]  ;;  %155 = vmatpush1.msra.mxu0 %v3412_v9  ;;  %v4186_v21 = vld [vmem:[%s5714_s0 + $0x28] sm:$0xff]  ;;  %v66_v25 = vld [vmem:[%s5715_s1 + $0x58] sm:$0xf]  ;;  %v81_v26 = vrot.slane %v4181_v20, 1 }
  0x15   :  { %3758 = vmatpush3.msra.mxu1 %v3414_v8  ;;  %v83_v22 = vrot.slane %v4176_v19, 1  ;;  %156 = vmatprep.subr.mxu0 %v3410_v10  ;;  %v84_v27 = vrot.slane %v4186_v21, 1  ;;  %v4199_v28 = vld [vmem:[%s5714_s0 + $0x30] sm:$0xff]  ;;  %v4204_v29 = vld [vmem:[%s5714_s0 + $0x38] sm:$0xf]  ;;  %v63_v37 = vld [vmem:[%s5715_s1 + $0x40] sm:$0xff] }
  0x16   :  { %3759 = vmatprep.subr.mxu1 %v3411_v11  ;;  %v78_v23 = vsel %vm75_vm1, %v76_v16, %v77_v17  ;;  %v80_v24 = vsel %vm75_vm1, %v77_v17, %v79_v18  ;;  %157 = vmatpush1.msra.mxu0 %v3409_v15  ;;  %v82_v30 = vsel %vm75_vm1, %v79_v18, %v81_v26  ;;  %v65_v31 = vld [vmem:[%s5715_s1 + $0x50] sm:$0xf]  ;;  %v86_v32 = vrot.slane %v4199_v28, 1  ;;  %v64_v33 = vld [vmem:[%s5715_s1 + $0x48] sm:$0xf]  ;;  %v62_v35 = vld [vmem:[%s5715_s1 + $0x38] sm:$0xff] }
  0x17   :  { %3760 = vmatpush3.msra.mxu1 %v3411_v11  ;;  %3761 = vmatprep.mubr.msk.f32.mxu1 %vm103_vm2, %v78_v23  ;;  %v85_v34 = vsel %vm75_vm1, %v83_v22, %v84_v27  ;;  %v88_v36 = vrot.slane %v4204_v29, 1  ;;  %v61_v39 = vld [vmem:[%s5715_s1 + $0x30] sm:$0xff]  ;;  %v59_v40 = vld [vmem:[%s5715_s1 + $0x20] sm:$0xff]  ;;  %v58_v42 = vld [vmem:[%s5715_s1 + $0x18] sm:$0xff]  ;;  %v1065_v44 = vrot.slane %v4155_v12, 4  ;;  %v1066_v45 = vrot.slane %v4160_v13, 4 }
  0x18   :  { %3423 = vmatmul.mubr.msk.f32.vlgmr.msra.gmra.mxu0 %vm103_vm2, %v78_v23  ;;  %3762 = vmatmul.mubr.msk.f32.vlgmr.msra.gmra.mxu1 %vm103_vm2, %v80_v24  ;;  %v87_v38 = vsel %vm75_vm1, %v84_v27, %v86_v32  ;;  %v56_v43 = vld [vmem:[%s5715_s1 + $0x8] sm:$0xff]  ;;  %v1068_v46 = vrot.slane %v4165_v14, 4  ;;  %v55_v47 = vld [vmem:[%s5715_s1] sm:$0xff]  ;;  %v1070_v49 = vrot.slane %v4181_v20, 4  ;;  %v1072_v52 = vrot.slane %v4176_v19, 4  ;;  %v57_v59 = vld [vmem:[%s5715_s1 + $0x10] sm:$0xff] }
  0x19   :  { %3770 = vmatprep.subr.msk.mxu0 %vm116_vm0, %v66_v25  ;;  %196 = vmatprep.mubr.f32.mxu0 %v5724_v0  ;;  %v89_v41 = vsel %vm75_vm1, %v86_v32, %v88_v36  ;;  %v60_v48 = vld [vmem:[%s5715_s1 + $0x28] sm:$0xff]  ;;  %v4263_v50 = vsel %vm116_vm0, %v1065_v44, %v1066_v45  ;;  %v1073_v53 = vrot.slane %v4186_v21, 4  ;;  %v1075_v55 = vrot.slane %v4199_v28, 4  ;;  %v3462_v57 = vld [vmem:[%s5715_s1 + $0x118] sm:$0xf]  ;;  %v3459_v62 = vld [vmem:[%s5715_s1 + $0x100] sm:$0xff] }
  0x1a   :  { %3771 = vmatpush3.msk.msra.mxu0 %vm116_vm0, %v66_v25  ;;  %3764 = vmatprep.mubr.msk.f32.mxu1 %vm103_vm2, %v82_v30  ;;  %v4266_v51 = vsel %vm116_vm0, %v1066_v45, %v1068_v46  ;;  %v4272_v54 = vsel %vm116_vm0, %v1068_v46, %v1070_v49  ;;  %v1077_v56 = vrot.slane %v4204_v29, 4  ;;  %v3461_v63 = vld [vmem:[%s5715_s1 + $0x110] sm:$0xf]  ;;  %v3456_v1 = vld [vmem:[%s5715_s1 + $0xe8] sm:$0xff]  ;;  %v3458_v3 = vld [vmem:[%s5715_s1 + $0xf8] sm:$0xff]  ;;  %v540_v8 = vrot.slane %v4155_v12, 2 }
  0x1b   :  { %3436 = vmatprep.subr.msk.mxu1 %vm116_vm0, %v65_v31  ;;  %3772 = vmatprep.subr.mxu0 %v63_v37  ;;  %v4280_v58 = vsel %vm116_vm0, %v1072_v52, %v1073_v53  ;;  %v4289_v60 = vsel %vm116_vm0, %v1073_v53, %v1075_v55  ;;  %v3460_v2 = vld [vmem:[%s5715_s1 + $0x108] sm:$0xf]  ;;  %v3457_v4 = vld [vmem:[%s5715_s1 + $0xf0] sm:$0xff]  ;;  %v3455_v6 = vld [vmem:[%s5715_s1 + $0xe0] sm:$0xff]  ;;  %v541_v9 = vrot.slane %v4160_v13, 2  ;;  %v543_v11 = vrot.slane %v4165_v14, 2 }
  0x1c   :  { %3424 = vmatmul.mubr.msk.f32.gmra.mxu0 %vm103_vm2, %v80_v24  ;;  %3437 = vmatpush1.msk.msra.mxu1 %vm116_vm0, %v64_v33  ;;  %v4292_v61 = vsel %vm116_vm0, %v1075_v55, %v1077_v56  ;;  %v3453_v5 = vld [vmem:[%s5715_s1 + $0xd0] sm:$0xff]  ;;  %v3454_v7 = vld [vmem:[%s5715_s1 + $0xd8] sm:$0xff]  ;;  %v3452_v10 = vld [vmem:[%s5715_s1 + $0xc8] sm:$0xff]  ;;  %v545_v18 = vrot.slane %v4181_v20, 2  ;;  %v547_v24 = vrot.slane %v4176_v19, 2  ;;  %v548_v25 = vrot.slane %v4186_v21, 2 }
  0x1d   :  { %3765 = vmatmul.mubr.msk.f32.gmra.mxu1 %vm103_vm2, %v85_v34  ;;  %369 = vmatprep.subr.mxu1 %v62_v35  ;;  %v3451_v15 = vld [vmem:[%s5715_s1 + $0xc0] sm:$0xff]  ;;  %v542_v16 = vsel %vm539_vm3, %v540_v8, %v541_v9  ;;  %v3489_v17 = vld [vmem:[%s5715_s1 + $0x178] sm:$0xf]  ;;  %v3488_v22 = vld [vmem:[%s5715_s1 + $0x170] sm:$0xf]  ;;  %v544_v23 = vsel %vm539_vm3, %v541_v9, %v543_v11  ;;  %v550_v26 = vrot.slane %v4199_v28, 2 }
  0x1e   :  { %202 = vmatprep.mubr.f32.mxu0 %v5724_v0  ;;  %3767 = vmatprep.mubr.msk.f32.mxu1 %vm103_vm2, %v87_v38  ;;  %v546_v27 = vsel %vm539_vm3, %v543_v11, %v545_v18  ;;  %v3485_v31 = vld [vmem:[%s5715_s1 + $0x158] sm:$0xff]  ;;  %v3486_v32 = vld [vmem:[%s5715_s1 + $0x160] sm:$0xff]  ;;  %v549_v33 = vsel %vm539_vm3, %v547_v24, %v548_v25  ;;  %v3484_v36 = vld [vmem:[%s5715_s1 + $0x150] sm:$0xff]  ;;  %v806_v44 = vrot.slane %v4165_v14, 3  ;;  %v810_v52 = vrot.slane %v4176_v19, 3 }
  0x1f   :  { %370 = vmatpush1.msra.mxu1 %v61_v39  ;;  %3773 = vmatpush3.msra.mxu0 %v63_v37  ;;  %v551_v35 = vsel %vm539_vm3, %v548_v25, %v550_v26  ;;  %v3482_v37 = vld [vmem:[%s5715_s1 + $0x140] sm:$0xff]  ;;  %v3516_v45 = vld [vmem:[%s5715_s1 + $0x1d8] sm:$0xf]  ;;  %v3480_v46 = vld [vmem:[%s5715_s1 + $0x130] sm:$0xff]  ;;  %v811_v53 = vrot.slane %v4186_v21, 3  ;;  %vm1973_vm11 = vcmask 1046534  }
  0x20   :  { %371 = vmatprep.subr.mxu1 %v59_v40  ;;  %3425 = vmatmul.mubr.msk.f32.gmra.mxu0 %vm103_vm2, %v82_v30  ;;  %v3487_v30 = vld [vmem:[%s5715_s1 + $0x168] sm:$0xf]  ;;  %v803_v40 = vrot.slane %v4155_v12, 3  ;;  %v3515_v49 = vld [vmem:[%s5715_s1 + $0x1d0] sm:$0xf]  ;;  %v1799_v8 = vld [vmem:[#allocation2 + $0x260] sm:$0xff] }
  0x21   :  { %3768 = vmatmul.mubr.msk.f32.gmra.mxu1 %vm103_vm2, %v89_v41  ;;  %208 = vmatprep.mubr.f32.mxu0 %v5724_v0  ;;  %v3510_v55 = vld [vmem:[%s5715_s1 + $0x1a8] sm:$0xff]  ;;  %v1749_v9 = vld [vmem:[#allocation2 + $0xd8] sm:$0xff]  ;;  %v1797_v11 = vld [vmem:[#allocation2 + $0x250] sm:$0xff]  ;;  %vm1975_vm12 = vcmask 1047559   ;;  %vm4059_vm13 = vmmov 0   ;;  %vm3379_vm14 = vcmask 74752  }
  0x22   :  { %372 = vmatpush1.msra.mxu1 %v58_v42  ;;  %407 = vmatprep.mubr.f32.mxu1 %v5724_v0  ;;  %v3481_v42 = vld [vmem:[%s5715_s1 + $0x138] sm:$0xff]  ;;  %v3514_v56 = vld [vmem:[%s5715_s1 + $0x1c8] sm:$0xf]  ;;  %v1793_v24 = vld [vmem:[#allocation2 + $0x230] sm:$0xff] }
  0x23   :  { %373 = vmatprep.subr.mxu1 %v56_v43  ;;  %3774 = vmatprep.subr.mxu0 %v60_v48  ;;  %v3479_v43 = vld [vmem:[%s5715_s1 + $0x128] sm:$0xff]  ;;  %v1745_v18 = vld [vmem:[#allocation2 + $0xb8] sm:$0xff] }
  0x24   :  { %374 = vmatpush1.msra.mxu1 %v55_v47  ;;  %3426 = vmatmul.mubr.msk.f32.gmra.mxu0 %vm103_vm2, %v85_v34  ;;  %v552_v34 = vrot.slane %v4204_v29, 2  ;;  %v808_v47 = vrot.slane %v4181_v20, 3  ;;  %v1743_v25 = vld [vmem:[#allocation2 + $0xa8] sm:$0xff] }
  0x25   :  { %3438 = vmatmul.mubr.msk.f32.vlgmr.msra.gmra.mxu1 %vm103_vm2, %v4155_v12  ;;  %3775 = vmatpush3.msra.mxu0 %v60_v48  ;;  %v3513_v48 = vld [vmem:[%s5715_s1 + $0x1c0] sm:$0xff] }
  0x26   :  { %214 = vmatprep.mubr.f32.mxu0 %v5724_v0  ;;  %413 = vmatprep.mubr.f32.mxu1 %v5724_v0  ;;  %v553_v39 = vsel %vm539_vm3, %v550_v26, %v552_v34  ;;  %v809_v20 = vsel %vm802_vm4, %v806_v44, %v808_v47  ;;  %v1792_v26 = vld [vmem:[#allocation2 + $0x228] sm:$0xff]  ;;  %v1789_v34 = vld [vmem:[#allocation2 + $0x210] sm:$0xff] }
  0x27   :  { %3787 = vmatprep.subr.msk.mxu1 %vm116_vm0, %v3462_v57  ;;  %3776 = vmatprep.subr.mxu0 %v57_v59 }
  0x28   :  { %3788 = vmatpush3.msk.msra.mxu1 %vm116_vm0, %v3462_v57  ;;  %3427 = vmatmul.mubr.msk.f32.gmra.mxu0 %vm103_vm2, %v87_v38  ;;  %v3483_v38 = vld [vmem:[%s5715_s1 + $0x148] sm:$0xff]  ;;  %v3512_v57 = vld [vmem:[%s5715_s1 + $0x1b8] sm:$0xff] }
  0x29   :  { %3439 = vmatmul.mubr.msk.f32.gmra.mxu1 %vm103_vm2, %v4160_v13  ;;  %220 = vmatprep.mubr.f32.mxu0 %v5724_v0 }
  0x2a   :  { %419 = vmatprep.mubr.f32.mxu1 %v5724_v0  ;;  %3777 = vmatpush3.msra.mxu0 %v57_v59  ;;  %v3511_v59 = vld [vmem:[%s5715_s1 + $0x1b0] sm:$0xff] }
  0x2b   :  { %3789 = vmatprep.subr.mxu1 %v3459_v62  ;;  %3463 = vmatprep.subr.msk.mxu0 %vm116_vm0, %v3461_v63  ;;  %v815_v63 = vrot.slane %v4204_v29, 3  ;;  %v3506_v29 = vld [vmem:[%s5715_s1 + $0x188] sm:$0xff] }
  0x2c   :  { %3790 = vmatpush3.msra.mxu1 %v3459_v62  ;;  %3428 = vmatmul.mubr.msk.f32.gmra.mxu0 %vm103_vm2, %v89_v41  ;;  %v804_v41 = vrot.slane %v4160_v13, 3 }
  0x2d   :  { %3440 = vmatmul.mubr.msk.f32.gmra.mxu1 %vm103_vm2, %v4165_v14  ;;  %3778 = vmatprep.mubr.msk.f32.mxu0 %vm103_vm2, %v4155_v12  ;;  %v3478_v12 = vld [vmem:[%s5715_s1 + $0x120] sm:$0xff] }
  0x2e   :  { %425 = vmatprep.mubr.f32.mxu1 %v5724_v0  ;;  %3791 = vmatprep.subr.mxu1 %v3456_v1 }
  0x2f   :  { %3792 = vmatpush3.msra.mxu1 %v3456_v1  ;;  %v3509_v1 = vld [vmem:[%s5715_s1 + $0x1a0] sm:$0xff] }
  0x30   :  { %3779 = vmatmul.mubr.msk.f32.vlgmr.msra.gmra.mxu0 %vm103_vm2, %v4160_v13  ;;  %3793 = vmatprep.subr.mxu1 %v3453_v5  ;;  %v805_v13 = vsel %vm802_vm4, %v803_v40, %v804_v41  ;;  %v1786_v40 = vld [vmem:[#allocation2 + $0x1f8] sm:$0xff] }
  0x31   :  { %3441 = vmatmul.mubr.msk.f32.gmra.mxu1 %vm103_vm2, %v4176_v19  ;;  %3464 = vmatpush1.msk.msra.mxu0 %vm116_vm0, %v3460_v2  ;;  %v3508_v2 = vld [vmem:[%s5715_s1 + $0x198] sm:$0xff] }
  0x32   :  { %431 = vmatprep.mubr.f32.mxu1 %v5724_v0  ;;  %3781 = vmatprep.mubr.msk.f32.mxu0 %vm103_vm2, %v4165_v14  ;;  %v807_v14 = vsel %vm802_vm4, %v804_v41, %v806_v44  ;;  %v1736_v41 = vld [vmem:[#allocation2 + $0x70] sm:$0xff] }
  0x33   :  { %614 = vmatprep.subr.mxu0 %v3458_v3  ;;  %3794 = vmatpush3.msra.mxu1 %v3453_v5  ;;  %v1801_v5 = vld [vmem:[#allocation2 + $0x270] sm:$0xff] }
  0x34   :  { %615 = vmatpush1.msra.mxu0 %v3457_v4  ;;  %3490 = vmatprep.subr.msk.mxu1 %vm116_vm0, %v3488_v22  ;;  %v3505_v4 = vld [vmem:[%s5715_s1 + $0x180] sm:$0xff]  ;;  %v1794_v22 = vld [vmem:[#allocation2 + $0x238] sm:$0xff] }
  0x35   :  { %3442 = vmatmul.mubr.msk.f32.gmra.mxu1 %vm103_vm2, %v4186_v21  ;;  %3782 = vmatmul.mubr.msk.f32.gmra.mxu0 %vm103_vm2, %v4176_v19  ;;  %v812_v19 = vsel %vm802_vm4, %v810_v52, %v811_v53 }
  0x36   :  { %616 = vmatprep.subr.mxu0 %v3455_v6  ;;  %437 = vmatprep.mubr.f32.mxu1 %v5724_v0  ;;  %v1751_v6 = vld [vmem:[#allocation2 + $0xe8] sm:$0xff] }
  0x37   :  { %3784 = vmatprep.mubr.msk.f32.mxu0 %vm103_vm2, %v4186_v21  ;;  %617 = vmatpush1.msra.mxu0 %v3454_v7  ;;  %v813_v21 = vrot.slane %v4199_v28, 3  ;;  %v1800_v7 = vld [vmem:[#allocation2 + $0x268] sm:$0xff] }
  0x38   :  { %618 = vmatprep.subr.mxu0 %v3452_v10  ;;  %v1748_v10 = vld [vmem:[#allocation2 + $0xd0] sm:$0xff] }
  0x39   :  { %3443 = vmatmul.mubr.msk.f32.gmra.mxu1 %vm103_vm2, %v4199_v28  ;;  %3785 = vmatmul.mubr.msk.f32.gmra.mxu0 %vm103_vm2, %v4199_v28  ;;  %v3507_v28 = vld [vmem:[%s5715_s1 + $0x190] sm:$0xff]  ;;  %v814_v62 = vsel %vm802_vm4, %v811_v53, %v813_v21  ;;  %v816_v3 = vsel %vm802_vm4, %v813_v21, %v815_v63  ;;  %s4057_s1 = smov 64  }
  0x3a   :  { %619 = vmatpush1.msra.mxu0 %v3451_v15  ;;  %652 = vmatprep.mubr.f32.mxu0 %v5724_v0  ;;  %v1796_v15 = vld [vmem:[#allocation2 + $0x248] sm:$0xff] }
  0x3b   :  { %3795 = vmatprep.mubr.msk.f32.mxu1 %vm103_vm2, %v542_v16  ;;  %3804 = vmatprep.subr.msk.mxu0 %vm116_vm0, %v3489_v17 }
  0x3d   :  { %3465 = vmatmul.mubr.msk.f32.vlgmr.msra.gmra.mxu0 %vm103_vm2, %v542_v16  ;;  %3796 = vmatmul.mubr.msk.f32.vlgmr.msra.gmra.mxu1 %vm103_vm2, %v544_v23  ;;  %v1746_v16 = vld [vmem:[#allocation2 + $0xc0] sm:$0xff] }
  0x3e   :  { %3805 = vmatpush3.msk.msra.mxu0 %vm116_vm0, %v3489_v17  ;;  %658 = vmatprep.mubr.f32.mxu0 %v5724_v0  ;;  %v1795_v17 = vld [vmem:[#allocation2 + $0x240] sm:$0xff] }
  0x3f   :  { %3798 = vmatprep.mubr.msk.f32.mxu1 %vm103_vm2, %v546_v27  ;;  %3491 = vmatpush1.msk.msra.mxu1 %vm116_vm0, %v3487_v30  ;;  %v1791_v30 = vld [vmem:[#allocation2 + $0x220] sm:$0xff] }
  0x40   :  { %877 = vmatprep.subr.mxu1 %v3485_v31  ;;  %3806 = vmatprep.subr.mxu0 %v3486_v32  ;;  %v1741_v31 = vld [vmem:[#allocation2 + $0x98] sm:$0xff] }
  0x41   :  { %3466 = vmatmul.mubr.msk.f32.gmra.mxu0 %vm103_vm2, %v544_v23  ;;  %3799 = vmatmul.mubr.msk.f32.gmra.mxu1 %vm103_vm2, %v549_v33  ;;  %v1744_v23 = vld [vmem:[#allocation2 + $0xb0] sm:$0xff] }
  0x42   :  { %664 = vmatprep.mubr.f32.mxu0 %v5724_v0  ;;  %3801 = vmatprep.mubr.msk.f32.mxu1 %vm103_vm2, %v551_v35 }
  0x43   :  { %878 = vmatpush1.msra.mxu1 %v3484_v36  ;;  %3807 = vmatpush3.msra.mxu0 %v3486_v32  ;;  %v1790_v32 = vld [vmem:[#allocation2 + $0x218] sm:$0xff]  ;;  %v1788_v36 = vld [vmem:[#allocation2 + $0x208] sm:$0xff] }
  0x44   :  { %879 = vmatprep.subr.mxu1 %v3482_v37  ;;  %3808 = vmatprep.subr.mxu0 %v3483_v38  ;;  %v1738_v37 = vld [vmem:[#allocation2 + $0x80] sm:$0xff] }
  0x45   :  { %3467 = vmatmul.mubr.msk.f32.gmra.mxu0 %vm103_vm2, %v546_v27  ;;  %3802 = vmatmul.mubr.msk.f32.gmra.mxu1 %vm103_vm2, %v553_v39  ;;  %v1742_v27 = vld [vmem:[#allocation2 + $0xa0] sm:$0xff] }
  0x46   :  { %880 = vmatpush1.msra.mxu1 %v3481_v42  ;;  %670 = vmatprep.mubr.f32.mxu0 %v5724_v0 }
  0x47   :  { %881 = vmatprep.subr.mxu1 %v3479_v43  ;;  %915 = vmatprep.mubr.f32.mxu1 %v5724_v0 }
  0x48   :  { %882 = vmatpush1.msra.mxu1 %v3478_v12  ;;  %3809 = vmatpush3.msra.mxu0 %v3483_v38  ;;  %v1787_v38 = vld [vmem:[#allocation2 + $0x200] sm:$0xff] }
  0x49   :  { %3468 = vmatmul.mubr.msk.f32.gmra.mxu0 %vm103_vm2, %v549_v33  ;;  %3492 = vmatmul.mubr.msk.f32.vlgmr.msra.gmra.mxu1 %vm103_vm2, %v805_v13  ;;  %v1740_v33 = vld [vmem:[#allocation2 + $0x90] sm:$0xff] }
  0x4a   :  { %676 = vmatprep.mubr.f32.mxu0 %v5724_v0  ;;  %921 = vmatprep.mubr.f32.mxu1 %v5724_v0 }
  0x4b   :  { %3821 = vmatprep.subr.msk.mxu1 %vm116_vm0, %v3516_v45  ;;  %3810 = vmatprep.subr.mxu0 %v3480_v46 }
  0x4c   :  { %3822 = vmatpush3.msk.msra.mxu1 %vm116_vm0, %v3516_v45  ;;  %3811 = vmatpush3.msra.mxu0 %v3480_v46 }
  0x4d   :  { %3469 = vmatmul.mubr.msk.f32.gmra.mxu0 %vm103_vm2, %v551_v35  ;;  %3493 = vmatmul.mubr.msk.f32.gmra.mxu1 %vm103_vm2, %v807_v14  ;;  %v1739_v35 = vld [vmem:[#allocation2 + $0x88] sm:$0xff] }
  0x4e   :  { %682 = vmatprep.mubr.f32.mxu0 %v5724_v0  ;;  %927 = vmatprep.mubr.f32.mxu1 %v5724_v0 }
  0x4f   :  { %3823 = vmatprep.subr.mxu1 %v3513_v48  ;;  %3517 = vmatprep.subr.msk.mxu0 %vm116_vm0, %v3515_v49 }
  0x50   :  { %3824 = vmatpush3.msra.mxu1 %v3513_v48 }
  0x51   :  { %3470 = vmatmul.mubr.msk.f32.gmra.mxu0 %vm103_vm2, %v553_v39  ;;  %3494 = vmatmul.mubr.msk.f32.gmra.mxu1 %vm103_vm2, %v809_v20  ;;  %v1737_v39 = vld [vmem:[#allocation2 + $0x78] sm:$0xff] }
  0x52   :  { %933 = vmatprep.mubr.f32.mxu1 %v5724_v0  ;;  %3812 = vmatprep.mubr.msk.f32.mxu0 %vm103_vm2, %v805_v13 }
  0x53   :  { %3825 = vmatprep.subr.mxu1 %v3510_v55 }
  0x54   :  { %3826 = vmatpush3.msra.mxu1 %v3510_v55 }
  0x55   :  { %3495 = vmatmul.mubr.msk.f32.gmra.mxu1 %vm103_vm2, %v812_v19  ;;  %3813 = vmatmul.mubr.msk.f32.vlgmr.msra.gmra.mxu0 %vm103_vm2, %v807_v14 }
  0x56   :  { %3518 = vmatpush1.msk.msra.mxu0 %vm116_vm0, %v3514_v56  ;;  %939 = vmatprep.mubr.f32.mxu1 %v5724_v0 }
  0x57   :  { %3815 = vmatprep.mubr.msk.f32.mxu0 %vm103_vm2, %v809_v20  ;;  %1139 = vmatprep.subr.mxu0 %v3512_v57 }
  0x58   :  { %1140 = vmatpush1.msra.mxu0 %v3511_v59  ;;  %3827 = vmatprep.subr.mxu1 %v3507_v28 }
  0x59   :  { %3496 = vmatmul.mubr.msk.f32.gmra.mxu1 %vm103_vm2, %v814_v62  ;;  %3816 = vmatmul.mubr.msk.f32.gmra.mxu0 %vm103_vm2, %v812_v19 }
  0x5a   :  { %1141 = vmatprep.subr.mxu0 %v3509_v1  ;;  %945 = vmatprep.mubr.f32.mxu1 %v5724_v0 }
  0x5b   :  { %3818 = vmatprep.mubr.msk.f32.mxu0 %vm103_vm2, %v814_v62  ;;  %1142 = vmatpush1.msra.mxu0 %v3508_v2 }
  0x5c   :  { %1143 = vmatprep.subr.mxu0 %v3506_v29  ;;  %3828 = vmatpush3.msra.mxu1 %v3507_v28 }
  0x5d   :  { %3497 = vmatmul.mubr.msk.f32.gmra.mxu1 %vm103_vm2, %v816_v3  ;;  %3819 = vmatmul.mubr.msk.f32.gmra.mxu0 %vm103_vm2, %v816_v3 }
  0x5e   :  { %1144 = vmatpush1.msra.mxu0 %v3505_v4  ;;  %1177 = vmatprep.mubr.f32.mxu0 %v5724_v0 }
  0x5f   :  { %3829 = vmatprep.mubr.msk.f32.mxu1 %vm103_vm2, %v4263_v50 }
  0x61   :  { %3519 = vmatmul.mubr.msk.f32.vlgmr.msra.gmra.mxu0 %vm103_vm2, %v4263_v50  ;;  %3830 = vmatmul.mubr.msk.f32.vlgmr.msra.gmra.mxu1 %vm103_vm2, %v4266_v51  ;;  %v1753_v50 = vld [vmem:[#allocation2 + $0xf8] sm:$0xff] }
  0x62   :  { %1183 = vmatprep.mubr.f32.mxu0 %v5724_v0  ;;  %3832 = vmatprep.mubr.msk.f32.mxu1 %vm103_vm2, %v4272_v54 }
  0x63   :  { %2133 = vmatprep.subr.mxu1 %v1753_v50 }
  0x65   :  { %3520 = vmatmul.mubr.msk.f32.gmra.mxu0 %vm103_vm2, %v4266_v51  ;;  %3833 = vmatmul.mubr.msk.f32.gmra.mxu1 %vm103_vm2, %v4280_v58  ;;  %v1802_v51 = vld [vmem:[#allocation2 + $0x278] sm:$0xff] }
  0x66   :  { %1189 = vmatprep.mubr.f32.mxu0 %v5724_v0  ;;  %3835 = vmatprep.mubr.msk.f32.mxu1 %vm103_vm2, %v4289_v60 }
  0x67   :  { %2004 = vmatprep.subr.mxu0 %v1802_v51 }
  0x68   :  { %2005 = vmatpush1.msra.mxu0 %v1801_v5 }
  0x69   :  { %3521 = vmatmul.mubr.msk.f32.gmra.mxu0 %vm103_vm2, %v4272_v54  ;;  %3836 = vmatmul.mubr.msk.f32.gmra.mxu1 %vm103_vm2, %v4292_v61  ;;  %v1752_v54 = vld [vmem:[#allocation2 + $0xf0] sm:$0xff] }
  0x6a   :  { %1195 = vmatprep.mubr.f32.mxu0 %v5724_v0  ;;  %2134 = vmatpush1.msra.mxu1 %v1752_v54 }
  0x6b   :  { %2135 = vmatprep.subr.mxu1 %v1751_v6  ;;  %2006 = vmatprep.subr.mxu0 %v1800_v7 }
  0x6c   :  { %2007 = vmatpush1.msra.mxu0 %v1799_v8 }
  0x6d   :  { %3522 = vmatmul.mubr.msk.f32.gmra.mxu0 %vm103_vm2, %v4280_v58  ;;  %v1750_v58 = vld [vmem:[#allocation2 + $0xe0] sm:$0xff] }
  0x6e   :  { %1201 = vmatprep.mubr.f32.mxu0 %v5724_v0  ;;  %2136 = vmatpush1.msra.mxu1 %v1750_v58 }
  0x6f   :  { %2137 = vmatprep.subr.mxu1 %v1749_v9 }
  0x70   :  { %2138 = vmatpush1.msra.mxu1 %v1748_v10 }
  0x71   :  { %3523 = vmatmul.mubr.msk.f32.gmra.mxu0 %vm103_vm2, %v4289_v60  ;;  %v1798_v60 = vld [vmem:[#allocation2 + $0x258] sm:$0xff] }
  0x72   :  { %1207 = vmatprep.mubr.f32.mxu0 %v5724_v0  ;;  %2008 = vmatprep.subr.mxu0 %v1798_v60 }
  0x73   :  { %2009 = vmatpush1.msra.mxu0 %v1797_v11 }
  0x74   :  { %2010 = vmatprep.subr.mxu0 %v1796_v15 }
  0x75   :  { %3524 = vmatmul.mubr.msk.f32.gmra.mxu0 %vm103_vm2, %v4292_v61  ;;  %v1747_v61 = vld [vmem:[#allocation2 + $0xc8] sm:$0xff] }
  0x76   :  { %2139 = vmatprep.subr.mxu1 %v1747_v61  ;;  %2011 = vmatpush1.msra.mxu0 %v1795_v17 }
  0x77   :  { %2140 = vmatpush1.msra.mxu1 %v1746_v16  ;;  %2012 = vmatprep.subr.mxu0 %v1794_v22 }
  0x78   :  { %2141 = vmatprep.subr.mxu1 %v1745_v18  ;;  %2013 = vmatpush1.msra.mxu0 %v1793_v24 }
  0x79   :  { %2142 = vmatpush1.msra.mxu1 %v1744_v23  ;;  %2014 = vmatprep.subr.mxu0 %v1792_v26 }
  0x7a   :  { %2143 = vmatprep.subr.mxu1 %v1743_v25  ;;  %2015 = vmatpush1.msra.mxu0 %v1791_v30 }
  0x7b   :  { %2144 = vmatpush1.msra.mxu1 %v1742_v27  ;;  %2016 = vmatprep.subr.mxu0 %v1790_v32 }
  0x7c   :  { %2145 = vmatprep.subr.mxu1 %v1741_v31  ;;  %2017 = vmatpush1.msra.mxu0 %v1789_v34 }
  0x7d   :  { %2146 = vmatpush1.msra.mxu1 %v1740_v33  ;;  %2018 = vmatprep.subr.mxu0 %v1788_v36 }
  0x7e   :  { %2147 = vmatprep.subr.mxu1 %v1739_v35  ;;  %2019 = vmatpush1.msra.mxu0 %v1787_v38 }
  0x7f   :  { %2148 = vmatpush1.msra.mxu1 %v1738_v37  ;;  %2020 = vmatprep.subr.mxu0 %v1786_v40 }
  0x80   :  { %2149 = vmatprep.subr.mxu1 %v1737_v39 }
  0x81   :  { %2150 = vmatpush1.msra.mxu1 %v1736_v41 }
  0xd8   :  { %v192_v42 = vpop.f32.mrf.mxu0  ;;  %v4536_v43 = vpop.f32.mrf.mxu1 }
  0xda   :  { %v4538_v12 = vpop.f32.mrf.mxu0  ;;  %v4540_v13 = vpop.f32.mrf.mxu1 }
  0xdc   :  { %v198_v44 = vpop.f32.mrf.mxu0 }
  0xdd   :  { %v4542_v45 = vpop.f32.mrf.mxu1 }
  0xde   :  { %v4544_v46 = vpop.f32.mrf.mxu0 }
  0xdf   :  { %v4546_v14 = vpop.f32.mrf.mxu1 }
  0xe0   :  { %v204_v47 = vpop.f32.mrf.mxu0 }
  0xe1   :  { %v4548_v48 = vpop.f32.mrf.mxu1 }
  0xe2   :  { %v4550_v49 = vpop.f32.mrf.mxu0 }
  0xe3   :  { %v4552_v20 = vpop.f32.mrf.mxu1 }
  0xe4   :  { %v210_v52 = vpop.f32.mrf.mxu0 }
  0xe5   :  { %v409_v53 = vpop.f32.mrf.mxu1 }
  0xe6   :  { %v410_v55 = vadd.f32 %v409_v53, %v192_v42  ;;  %v4554_v19 = vpop.f32.mrf.mxu0 }
  0xe7   :  { %v4556_v21 = vpop.f32.mrf.mxu1 }
  0xe8   :  { %v216_v56 = vpop.f32.mrf.mxu0 }
  0xe9   :  { %v415_v57 = vpop.f32.mrf.mxu1 }
  0xea   :  { %v416_v59 = vadd.f32 %v415_v57, %v198_v44  ;;  %v4558_v28 = vpop.f32.mrf.mxu0 }
  0xeb   :  { %v4560_v62 = vpop.f32.mrf.mxu1 }
  0xec   :  { %v222_v63 = vpop.f32.mrf.mxu0 }
  0xed   :  { %v421_v1 = vpop.f32.mrf.mxu1 }
  0xee   :  { %v422_v2 = vadd.f32 %v421_v1, %v204_v47  ;;  %v4562_v29 = vpop.f32.mrf.mxu0 }
  0xef   :  { %v4564_v3 = vpop.f32.mrf.mxu1 }
  0xf0   :  { %v4566_v50 = vpop.f32.mrf.mxu0 }
  0xf1   :  { %v427_v4 = vpop.f32.mrf.mxu1 }
  0xf2   :  { %v428_v51 = vadd.f32 %v427_v4, %v210_v52  ;;  %v4570_v5 = vpop.f32.mrf.mxu0 }
  0xf3   :  { %v4568_v54 = vpop.f32.mrf.mxu1 }
  0xf5   :  { %v433_v6 = vpop.f32.mrf.mxu1  ;;  %v4572_v7 = vpop.f32.mrf.mxu0 }
  0xf6   :  { %v434_v58 = vadd.f32 %v433_v6, %v216_v56 }
  0xf7   :  { %v4574_v8 = vpop.f32.mrf.mxu1  ;;  %v4576_v9 = vpop.f32.mrf.mxu0 }
  0xf9   :  { %v439_v60 = vpop.f32.mrf.mxu1  ;;  %v4578_v10 = vpop.f32.mrf.mxu0 }
  0xfa   :  { %v440_v11 = vadd.f32 %v439_v60, %v222_v63 }
  0xfb   :  { %v4580_v61 = vpop.f32.mrf.mxu1  ;;  %v4582_v15 = vpop.f32.mrf.mxu0 }
  0xfd   :  { %v654_v16 = vpop.f32.mrf.mxu0  ;;  %v4584_v17 = vpop.f32.mrf.mxu1 }
  0xfe   :  { %v784_v18 = vadd.f32 %v654_v16, %v410_v55  ;;  %v1785_v16 = vld [vmem:[#allocation2 + $0x1f0] sm:$0xff] }
  0xff   :  { %v4586_v22 = vpop.f32.mrf.mxu0  ;;  %v4588_v23 = vpop.f32.mrf.mxu1  ;;  %2021 = vmatpush1.msra.mxu0 %v1785_v16  ;;  %v1781_v16 = vld [vmem:[#allocation2 + $0x1d0] sm:$0xff] }
 0x101   :  { %v660_v24 = vpop.f32.mrf.mxu0  ;;  %v4590_v25 = vpop.f32.mrf.mxu1 }
 0x102   :  { %v787_v26 = vadd.f32 %v660_v24, %v416_v59  ;;  %v1784_v24 = vld [vmem:[#allocation2 + $0x1e8] sm:$0xff] }
 0x103   :  { %v4592_v27 = vpop.f32.mrf.mxu0  ;;  %v4594_v30 = vpop.f32.mrf.mxu1  ;;  %2022 = vmatprep.subr.mxu0 %v1784_v24 }
 0x105   :  { %v666_v31 = vpop.f32.mrf.mxu0  ;;  %v4596_v32 = vpop.f32.mrf.mxu1 }
 0x106   :  { %v790_v33 = vadd.f32 %v666_v31, %v422_v2  ;;  %v1734_v31 = vld [vmem:[#allocation2 + $0x60] sm:$0xff] }
 0x107   :  { %v4598_v34 = vpop.f32.mrf.mxu0  ;;  %v4600_v35 = vpop.f32.mrf.mxu1 }
 0x109   :  { %v672_v36 = vpop.f32.mrf.mxu0  ;;  %v917_v37 = vpop.f32.mrf.mxu1 }
 0x10a   :  { %v793_v38 = vadd.f32 %v672_v36, %v428_v51  ;;  %v4602_v39 = vadd.f32 %v917_v37, %v784_v18  ;;  %v1735_v18 = vld [vmem:[#allocation2 + $0x68] sm:$0xff]  ;;  %v1733_v36 = vld [vmem:[#allocation2 + $0x58] sm:$0xff] }
 0x10b   :  { %v4604_v40 = vpop.f32.mrf.mxu0  ;;  %v4606_v41 = vpop.f32.mrf.mxu1  ;;  %2151 = vmatprep.subr.mxu1 %v1735_v18  ;;  %v1731_v18 = vld [vmem:[#allocation2 + $0x48] sm:$0xff] }
 0x10c   :  { %2152 = vmatpush1.msra.mxu1 %v1734_v31  ;;  %v1730_v31 = vld [vmem:[#allocation2 + $0x40] sm:$0xff] }
 0x10d   :  { %v678_v42 = vpop.f32.mrf.mxu0  ;;  %v923_v44 = vpop.f32.mrf.mxu1  ;;  %2153 = vmatprep.subr.mxu1 %v1733_v36  ;;  %v1779_v36 = vld [vmem:[#allocation2 + $0x1c0] sm:$0xff] }
 0x10e   :  { %v796_v47 = vadd.f32 %v678_v42, %v434_v58  ;;  %v4608_v52 = vadd.f32 %v923_v44, %v787_v26  ;;  %v1732_v42 = vld [vmem:[#allocation2 + $0x50] sm:$0xff] }
 0x10f   :  { %v4610_v53 = vpop.f32.mrf.mxu0  ;;  %v4612_v55 = vpop.f32.mrf.mxu1  ;;  %2154 = vmatpush1.msra.mxu1 %v1732_v42 }
 0x110   :  { %2155 = vmatprep.subr.mxu1 %v1731_v18 }
 0x111   :  { %v684_v56 = vpop.f32.mrf.mxu0  ;;  %v929_v57 = vpop.f32.mrf.mxu1  ;;  %2156 = vmatpush1.msra.mxu1 %v1730_v31 }
 0x112   :  { %v799_v59 = vadd.f32 %v684_v56, %v440_v11  ;;  %v4614_v63 = vadd.f32 %v929_v57, %v790_v33  ;;  %v1783_v33 = vld [vmem:[#allocation2 + $0x1e0] sm:$0xff] }
 0x113   :  { %v4616_v1 = vpop.f32.mrf.mxu0  ;;  %v4618_v2 = vpop.f32.mrf.mxu1  ;;  %2023 = vmatpush1.msra.mxu0 %v1783_v33 }
 0x115   :  { %v935_v4 = vpop.f32.mrf.mxu1  ;;  %v4620_v51 = vpop.f32.mrf.mxu0 }
 0x116   :  { %v4622_v6 = vadd.f32 %v935_v4, %v793_v38  ;;  %v1782_v38 = vld [vmem:[#allocation2 + $0x1d8] sm:$0xff] }
 0x117   :  { %v4624_v58 = vpop.f32.mrf.mxu1  ;;  %v4626_v60 = vpop.f32.mrf.mxu0  ;;  %2024 = vmatprep.subr.mxu0 %v1782_v38  ;;  %v1729_v38 = vld [vmem:[#allocation2 + $0x38] sm:$0xff] }
 0x118   :  { %2025 = vmatpush1.msra.mxu0 %v1781_v16  ;;  %2157 = vmatprep.subr.mxu1 %v1729_v38  ;;  %v511_v16 = vadd.f32 %v4570_v5, %v4540_v13  ;;  %v1727_v38 = vld [vmem:[#allocation2 + $0x28] sm:$0xff]  ;;  %v516_v13 = vadd.f32 %v4566_v50, %v4536_v43  ;;  %v1725_v43 = vld [vmem:[#allocation2 + $0x18] sm:$0xff] }
 0x119   :  { %v941_v26 = vpop.f32.mrf.mxu1  ;;  %v4628_v11 = vpop.f32.mrf.mxu0 }
 0x11a   :  { %v4630_v37 = vadd.f32 %v941_v26, %v796_v47  ;;  %v412_v47 = vadd.f32 %v4556_v21, %v4538_v12  ;;  %v1780_v26 = vld [vmem:[#allocation2 + $0x1c8] sm:$0xff]  ;;  %v1728_v12 = vld [vmem:[#allocation2 + $0x30] sm:$0xff] }
 0x11b   :  { %v4632_v44 = vpop.f32.mrf.mxu1  ;;  %v4634_v56 = vpop.f32.mrf.mxu0  ;;  %2026 = vmatprep.subr.mxu0 %v1780_v26  ;;  %2158 = vmatpush1.msra.mxu1 %v1728_v12  ;;  %v1774_v12 = vld [vmem:[#allocation2 + $0x198] sm:$0xff] }
 0x11c   :  { %v785_v42 = vadd.f32 %v4586_v22, %v412_v47  ;;  %2027 = vmatpush1.msra.mxu0 %v1779_v36  ;;  %v786_v47 = vadd.f32 %v4588_v23, %v511_v16  ;;  %2159 = vmatprep.subr.mxu1 %v1727_v38  ;;  %v521_v16 = vadd.f32 %v4576_v9, %v4546_v14  ;;  %v1773_v38 = vld [vmem:[#allocation2 + $0x190] sm:$0xff] }
 0x11d   :  { %v947_v57 = vpop.f32.mrf.mxu1  ;;  %v4636_v4 = vpop.f32.mrf.mxu0 }
 0x11e   :  { %5726 = vst [vmem:[#allocation8_spill] sm:$0xff] %v4636_v4  ;;  %v4640_v24 = vadd.f32 %v947_v57, %v799_v59  ;;  %v1778_v4 = vld [vmem:[#allocation2 + $0x1b8] sm:$0xff]  ;;  %v418_v57 = vadd.f32 %v4560_v62, %v4544_v46  ;;  %v1048_v18 = vadd.f32 %v4606_v41, %v785_v42  ;;  %v424_v46 = vadd.f32 %v4564_v3, %v4550_v49  ;;  %v1726_v41 = vld [vmem:[#allocation2 + $0x20] sm:$0xff] }
 0x11f   :  { %v4642_v0 = vpop.f32.mrf.mxu1  ;;  %v4644_v33 = vpop.f32.mrf.mxu0  ;;  %2028 = vmatprep.subr.mxu0 %v1778_v4  ;;  %v1777_v4 = vld [vmem:[#allocation2 + $0x1b0] sm:$0xff]  ;;  %v1775_v49 = vld [vmem:[#allocation2 + $0x1a0] sm:$0xff]  ;;  %v789_v3 = vadd.f32 %v4584_v17, %v516_v13  ;;  %2160 = vmatpush1.msra.mxu1 %v1726_v41  ;;  %v442_v41 = vadd.f32 %v4580_v61, %v4562_v29  ;;  %v1767_v61 = vld [vmem:[#allocation2 + $0x168] sm:$0xff] }
 0x120   :  { %v788_v31 = vadd.f32 %v4592_v27, %v418_v57  ;;  %2029 = vmatpush1.msra.mxu0 %v1777_v4  ;;  %v1049_v27 = vadd.f32 %v4626_v60, %v786_v47  ;;  %2161 = vmatprep.subr.mxu1 %v1725_v43  ;;  %v1817_v29 = vld [vmem:[#allocation2 + $0x2f0] sm:$0xff] }
 0x121   :  { %v1179_v21 = vpop.f32.mrf.mxu0  ;;  %v3831_v59 = vpop.f32.mrf.mxu1  ;;  %v1052_v47 = vadd.f32 %v4620_v51, %v789_v3  ;;  %v1816_v3 = vld [vmem:[#allocation2 + $0x2e8] sm:$0xff] }
 0x122   :  { %v4653_v26 = vadd.f32 %v1179_v21, %v4602_v39  ;;  %v1776_v39 = vld [vmem:[#allocation2 + $0x1a8] sm:$0xff]  ;;  %v1051_v23 = vadd.f32 %v4612_v55, %v788_v31  ;;  %v1724_v21 = vld [vmem:[#allocation2 + $0x10] sm:$0xff]  ;;  %v791_v55 = vadd.f32 %v4598_v34, %v424_v46 }
 0x123   :  { %v1181_v22 = vpop.f32.mrf.mxu0  ;;  %v1280_v62 = vpop.f32.mrf.mxu1  ;;  %2030 = vmatprep.subr.mxu0 %v1776_v39  ;;  %2162 = vmatpush1.msra.mxu1 %v1724_v21  ;;  %v1723_v46 = vld [vmem:[#allocation2 + $0x8] sm:$0xff]  ;;  %v1768_v39 = vld [vmem:[#allocation2 + $0x170] sm:$0xff]  ;;  %v1765_v21 = vld [vmem:[#allocation2 + $0x158] sm:$0xff] }
 0x124   :  { %v4657_v36 = vadd.f32 %v1181_v22, %v1048_v18  ;;  %2031 = vmatpush1.msra.mxu0 %v1775_v49  ;;  %v1311_v60 = vadd.f32 %v1280_v62, %v1049_v27  ;;  %v1054_v22 = vadd.f32 %v4618_v2, %v791_v55  ;;  %v526_v2 = vadd.f32 %v4572_v7, %v4542_v45  ;;  %v1772_v45 = vld [vmem:[#allocation2 + $0x188] sm:$0xff]  ;;  %v1722_v7 = vld [vmem:[#allocation2] sm:$0xff] }
 0x125   :  { %v1185_v5 = vpop.f32.mrf.mxu0  ;;  %2032 = vmatprep.subr.mxu0 %v1774_v12  ;;  %v3834_v18 = vpop.f32.mrf.mxu1  ;;  %2163 = vmatprep.subr.mxu1 %v1723_v46  ;;  %v536_v55 = vadd.f32 %v4578_v10, %v4548_v48  ;;  %v1813_v48 = vld [vmem:[#allocation2 + $0x2d0] sm:$0xff]  ;;  %v1763_v10 = vld [vmem:[#allocation2 + $0x148] sm:$0xff] }
 0x126   :  { %v4666_v42 = vadd.f32 %v1185_v5, %v4608_v52  ;;  %1339 = vrot.lane.b32.xlu0 %v4657_v36, %s4057_s1  ;;  %v430_v52 = vadd.f32 %v4568_v54, %v4554_v19  ;;  %v792_v19 = vadd.f32 %v4594_v30, %v521_v16  ;;  %v1314_v54 = vadd.f32 %v3831_v59, %v1052_v47  ;;  %v1769_v59 = vld [vmem:[#allocation2 + $0x178] sm:$0xff]  ;;  %v1764_v16 = vld [vmem:[#allocation2 + $0x150] sm:$0xff]  ;;  %v1808_v46 = vld [vmem:[#allocation2 + $0x2a8] sm:$0xff] }
 0x127   :  { %v1187_v50 = vpop.f32.mrf.mxu0  ;;  %v1290_v51 = vpop.f32.mrf.mxu1  ;;  %2033 = vmatpush1.msra.mxu0 %v1773_v38  ;;  %2164 = vmatpush1.msra.mxu1 %v1722_v7  ;;  %v801_v47 = vadd.f32 %v4596_v32, %v536_v55  ;;  %v1760_v32 = vld [vmem:[#allocation2 + $0x130] sm:$0xff]  ;;  %v1759_v38 = vld [vmem:[#allocation2 + $0x128] sm:$0xff]  ;;  %v1806_v7 = vld [vmem:[#allocation2 + $0x298] sm:$0xff] }
 0x128   :  { %v4672_v57 = vadd.f32 %v1187_v50, %v1051_v23  ;;  %v794_v14 = vadd.f32 %v4604_v40, %v430_v52  ;;  %v1055_v62 = vadd.f32 %v4634_v56, %v792_v19  ;;  %v1771_v40 = vld [vmem:[#allocation2 + $0x180] sm:$0xff]  ;;  %2034 = vmatprep.subr.mxu0 %v1772_v45  ;;  %2181 = vmatprep.subr.mxu1 %v1769_v59  ;;  %v1757_v45 = vld [vmem:[#allocation2 + $0x118] sm:$0xff]  ;;  %v1804_v59 = vld [vmem:[#allocation2 + $0x288] sm:$0xff] }
 0x129   :  { %v1191_v17 = vpop.f32.mrf.mxu0  ;;  %v3837_v23 = vpop.f32.mrf.mxu1  ;;  %2035 = vmatpush1.msra.mxu0 %v1771_v40  ;;  %2182 = vmatpush2.msra.mxu1 %v1768_v39  ;;  %v1766_v50 = vld [vmem:[#allocation2 + $0x160] sm:$0xff]  ;;  %v1755_v40 = vld [vmem:[#allocation2 + $0x108] sm:$0xff]  ;;  %v2242_v39 = vld [vmem:[#allocation2 + $0x3f8] sm:$0xff] }
 0x12a   :  { %v4681_v34 = vadd.f32 %v1191_v17, %v4614_v63  ;;  %1343 = vrot.lane.b32.xlu1 %v4672_v57, %s4057_s1  ;;  %1341 = vrot.lane.b32.xlu0 %v1311_v60, %s4057_s1  ;;  %v436_v63 = vadd.f32 %v4574_v8, %v4558_v28  ;;  %v1057_v13 = vadd.f32 %v4624_v58, %v794_v14  ;;  %v1761_v14 = vld [vmem:[#allocation2 + $0x138] sm:$0xff] }
 0x12b   :  { %v1193_v31 = vpop.f32.mrf.mxu0  ;;  %v795_v28 = vadd.f32 %v4590_v25, %v526_v2  ;;  %v1317_v56 = vadd.f32 %v1290_v51, %v1055_v62  ;;  %v531_v25 = vadd.f32 %v4582_v15, %v4552_v20  ;;  %2183 = vmatprep.subr.mxu1 %v1767_v61  ;;  %v1300_v60 = vpop.f32.mrf.mxu1  ;;  %v1807_v62 = vld [vmem:[#allocation2 + $0x2a0] sm:$0xff] }
 0x12c   :  { %v4688_v9 = vadd.f32 %v1193_v31, %v1054_v22  ;;  %v797_v58 = vadd.f32 %v4610_v53, %v436_v63  ;;  %2184 = vmatpush2.msra.mxu1 %v1766_v50  ;;  %v1810_v63 = vld [vmem:[#allocation2 + $0x2b8] sm:$0xff] }
 0x12d   :  { %v1197_v4 = vpop.f32.mrf.mxu0  ;;  %v1058_v49 = vadd.f32 %v4628_v11, %v795_v28  ;;  %v798_v20 = vadd.f32 %v4600_v35, %v531_v25  ;;  %v800_v11 = vadd.f32 %v4616_v1, %v442_v41  ;;  %v1814_v35 = vld [vmem:[#allocation2 + $0x2d8] sm:$0xff]  ;;  %2185 = vmatprep.subr.mxu1 %v1765_v21  ;;  %v1756_v28 = vld [vmem:[#allocation2 + $0x110] sm:$0xff]  ;;  %v1411_v41 = vlaneseq }
 0x12e   :  { %v4697_v30 = vadd.f32 %v1197_v4, %v4622_v6  ;;  %1345 = vrot.lane.b32.xlu1 %v1314_v54, %s4057_s1  ;;  %1347 = vrot.lane.b32.xlu0 %v4688_v9, %s4057_s1  ;;  %v1818_v6 = vld [vmem:[#allocation2 + $0x2f8] sm:$0xff]  ;;  %v1060_v53 = vadd.f32 %v4632_v44, %v797_v58  ;;  %v5727_v54 = vld [vmem:[#allocation8_spill] sm:$0xff]  ;;  %v1809_v4 = vld [vmem:[#allocation2 + $0x2b0] sm:$0xff] }
 0x12f   :  { %v1199_v8 = vpop.f32.mrf.mxu0  ;;  %2052 = vmatprep.subr.mxu0 %v1818_v6  ;;  %v1320_v44 = vadd.f32 %v3834_v18, %v1058_v49  ;;  %v1063_v17 = vadd.f32 %v4642_v0, %v800_v11  ;;  %v1061_v1 = vadd.f32 %v4644_v33, %v798_v20  ;;  %2186 = vmatpush2.msra.mxu1 %v1764_v16  ;;  %v1812_v0 = vld [vmem:[#allocation2 + $0x2c8] sm:$0xff]  ;;  %v1811_v33 = vld [vmem:[#allocation2 + $0x2c0] sm:$0xff]  ;;  %v2424_v6 = vld [vmem:[#allocation2 + $0x578] sm:$0xff]  ;;  %v1412_v25 = vshrl.u32 %v1411_v41, 7 }
 0x130   :  { %v4704_v5 = vadd.f32 %v1199_v8, %v1057_v13  ;;  %2053 = vmatpush2.msra.mxu0 %v1817_v29  ;;  %2187 = vmatprep.subr.mxu1 %v1763_v10  ;;  %v1064_v2 = vadd.f32 %v5727_v54, %v801_v47  ;;  %v1758_v13 = vld [vmem:[#allocation2 + $0x120] sm:$0xff]  ;;  %v1805_v8 = vld [vmem:[#allocation2 + $0x290] sm:$0xff] }
 0x131   :  { %v1203_v27 = vpop.f32.mrf.mxu0  ;;  %2054 = vmatprep.subr.mxu0 %v1816_v3  ;;  %v1323_v31 = vadd.f32 %v1300_v60, %v1061_v1  ;;  %v1754_v58 = vld [vmem:[#allocation2 + $0x100] sm:$0xff] }
 0x132   :  { %v4713_v43 = vadd.f32 %v1203_v27, %v4630_v37  ;;  %1349 = vrot.lane.b32.xlu1 %v1317_v56, %s4057_s1  ;;  %1351 = vrot.lane.b32.xlu0 %v4704_v5, %s4057_s1  ;;  %v1815_v37 = vld [vmem:[#allocation2 + $0x2e0] sm:$0xff]  ;;  %v1326_v51 = vadd.f32 %v3837_v23, %v1064_v2  ;;  %v4740_v23 = vsub.s32 0, %v1412_v25  ;;  %v1642_v27 = vsub.s32 1, %v1412_v25 }
 0x133   :  { %v1205_v15 = vpop.f32.mrf.mxu0  ;;  %2055 = vmatpush2.msra.mxu0 %v1815_v37  ;;  %v1803_v56 = vld [vmem:[#allocation2 + $0x280] sm:$0xff] }
 0x134   :  { %v4720_v12 = vadd.f32 %v1205_v15, %v1060_v53  ;;  %2056 = vmatprep.subr.mxu0 %v1814_v35  ;;  %v1634_v49 = vld [vmem:[%s5716_s2] sm:$0x3]  ;;  %v4058_v53 = vmov 1983009808  }
 0x135   :  { %v1209_v52 = vpop.f32.mrf.mxu0  ;;  %2057 = vmatpush2.msra.mxu0 %v1813_v48  ;;  %v1409_v29 = vunpack.c.l.s4 %v4058_v53  ;;  %v1639_v61 = vrot.slane %v1634_v49, %v4740_v23  ;;  %v1643_v20 = vrot.slane %v1634_v49, %v1642_v27 }
 0x136   :  { %v4727_v18 = vadd.f32 %v1209_v52, %v4640_v24  ;;  %1353 = vrot.lane.b32.xlu1 %v1320_v44, %s4057_s1  ;;  %1355 = vrot.lane.b32.xlu0 %v4720_v12, %s4057_s1  ;;  %v1762_v24 = vld [vmem:[#allocation2 + $0x140] sm:$0xff] }
 0x137   :  { %v1211_v22 = vpop.f32.mrf.mxu0  ;;  %2058 = vmatprep.subr.mxu0 %v1812_v0  ;;  %2188 = vmatpush2.msra.mxu1 %v1762_v24  ;;  %v1410_v15 = vunpack.c.0.s8 %v1409_v29  ;;  %v1644_v3 = vcombine.low %v1639_v61, %v1643_v20  ;;  %v1645_v44 = vcombine.high %v1639_v61, %v1643_v20 }
 0x138   :  { %v4733_v19 = vadd.f32 %v1211_v22, %v1063_v17  ;;  %2059 = vmatpush2.msra.mxu0 %v1811_v33  ;;  %2189 = vmatprep.subr.mxu1 %v1761_v14  ;;  %v4776_v14 = vsub.s32 2, %v1412_v25 }
 0x139   :  { %2060 = vmatprep.subr.mxu0 %v1810_v63  ;;  %2190 = vmatpush2.msra.mxu1 %v1760_v32  ;;  %v4746_v11 = vsub.s32 %v1410_v15, %v1412_v25 }
 0x13a   :  { %1357 = vrot.lane.b32.xlu1 %v1323_v31, %s4057_s1  ;;  %1359 = vrot.lane.b32.xlu0 %v4733_v19, %s4057_s1 }
 0x13b   :  { %2061 = vmatpush2.msra.mxu0 %v1809_v4  ;;  %2191 = vmatprep.subr.mxu1 %v1759_v38  ;;  %v4749_v37 = vrot.slane %v1644_v3, %v4746_v11  ;;  %v4754_v35 = vrot.slane %v1645_v44, %v4746_v11 }
 0x13c   :  { %2062 = vmatprep.subr.mxu0 %v1808_v46  ;;  %2192 = vmatpush2.msra.mxu1 %v1758_v13 }
 0x13d   :  { %2063 = vmatpush2.msra.mxu0 %v1807_v62  ;;  %2193 = vmatprep.subr.mxu1 %v1757_v45  ;;  %v4759_v17 = vcombine.high %v4749_v37, %v4749_v37  ;;  %v4763_v10 = vcombine.high %v4754_v35, %v4754_v35  ;;  %v4771_v24 = vrot.slane %v4749_v37, 1  ;;  %v4779_v54 = vrot.slane %v4754_v35, 1 }
 0x13e   :  { %1361 = vrot.lane.b32.xlu1 %v1326_v51, %s4057_s1  ;;  %2064 = vmatprep.subr.mxu0 %v1806_v7 }
 0x13f   :  { %2194 = vmatpush2.msra.mxu1 %v1756_v28  ;;  %2065 = vmatpush2.msra.mxu0 %v1805_v8  ;;  %v4774_v33 = vrot.slane %v4759_v17, 1  ;;  %v4782_v38 = vrot.slane %v4763_v10, 1 }
 0x140   :  { %2195 = vmatprep.subr.mxu1 %v1755_v40  ;;  %2066 = vmatprep.subr.mxu0 %v1804_v59 }
 0x141   :  { %2196 = vmatpush2.msra.mxu1 %v1754_v58  ;;  %2067 = vmatpush2.msra.mxu0 %v1803_v56 }
 0x142   :  { %2493 = vmatprep.subr.mxu1 %v2424_v6  ;;  %2311 = vmatprep.subr.mxu0 %v2242_v39 }
 0x198   :  { %v1340_v50 = vpop.permute.xlu0 %1339 }
 0x19c   :  { %v1344_v21 = vpop.permute.xlu1 %1343  ;;  %v1342_v55 = vpop.permute.xlu0 %1341 }
 0x19d   :  { %v1364_v60 = vsel %vm1363_vm5, %v1340_v50, %v1342_v55  ;;  %v1383_v52 = vmax.f32 %v4657_v36, %v1342_v55 }
 0x19e   :  { %v1382_v16 = vmax.f32 %v4653_v26, %v1364_v60 }
 0x1a0   :  { %v1406_v1 = vcombine.low %v1382_v16, %v1383_v52  ;;  %v1407_v22 = vcombine.high %v1382_v16, %v1383_v52  ;;  %v1346_v48 = vpop.permute.xlu1 %1345  ;;  %v1348_v51 = vpop.permute.xlu0 %1347 }
 0x1a1   :  { %v1365_v47 = vsel %vm1363_vm5, %v1344_v21, %v1346_v48  ;;  %v1385_v36 = vmax.f32 %v4672_v57, %v1346_v48 }
 0x1a2   :  { %v1414_v31 = vrot.slane %v1406_v1, %v4746_v11  ;;  %v1421_v0 = vrot.slane %v1407_v22, %v4746_v11  ;;  %v1384_v26 = vmax.f32 %v4666_v42, %v1365_v47 }
 0x1a4   :  { %v1422_v2 = vcombine.high %v1414_v31, %v1414_v31  ;;  %v1423_v63 = vcombine.high %v1421_v0, %v1421_v0  ;;  %v3532_v57 = vrot.slane %v1414_v31, 9  ;;  %v3534_v32 = vrot.slane %v1421_v0, 9  ;;  %v1350_v4 = vpop.permute.xlu1 %1349  ;;  %v1352_v21 = vpop.permute.xlu0 %1351 }
 0x1a5   :  { %v1424_v42 = vcombine.low %v1384_v26, %v1385_v36  ;;  %v1425_v46 = vcombine.high %v1384_v26, %v1385_v36  ;;  %v1366_v13 = vsel %vm1363_vm5, %v1348_v51, %v1350_v4  ;;  %v1387_v58 = vmax.f32 %v4688_v9, %v1350_v4 }
 0x1a6   :  { %v3533_v62 = vrot.slane %v1422_v2, 9  ;;  %v3535_v45 = vrot.slane %v1423_v63, 9  ;;  %v1610_v7 = vmax.f32 %v1414_v31, %v3532_v57  ;;  %v1612_v28 = vmax.f32 %v1421_v0, %v3534_v32 }
 0x1a7   :  { %v1432_v8 = vrot.slane %v1424_v42, %v4746_v11  ;;  %v1439_v40 = vrot.slane %v1425_v46, %v4746_v11  ;;  %v1386_v59 = vmax.f32 %v4681_v34, %v1366_v13 }
 0x1a8   :  { %v1611_v56 = vmax.f32 %v1422_v2, %v3533_v62  ;;  %v1613_v6 = vmax.f32 %v1423_v63, %v3535_v45  ;;  %v1674_v39 = vadd.f32 %v4749_v37, %v1610_v7  ;;  %v1676_v41 = vadd.f32 %v4759_v17, %v1612_v28  ;;  %v1354_v29 = vpop.permute.xlu1 %1353 }
 0x1a9   :  { %v1440_v25 = vcombine.high %v1432_v8, %v1432_v8  ;;  %v1441_v27 = vcombine.high %v1439_v40, %v1439_v40  ;;  %v3536_v49 = vrot.slane %v1432_v8, 9  ;;  %v3538_v53 = vrot.slane %v1439_v40, 9 }
 0x1aa   :  { %v1675_v61 = vadd.f32 %v4771_v24, %v1611_v56  ;;  %v1677_v20 = vadd.f32 %v4774_v33, %v1613_v6  ;;  %v1698_v15 = vmax.f32 %v1674_v39, 0.0  ;;  %v1700_v3 = vmax.f32 %v1676_v41, 0.0 }
 0x1ab   :  { %v3537_v34 = vrot.slane %v1440_v25, 9  ;;  %v3539_v50 = vrot.slane %v1441_v27, 9  ;;  %v1614_v9 = vmax.f32 %v1432_v8, %v3536_v49  ;;  %v1616_v44 = vmax.f32 %v1439_v40, %v3538_v53  ;;  %v1356_v8 = vpop.permute.xlu0 %1355 }
 0x1ac   :  { %v1699_v55 = vmax.f32 %v1675_v61, 0.0  ;;  %v1701_v60 = vmax.f32 %v1677_v20, 0.0  ;;  %v4794_v52 = vrot.slane %v1700_v3, %v4740_v23  ;;  %v4797_v16 = vrot.slane %v1700_v3, %v4776_v14  ;;  %v1358_v51 = vpop.permute.xlu1 %1357 }
 0x1ad   :  { %v4800_v1 = vrot.slane %v1698_v15, %v4740_v23  ;;  %v4803_v22 = vrot.slane %v1698_v15, %v4776_v14  ;;  %v1615_v48 = vmax.f32 %v1440_v25, %v3537_v34  ;;  %v1617_v47 = vmax.f32 %v1441_v27, %v3539_v50 }
 0x1ae   :  { %v4806_v36 = vrot.slane %v1699_v55, %v4740_v23  ;;  %v4809_v31 = vrot.slane %v1699_v55, %v4776_v14  ;;  %v4812_v0 = vrot.slane %v1701_v60, %v4740_v23  ;;  %v4815_v26 = vrot.slane %v1701_v60, %v4776_v14 }
 0x1af   :  { %v1678_v2 = vadd.f32 %v4754_v35, %v1614_v9  ;;  %v1679_v63 = vadd.f32 %v4779_v54, %v1615_v48  ;;  %v1680_v57 = vadd.f32 %v4763_v10, %v1616_v44  ;;  %v4821_v32 = vadd.f32 %v4782_v38, %v1617_v47 }
 0x1b0   :  { %v1442_v4 = vcombine.low %v1386_v59, %v1387_v58  ;;  %v1443_v42 = vcombine.high %v1386_v59, %v1387_v58  ;;  %v1367_v46 = vsel %vm1363_vm5, %v1352_v21, %v1354_v29  ;;  %v1389_v13 = vmax.f32 %v4704_v5, %v1354_v29 }
 0x1b1   :  { %v1702_v62 = vmax.f32 %v1678_v2, 0.0  ;;  %v1703_v45 = vmax.f32 %v1679_v63, 0.0  ;;  %v1704_v7 = vmax.f32 %v1680_v57, 0.0  ;;  %v1705_v28 = vmax.f32 %v4821_v32, 0.0  ;;  %v1362_v63 = vpop.permute.xlu1 %1361 }
 0x1b2   :  { %v1450_v40 = vrot.slane %v1442_v4, %v4746_v11  ;;  %v1457_v56 = vrot.slane %v1443_v42, %v4746_v11  ;;  %v1388_v6 = vmax.f32 %v4697_v30, %v1367_v46  ;;  %v1368_v39 = vsel %vm1363_vm5, %v1356_v8, %v1358_v51 }
 0x1b3   :  { %v4831_v59 = vrot.slane %v1702_v62, %v4740_v23  ;;  %v4834_v58 = vrot.slane %v1702_v62, %v4776_v14  ;;  %v4837_v5 = vrot.slane %v1703_v45, %v4740_v23  ;;  %v4840_v41 = vrot.slane %v1703_v45, %v4776_v14  ;;  %v1360_v62 = vpop.permute.xlu0 %1359 }
 0x1b4   :  { %v4843_v25 = vrot.slane %v1704_v7, %v4740_v23  ;;  %v4846_v27 = vrot.slane %v1704_v7, %v4776_v14  ;;  %v4851_v30 = vrot.slane %v1705_v28, %v4740_v23  ;;  %v1458_v49 = vcombine.high %v1450_v40, %v1450_v40 }
 0x1b5   :  { %v1459_v53 = vcombine.high %v1457_v56, %v1457_v56  ;;  %v3540_v29 = vrot.slane %v1450_v40, 9  ;;  %v3542_v61 = vrot.slane %v1457_v56, 9  ;;  %v1460_v20 = vcombine.low %v1388_v6, %v1389_v13 }
 0x1b6   :  { %v3541_v15 = vrot.slane %v1458_v49, 9  ;;  %v1461_v3 = vcombine.high %v1388_v6, %v1389_v13  ;;  %v1390_v34 = vmax.f32 %v4713_v43, %v1368_v39  ;;  %v1391_v50 = vmax.f32 %v4720_v12, %v1358_v51 }
 0x1b7   :  { %v3543_v9 = vrot.slane %v1459_v53, 9  ;;  %v1618_v44 = vmax.f32 %v1450_v40, %v3540_v29  ;;  %v4855_v21 = vmax.f32 %v1457_v56, %v3542_v61  ;;  %v1468_v55 = vrot.slane %v1460_v20, %v4746_v11 }
 0x1b8   :  { %v4858_v60 = vmax.f32 %v1458_v49, %v3541_v15  ;;  %v1475_v48 = vrot.slane %v1461_v3, %v4746_v11  ;;  %v1478_v47 = vcombine.low %v1390_v34, %v1391_v50  ;;  %v1479_v2 = vcombine.high %v1390_v34, %v1391_v50 }
 0x1b9   :  { %v4861_v57 = vmax.f32 %v1459_v53, %v3543_v9  ;;  %v4864_v4 = vadd.f32 %v4749_v37, %v1618_v44  ;;  %v1476_v43 = vcombine.high %v1468_v55, %v1468_v55  ;;  %v3544_v12 = vrot.slane %v1468_v55, 9 }
 0x1ba   :  { %v1477_v51 = vcombine.high %v1475_v48, %v1475_v48  ;;  %v3546_v42 = vrot.slane %v1475_v48, 9  ;;  %v1486_v46 = vrot.slane %v1478_v47, %v4746_v11  ;;  %v1493_v13 = vrot.slane %v1479_v2, %v4746_v11 }
 0x1bb   :  { %v1706_v45 = vmax.f32 %v4864_v4, 0.0  ;;  %v3545_v7 = vrot.slane %v1476_v43, 9  ;;  %v1622_v8 = vmax.f32 %v1468_v55, %v3544_v12  ;;  %v1369_v40 = vsel %vm1363_vm5, %v1360_v62, %v1362_v63 }
 0x1bc   :  { %v3547_v56 = vrot.slane %v1477_v51, 9  ;;  %v1624_v6 = vmax.f32 %v1475_v48, %v3546_v42  ;;  %v1494_v39 = vcombine.high %v1486_v46, %v1486_v46  ;;  %v1495_v49 = vcombine.high %v1493_v13, %v1493_v13 }
 0x1bd   :  { %v1623_v53 = vmax.f32 %v1476_v43, %v3545_v7  ;;  %v1686_v29 = vadd.f32 %v4754_v35, %v1622_v8  ;;  %v3548_v61 = vrot.slane %v1486_v46, 9  ;;  %v3550_v20 = vrot.slane %v1493_v13, 9 }
 0x1be   :  { %v1625_v15 = vmax.f32 %v1477_v51, %v3547_v56  ;;  %v1688_v3 = vadd.f32 %v4763_v10, %v1624_v6  ;;  %v3549_v34 = vrot.slane %v1494_v39, 9  ;;  %v3551_v50 = vrot.slane %v1495_v49, 9 }
 0x1bf   :  { %v1687_v9 = vadd.f32 %v4779_v54, %v1623_v53  ;;  %v1710_v44 = vmax.f32 %v1686_v29, 0.0  ;;  %v1626_v55 = vmax.f32 %v1486_v46, %v3548_v61  ;;  %v1628_v47 = vmax.f32 %v1493_v13, %v3550_v20 }
 0x1c0   :  { %v1689_v48 = vadd.f32 %v4782_v38, %v1625_v15  ;;  %v1712_v2 = vmax.f32 %v1688_v3, 0.0  ;;  %v1627_v43 = vmax.f32 %v1494_v39, %v3549_v34  ;;  %v1629_v12 = vmax.f32 %v1495_v49, %v3551_v50 }
 0x1c1   :  { %v1711_v42 = vmax.f32 %v1687_v9, 0.0  ;;  %v4875_v62 = vrot.slane %v1710_v44, %v4740_v23  ;;  %v4878_v51 = vrot.slane %v1710_v44, %v4776_v14  ;;  %v1690_v7 = vadd.f32 %v4749_v37, %v1626_v55 }
 0x1c2   :  { %v1713_v8 = vmax.f32 %v1689_v48, 0.0  ;;  %v4882_v46 = vrot.slane %v1712_v2, %v4740_v23  ;;  %v4885_v13 = vrot.slane %v1712_v2, %v4776_v14  ;;  %v1691_v56 = vadd.f32 %v4771_v24, %v1627_v43 }
 0x1c3   :  { %v4889_v6 = vrot.slane %v1711_v42, %v4740_v23  ;;  %v4892_v39 = vrot.slane %v1711_v42, %v4776_v14  ;;  %v1692_v49 = vadd.f32 %v4759_v17, %v1628_v47  ;;  %v4896_v37 = vadd.f32 %v4774_v33, %v1629_v12 }
 0x1c4   :  { %v4899_v53 = vrot.slane %v1713_v8, %v4740_v23  ;;  %v4902_v29 = vrot.slane %v1713_v8, %v4776_v14  ;;  %v1714_v61 = vmax.f32 %v1690_v7, 0.0  ;;  %v1715_v20 = vmax.f32 %v1691_v56, 0.0 }
 0x1c5   :  { %v1716_v15 = vmax.f32 %v1692_v49, 0.0  ;;  %v1717_v3 = vmax.f32 %v4896_v37, 0.0  ;;  %v1392_v34 = vmax.f32 %v4727_v18, %v1369_v40  ;;  %v1393_v50 = vmax.f32 %v4733_v19, %v1362_v63  ;;  %v2419_v37 = vld [vmem:[#allocation2 + $0x550] sm:$0xff] }
 0x1c6   :  { %v4908_v9 = vrot.slane %v1714_v61, %v4740_v23  ;;  %v4911_v44 = vrot.slane %v1714_v61, %v4776_v14  ;;  %v4914_v55 = vrot.slane %v1715_v20, %v4740_v23  ;;  %v4917_v47 = vrot.slane %v1715_v20, %v4776_v14 }
 0x1c7   :  { %v4920_v48 = vrot.slane %v1716_v15, %v4740_v23  ;;  %v4923_v18 = vrot.slane %v1716_v15, %v4776_v14  ;;  %v1496_v19 = vcombine.low %v1392_v34, %v1393_v50  ;;  %v1497_v63 = vcombine.high %v1392_v34, %v1393_v50 }
 0x1c8   :  { %v4928_v40 = vrot.slane %v1705_v28, %v4776_v14  ;;  %v2106_v2 = vsel %vm1963_vm6, %v4809_v31, %v4803_v22  ;;  %v4936_v43 = vrot.slane %v1706_v45, %v4776_v14  ;;  %v1977_v12 = vsel %vm1963_vm6, %v4797_v16, %v4809_v31 }
 0x1c9   :  { %v1504_v42 = vrot.slane %v1496_v19, %v4746_v11  ;;  %v1511_v7 = vrot.slane %v1497_v63, %v4746_v11  ;;  %v2107_v32 = vsel %vm1965_vm7, %v4797_v16, %v2106_v2  ;;  %v1978_v28 = vsel %vm1965_vm7, %v4815_v26, %v1977_v12 }
 0x1ca   :  { %v2108_v22 = vsel %vm1967_vm8, %v4815_v26, %v2107_v32  ;;  %v1979_v8 = vsel %vm1967_vm8, %v4834_v58, %v1978_v28  ;;  %v2099_v31 = vsel %vm1963_vm6, %v4806_v36, %v4800_v1  ;;  %v4957_v56 = vrot.slane %v1706_v45, %v4740_v23 }
 0x1cb   :  { %v1512_v49 = vcombine.high %v1504_v42, %v1504_v42  ;;  %v1513_v61 = vcombine.high %v1511_v7, %v1511_v7  ;;  %v3552_v20 = vrot.slane %v1504_v42, 9  ;;  %v3554_v15 = vrot.slane %v1511_v7, 9 }
 0x1cc   :  { %v2109_v34 = vsel %vm1969_vm9, %v4834_v58, %v2108_v22  ;;  %v1980_v50 = vsel %vm1969_vm9, %v4840_v41, %v1979_v8  ;;  %v2100_v19 = vsel %vm1965_vm7, %v4794_v52, %v2099_v31  ;;  %v1964_v1 = vsel %vm1963_vm6, %v4794_v52, %v4806_v36 }
 0x1cd   :  { %v3553_v4 = vrot.slane %v1512_v49, 9  ;;  %v3555_v45 = vrot.slane %v1513_v61, 9  ;;  %v1630_v63 = vmax.f32 %v1504_v42, %v3552_v20  ;;  %v4968_v2 = vmax.f32 %v1511_v7, %v3554_v15 }
 0x1ce   :  { %v2110_v12 = vsel %vm1971_vm10, %v4840_v41, %v2109_v34  ;;  %v1981_v32 = vsel %vm1971_vm10, %v4846_v27, %v1980_v50  ;;  %v2101_v28 = vsel %vm1967_vm8, %v4812_v0, %v2100_v19  ;;  %v1966_v22 = vsel %vm1965_vm7, %v4812_v0, %v1964_v1  ;;  %v2423_v1 = vld [vmem:[#allocation2 + $0x570] sm:$0xff] }
 0x1cf   :  { %v4978_v8 = vmax.f32 %v1512_v49, %v3553_v4  ;;  %v4980_v36 = vmax.f32 %v1513_v61, %v3555_v45  ;;  %v4983_v42 = vadd.f32 %v4754_v35, %v1630_v63  ;;  %v2111_v7 = vsel %vm1973_vm11, %v4846_v27, %v2110_v12 }
 0x1d0   :  { %v2112_v31 = vsel %vm1975_vm12, %v4928_v40, %v2111_v7  ;;  %v1982_v20 = vsel %vm1973_vm11, %v4928_v40, %v1981_v32  ;;  %v2102_v15 = vsel %vm1969_vm9, %v4831_v59, %v2101_v28  ;;  %v1968_v49 = vsel %vm1967_vm8, %v4831_v59, %v1966_v22  ;;  %v2241_v28 = vld [vmem:[#allocation2 + $0x3f0] sm:$0xff]  ;;  %v2422_v22 = vld [vmem:[#allocation2 + $0x568] sm:$0xff] }
 0x1d1   :  { %v1718_v61 = vmax.f32 %v4983_v42, 0.0  ;;  %3558 = vmatprep.mubr.msk.f32.mxu1 %vm1363_vm5, %v2112_v31  ;;  %v1983_v35 = vsel %vm1975_vm12, %v4936_v43, %v1982_v20  ;;  %v2103_v34 = vsel %vm1971_vm10, %v4837_v5, %v2102_v15  ;;  %v1970_v50 = vsel %vm1969_vm9, %v4837_v5, %v1968_v49  ;;  %v2240_v20 = vld [vmem:[#allocation2 + $0x3e8] sm:$0xff] }
 0x1d2   :  { %3556 = vmatprep.mubr.msk.f32.mxu0 %vm1363_vm5, %v1983_v35  ;;  %v2104_v19 = vsel %vm1973_vm11, %v4843_v25, %v2103_v34  ;;  %v1972_v4 = vsel %vm1971_vm10, %v4843_v25, %v1970_v50  ;;  %v5011_v45 = vrot.slane %v1717_v3, %v4776_v14  ;;  %v2120_v63 = vsel %vm1963_vm6, %v4892_v39, %v4878_v51  ;;  %v2421_v51 = vld [vmem:[#allocation2 + $0x560] sm:$0xff]  ;;  %v2420_v50 = vld [vmem:[#allocation2 + $0x558] sm:$0xff] }
 0x1d3   :  { %v2105_v12 = vsel %vm1975_vm12, %v4851_v30, %v2104_v19  ;;  %v1974_v32 = vsel %vm1973_vm11, %v4851_v30, %v1972_v4  ;;  %v2121_v42 = vsel %vm1965_vm7, %v4885_v13, %v2120_v63  ;;  %v5023_v7 = vrot.slane %v1718_v61, %v4776_v14  ;;  %v2239_v34 = vld [vmem:[#allocation2 + $0x3e0] sm:$0xff] }
 0x1d4   :  { %2198 = vmatmul.mubr.f32.vlgmr.msra.gmra.mxu1 %v2105_v12  ;;  %v1976_v31 = vsel %vm1975_vm12, %v4957_v56, %v1974_v32  ;;  %v2122_v15 = vsel %vm1967_vm8, %v4902_v29, %v2121_v42  ;;  %v1991_v49 = vsel %vm1963_vm6, %v4885_v13, %v4892_v39  ;;  %v5035_v35 = vrot.slane %v1717_v3, %v4740_v23  ;;  %v2238_v39 = vld [vmem:[#allocation2 + $0x3d8] sm:$0xff]  ;;  %v2237_v32 = vld [vmem:[#allocation2 + $0x3d0] sm:$0xff]  ;;  %v2418_v42 = vld [vmem:[#allocation2 + $0x548] sm:$0xff] }
 0x1d5   :  { %2494 = vmatpush1.msra.mxu1 %v2423_v1  ;;  %2069 = vmatmul.mubr.f32.vlgmr.msra.gmra.mxu0 %v1976_v31  ;;  %v2123_v19 = vsel %vm1969_vm9, %v4911_v44, %v2122_v15  ;;  %v1992_v4 = vsel %vm1965_vm7, %v4902_v29, %v1991_v49  ;;  %v2113_v63 = vsel %vm1963_vm6, %v4889_v6, %v4875_v62  ;;  %v2236_v31 = vld [vmem:[#allocation2 + $0x3c8] sm:$0xff]  ;;  %v2417_v15 = vld [vmem:[#allocation2 + $0x540] sm:$0xff] }
 0x1d6   :  { %2312 = vmatpush1.msra.mxu0 %v2241_v28  ;;  %2495 = vmatprep.subr.mxu1 %v2422_v22  ;;  %v2124_v3 = vsel %vm1971_vm10, %v4917_v47, %v2123_v19  ;;  %v1993_v1 = vsel %vm1967_vm8, %v4911_v44, %v1992_v4  ;;  %v2114_v12 = vsel %vm1965_vm7, %v4882_v46, %v2113_v63  ;;  %v2235_v19 = vld [vmem:[#allocation2 + $0x3c0] sm:$0xff]  ;;  %v2416_v4 = vld [vmem:[#allocation2 + $0x538] sm:$0xff] }
 0x1d7   :  { %2313 = vmatprep.subr.mxu0 %v2240_v20  ;;  %2496 = vmatpush1.msra.mxu1 %v2421_v51  ;;  %v2125_v62 = vsel %vm1973_vm11, %v4923_v18, %v2124_v3  ;;  %v1994_v28 = vsel %vm1969_vm9, %v4917_v47, %v1993_v1  ;;  %v2115_v22 = vsel %vm1967_vm8, %v4899_v53, %v2114_v12  ;;  %v2234_v3 = vld [vmem:[#allocation2 + $0x3b8] sm:$0xff]  ;;  %v2415_v1 = vld [vmem:[#allocation2 + $0x530] sm:$0xff] }
 0x1d8   :  { %2314 = vmatpush1.msra.mxu0 %v2239_v34  ;;  %2497 = vmatprep.subr.mxu1 %v2420_v50  ;;  %v2126_v49 = vsel %vm1975_vm12, %v5011_v45, %v2125_v62  ;;  %v1995_v20 = vsel %vm1971_vm10, %v4923_v18, %v1994_v28  ;;  %v2116_v51 = vsel %vm1969_vm9, %v4908_v9, %v2115_v22  ;;  %v2233_v62 = vld [vmem:[#allocation2 + $0x3b0] sm:$0xff]  ;;  %v2414_v28 = vld [vmem:[#allocation2 + $0x528] sm:$0xff] }
 0x1d9   :  { %2315 = vmatprep.subr.mxu0 %v2238_v39  ;;  %2498 = vmatpush1.msra.mxu1 %v2419_v37  ;;  %v1996_v63 = vsel %vm1973_vm11, %v5011_v45, %v1995_v20  ;;  %v2117_v34 = vsel %vm1971_vm10, %v4914_v55, %v2116_v51  ;;  %v5067_v50 = vrot.slane %v1718_v61, %v4740_v23  ;;  %v2232_v22 = vld [vmem:[#allocation2 + $0x3a8] sm:$0xff]  ;;  %v2413_v20 = vld [vmem:[#allocation2 + $0x520] sm:$0xff] }
 0x1da   :  { %2316 = vmatpush1.msra.mxu0 %v2237_v32  ;;  %2499 = vmatprep.subr.mxu1 %v2418_v42  ;;  %v1997_v12 = vsel %vm1975_vm12, %v5023_v7, %v1996_v63  ;;  %v2118_v39 = vsel %vm1973_vm11, %v4920_v48, %v2117_v34  ;;  %v1984_v37 = vsel %vm1963_vm6, %v4882_v46, %v4889_v6  ;;  %v2231_v51 = vld [vmem:[#allocation2 + $0x3a0] sm:$0xff] }
 0x1db   :  { %2317 = vmatprep.subr.mxu0 %v2236_v31  ;;  %2500 = vmatpush1.msra.mxu1 %v2417_v15  ;;  %v2119_v61 = vsel %vm1975_vm12, %v5035_v35, %v2118_v39  ;;  %v1985_v32 = vsel %vm1965_vm7, %v4899_v53, %v1984_v37  ;;  %v1683_v42 = vadd.f32 %v4771_v24, %v4858_v60  ;;  %v2411_v37 = vld [vmem:[#allocation2 + $0x510] sm:$0xff] }
 0x1dc   :  { %2318 = vmatpush1.msra.mxu0 %v2235_v19  ;;  %2501 = vmatprep.subr.mxu1 %v2416_v4  ;;  %v1986_v6 = vsel %vm1967_vm8, %v4908_v9, %v1985_v32  ;;  %v1684_v31 = vadd.f32 %v4759_v17, %v4855_v21  ;;  %v2466_v15 = vsel %vm1963_vm6, %v4834_v58, %v4815_v26  ;;  %v2412_v17 = vld [vmem:[#allocation2 + $0x518] sm:$0xff] }
 0x1dd   :  { %2319 = vmatprep.subr.mxu0 %v2234_v3  ;;  %2502 = vmatpush1.msra.mxu1 %v2415_v1  ;;  %v1987_v24 = vsel %vm1969_vm9, %v4914_v55, %v1986_v6  ;;  %v1707_v60 = vmax.f32 %v1683_v42, 0.0  ;;  %v2467_v19 = vsel %vm1965_vm7, %v4840_v41, %v2466_v15  ;;  %v2284_v4 = vsel %vm1963_vm6, %v4815_v26, %v4797_v16  ;;  %v2230_v1 = vld [vmem:[#allocation2 + $0x398] sm:$0xff]  ;;  %v2229_v42 = vld [vmem:[#allocation2 + $0x390] sm:$0xff]  ;;  %v2228_v15 = vld [vmem:[#allocation2 + $0x388] sm:$0xff] }
 0x1de   :  { %2320 = vmatpush1.msra.mxu0 %v2233_v62  ;;  %2503 = vmatprep.subr.mxu1 %v2414_v28  ;;  %v1988_v21 = vsel %vm1971_vm10, %v4920_v48, %v1987_v24  ;;  %v1708_v63 = vmax.f32 %v1684_v31, 0.0  ;;  %v2468_v34 = vsel %vm1967_vm8, %v4846_v27, %v2467_v19  ;;  %v2285_v3 = vsel %vm1965_vm7, %v4834_v58, %v2284_v4  ;;  %v2409_v19 = vld [vmem:[#allocation2 + $0x500] sm:$0xff] }
 0x1df   :  { %2321 = vmatprep.subr.mxu0 %v2232_v22  ;;  %2504 = vmatpush1.msra.mxu1 %v2413_v20  ;;  %v1989_v39 = vsel %vm1973_vm11, %v5035_v35, %v1988_v21  ;;  %v5105_v16 = vrot.slane %v1707_v60, %v4776_v14  ;;  %v2469_v26 = vsel %vm1969_vm9, %v4928_v40, %v2468_v34  ;;  %v2410_v22 = vld [vmem:[#allocation2 + $0x508] sm:$0xff]  ;;  %v2408_v21 = vld [vmem:[#allocation2 + $0x4f8] sm:$0xff] }
 0x1e0   :  { %3559 = vmatprep.mubr.msk.f32.mxu1 %vm1363_vm5, %v2126_v49  ;;  %2322 = vmatpush1.msra.mxu0 %v2231_v51  ;;  %v1990_v62 = vsel %vm1975_vm12, %v5067_v50, %v1989_v39  ;;  %v5113_v28 = vrot.slane %v1708_v63, %v4776_v14  ;;  %v2470_v32 = vsel %vm1971_vm10, %v4936_v43, %v2469_v26  ;;  %v2225_v26 = vld [vmem:[#allocation2 + $0x370] sm:$0xff] }
 0x1e1   :  { %2505 = vmatprep.subr.mxu1 %v2412_v17  ;;  %3557 = vmatprep.mubr.msk.f32.mxu0 %vm1363_vm5, %v1997_v12  ;;  %v2471_v20 = vsel %vm1973_vm11, %v5105_v16, %v2470_v32  ;;  %v2286_v49 = vsel %vm1967_vm8, %v4840_v41, %v2285_v3  ;;  %v5123_v6 = vrot.slane %v1707_v60, %v4740_v23  ;;  %v2227_v17 = vld [vmem:[#allocation2 + $0x380] sm:$0xff] }
 0x1e2   :  { %2204 = vmatmul.mubr.f32.gmra.mxu1 %v2119_v61  ;;  %2323 = vmatprep.subr.mxu0 %v2230_v1  ;;  %v2472_v31 = vsel %vm1975_vm12, %v5113_v28, %v2471_v20  ;;  %v2287_v12 = vsel %vm1969_vm9, %v4846_v27, %v2286_v49  ;;  %v5130_v51 = vrot.slane %v1708_v63, %v4740_v23  ;;  %v2405_v20 = vld [vmem:[#allocation2 + $0x4e0] sm:$0xff] }
 0x1e3   :  { %2506 = vmatpush1.msra.mxu1 %v2411_v37  ;;  %2075 = vmatmul.mubr.f32.gmra.mxu0 %v1990_v62  ;;  %v2288_v24 = vsel %vm1971_vm10, %v4928_v40, %v2287_v12  ;;  %v2459_v61 = vsel %vm1963_vm6, %v4831_v59, %v4812_v0  ;;  %v2277_v60 = vsel %vm1963_vm6, %v4812_v0, %v4794_v52  ;;  %v2226_v52 = vld [vmem:[#allocation2 + $0x378] sm:$0xff]  ;;  %v2407_v0 = vld [vmem:[#allocation2 + $0x4f0] sm:$0xff]  ;;  %v2406_v37 = vld [vmem:[#allocation2 + $0x4e8] sm:$0xff] }
 0x1e4   :  { %2324 = vmatpush1.msra.mxu0 %v2229_v42  ;;  %2507 = vmatprep.subr.mxu1 %v2410_v22  ;;  %v2289_v4 = vsel %vm1973_vm11, %v4936_v43, %v2288_v24  ;;  %v2460_v63 = vsel %vm1965_vm7, %v4837_v5, %v2459_v61  ;;  %v2278_v34 = vsel %vm1965_vm7, %v4831_v59, %v2277_v60  ;;  %v2224_v22 = vld [vmem:[#allocation2 + $0x368] sm:$0xff]  ;;  %v2223_v12 = vld [vmem:[#allocation2 + $0x360] sm:$0xff]  ;;  %v2404_v24 = vld [vmem:[#allocation2 + $0x4d8] sm:$0xff] }
 0x1e5   :  { %3562 = vmatprep.mubr.msk.f32.mxu1 %vm1363_vm5, %v2472_v31  ;;  %2325 = vmatprep.subr.mxu0 %v2228_v15  ;;  %v2290_v3 = vsel %vm1975_vm12, %v5105_v16, %v2289_v4  ;;  %v2461_v1 = vsel %vm1967_vm8, %v4843_v25, %v2460_v63  ;;  %v2279_v39 = vsel %vm1967_vm8, %v4837_v5, %v2278_v34  ;;  %v2222_v60 = vld [vmem:[#allocation2 + $0x358] sm:$0xff]  ;;  %v2403_v4 = vld [vmem:[#allocation2 + $0x4d0] sm:$0xff]  ;;  %v2402_v34 = vld [vmem:[#allocation2 + $0x4c8] sm:$0xff] }
 0x1e6   :  { %3560 = vmatprep.mubr.msk.f32.mxu0 %vm1363_vm5, %v2290_v3  ;;  %2508 = vmatpush1.msra.mxu1 %v2409_v19  ;;  %v2462_v62 = vsel %vm1969_vm9, %v4851_v30, %v2461_v1  ;;  %v2280_v32 = vsel %vm1969_vm9, %v4843_v25, %v2279_v39  ;;  %v1695_v42 = vadd.f32 %v4779_v54, %v4978_v8  ;;  %v2221_v63 = vld [vmem:[#allocation2 + $0x350] sm:$0xff]  ;;  %v2220_v1 = vld [vmem:[#allocation2 + $0x348] sm:$0xff]  ;;  %v2401_v39 = vld [vmem:[#allocation2 + $0x4c0] sm:$0xff] }
 0x1e7   :  { %2326 = vmatpush1.msra.mxu0 %v2227_v17  ;;  %2509 = vmatprep.subr.mxu1 %v2408_v21  ;;  %v2463_v49 = vsel %vm1971_vm10, %v4957_v56, %v2462_v62  ;;  %v2281_v31 = vsel %vm1971_vm10, %v4851_v30, %v2280_v32  ;;  %v1696_v15 = vadd.f32 %v4763_v10, %v4968_v2  ;;  %v2219_v32 = vld [vmem:[#allocation2 + $0x340] sm:$0xff] }
 0x1e8   :  { %2327 = vmatprep.subr.mxu0 %v2226_v52  ;;  %2510 = vmatpush1.msra.mxu1 %v2407_v0  ;;  %v2464_v54 = vsel %vm1973_vm11, %v5123_v6, %v2463_v49  ;;  %v2282_v8 = vsel %vm1973_vm11, %v4957_v56, %v2281_v31  ;;  %v1719_v19 = vmax.f32 %v1695_v42, 0.0  ;;  %v2480_v61 = vsel %vm1963_vm6, %v4911_v44, %v4902_v29  ;;  %v2400_v42 = vld [vmem:[#allocation2 + $0x4b8] sm:$0xff]  ;;  %v2399_v49 = vld [vmem:[#allocation2 + $0x4b0] sm:$0xff] }
 0x1e9   :  { %2328 = vmatpush1.msra.mxu0 %v2225_v26  ;;  %2511 = vmatprep.subr.mxu1 %v2406_v37  ;;  %v5175_v10 = vsel %vm1975_vm12, %v5130_v51, %v2464_v54  ;;  %v5179_v2 = vsel %vm1975_vm12, %v5123_v6, %v2282_v8  ;;  %v1720_v17 = vmax.f32 %v1696_v15, 0.0  ;;  %v2481_v21 = vsel %vm1965_vm7, %v4917_v47, %v2480_v61  ;;  %v2398_v54 = vld [vmem:[#allocation2 + $0x4a8] sm:$0xff] }
 0x1ea   :  { %2329 = vmatprep.subr.mxu0 %v2224_v22  ;;  %2512 = vmatpush1.msra.mxu1 %v2405_v20  ;;  %v5184_v3 = vrot.slane %v1719_v19, %v4776_v14  ;;  %v2482_v52 = vsel %vm1967_vm8, %v4923_v18, %v2481_v21  ;;  %v2298_v0 = vsel %vm1963_vm6, %v4902_v29, %v4885_v13  ;;  %v2218_v20 = vld [vmem:[#allocation2 + $0x338] sm:$0xff] }
 0x1eb   :  { %2330 = vmatpush1.msra.mxu0 %v2223_v12  ;;  %2513 = vmatprep.subr.mxu1 %v2404_v24  ;;  %v5192_v26 = vrot.slane %v1720_v17, %v4776_v14  ;;  %v2483_v37 = vsel %vm1969_vm9, %v5011_v45, %v2482_v52  ;;  %v2299_v62 = vsel %vm1965_vm7, %v4911_v44, %v2298_v0  ;;  %v2217_v24 = vld [vmem:[#allocation2 + $0x330] sm:$0xff]  ;;  %v2396_v52 = vld [vmem:[#allocation2 + $0x498] sm:$0xff] }
 0x1ec   :  { %2331 = vmatprep.subr.mxu0 %v2222_v60  ;;  %2514 = vmatpush1.msra.mxu1 %v2403_v4  ;;  %v2484_v13 = vsel %vm1971_vm10, %v5023_v7, %v2483_v37  ;;  %v2300_v29 = vsel %vm1967_vm8, %v4917_v47, %v2299_v62  ;;  %v5203_v22 = vrot.slane %v1719_v19, %v4740_v23  ;;  %v2216_v60 = vld [vmem:[#allocation2 + $0x328] sm:$0xff]  ;;  %v2397_v4 = vld [vmem:[#allocation2 + $0x4a0] sm:$0xff]  ;;  %v2214_v37 = vld [vmem:[#allocation2 + $0x318] sm:$0xff] }
 0x1ed   :  { %2332 = vmatpush1.msra.mxu0 %v2221_v63  ;;  %2515 = vmatprep.subr.mxu1 %v2402_v34  ;;  %v2485_v31 = vsel %vm1973_vm11, %v5184_v3, %v2484_v13  ;;  %v2301_v15 = vsel %vm1969_vm9, %v4923_v18, %v2300_v29  ;;  %v5210_v12 = vrot.slane %v1720_v17, %v4740_v23  ;;  %v2215_v34 = vld [vmem:[#allocation2 + $0x320] sm:$0xff]  ;;  %v2395_v62 = vld [vmem:[#allocation2 + $0x490] sm:$0xff]  ;;  %v2394_v13 = vld [vmem:[#allocation2 + $0x488] sm:$0xff] }
 0x1ee   :  { %2333 = vmatprep.subr.mxu0 %v2220_v1  ;;  %2516 = vmatpush1.msra.mxu1 %v2401_v39  ;;  %v5214_v8 = vsel %vm1975_vm12, %v5192_v26, %v2485_v31  ;;  %v2302_v19 = vsel %vm1971_vm10, %v5011_v45, %v2301_v15  ;;  %v2473_v61 = vsel %vm1963_vm6, %v4908_v9, %v4899_v53  ;;  %v2212_v31 = vld [vmem:[#allocation2 + $0x308] sm:$0xff]  ;;  %v2393_v15 = vld [vmem:[#allocation2 + $0x480] sm:$0xff] }
 0x1ef   :  { %2334 = vmatpush1.msra.mxu0 %v2219_v32  ;;  %2517 = vmatprep.subr.mxu1 %v2400_v42  ;;  %v2303_v17 = vsel %vm1973_vm11, %v5023_v7, %v2302_v19  ;;  %v2474_v21 = vsel %vm1965_vm7, %v4914_v55, %v2473_v61  ;;  %v2291_v63 = vsel %vm1963_vm6, %v4899_v53, %v4882_v46  ;;  %v2213_v42 = vld [vmem:[#allocation2 + $0x310] sm:$0xff]  ;;  %v2211_v19 = vld [vmem:[#allocation2 + $0x300] sm:$0xff]  ;;  %v2440_v61 = vld [vmem:[#allocation2 + $0x5f8] sm:$0xff] }
 0x1f0   :  { %2335 = vmatprep.subr.mxu0 %v2218_v20  ;;  %2518 = vmatpush1.msra.mxu1 %v2399_v49  ;;  %v5230_v0 = vsel %vm1975_vm12, %v5184_v3, %v2303_v17  ;;  %v2475_v1 = vsel %vm1967_vm8, %v4920_v48, %v2474_v21  ;;  %v2292_v39 = vsel %vm1965_vm7, %v4908_v9, %v2291_v63  ;;  %v2439_v17 = vld [vmem:[#allocation2 + $0x5f0] sm:$0xff] }
 0x1f1   :  { %2336 = vmatpush1.msra.mxu0 %v2217_v24  ;;  %2519 = vmatprep.subr.mxu1 %v2398_v54  ;;  %v2476_v46 = vsel %vm1969_vm9, %v5035_v35, %v2475_v1  ;;  %v2293_v53 = vsel %vm1967_vm8, %v4914_v55, %v2292_v39  ;;  %v1685_v32 = vadd.f32 %v4774_v33, %v4861_v57 }
 0x1f2   :  { %2337 = vmatprep.subr.mxu0 %v2216_v60  ;;  %2520 = vmatpush1.msra.mxu1 %v2397_v4  ;;  %v2477_v29 = vsel %vm1971_vm10, %v5067_v50, %v2476_v46  ;;  %v2294_v20 = vsel %vm1969_vm9, %v4920_v48, %v2293_v53  ;;  %v2648_v49 = vsel %vm1963_vm6, %v4840_v41, %v4834_v58  ;;  %v2258_v4 = vld [vmem:[#allocation2 + $0x478] sm:$0xff] }
 0x1f3   :  { %2338 = vmatpush1.msra.mxu0 %v2215_v34  ;;  %2521 = vmatprep.subr.mxu1 %v2396_v52  ;;  %v2478_v33 = vsel %vm1973_vm11, %v5203_v22, %v2477_v29  ;;  %v2295_v57 = vsel %vm1971_vm10, %v5035_v35, %v2294_v20  ;;  %v1709_v24 = vmax.f32 %v1685_v32, 0.0  ;;  %v2649_v54 = vsel %vm1965_vm7, %v4846_v27, %v2648_v49  ;;  %v2257_v34 = vld [vmem:[#allocation2 + $0x470] sm:$0xff]  ;;  %v2438_v52 = vld [vmem:[#allocation2 + $0x5e8] sm:$0xff]  ;;  %v2436_v32 = vld [vmem:[#allocation2 + $0x5d8] sm:$0xff] }
 0x1f4   :  { %2339 = vmatprep.subr.mxu0 %v2214_v37  ;;  %2522 = vmatpush1.msra.mxu1 %v2395_v62  ;;  %v5257_v58 = vsel %vm1975_vm12, %v5210_v12, %v2478_v33  ;;  %v2296_v41 = vsel %vm1973_vm11, %v5067_v50, %v2295_v57  ;;  %v2650_v60 = vsel %vm1967_vm8, %v4928_v40, %v2649_v54  ;;  %v2256_v37 = vld [vmem:[#allocation2 + $0x468] sm:$0xff]  ;;  %v2437_v62 = vld [vmem:[#allocation2 + $0x5e0] sm:$0xff]  ;;  %v2250_v33 = vld [vmem:[#allocation2 + $0x438] sm:$0xff] }
 0x1f5   :  { %2340 = vmatpush1.msra.mxu0 %v2213_v42  ;;  %2523 = vmatprep.subr.mxu1 %v2394_v13  ;;  %v5265_v27 = vsel %vm1975_vm12, %v5203_v22, %v2296_v41  ;;  %v2632_v21 = vrot.slane %v1709_v24, %v4776_v14  ;;  %v2651_v63 = vsel %vm1969_vm9, %v4936_v43, %v2650_v60  ;;  %v2434_v20 = vld [vmem:[#allocation2 + $0x5c8] sm:$0xff]  ;;  %v2433_v49 = vld [vmem:[#allocation2 + $0x5c0] sm:$0xff]  ;;  %v2431_v57 = vld [vmem:[#allocation2 + $0x5b0] sm:$0xff] }
 0x1f6   :  { %2341 = vmatprep.subr.mxu0 %v2212_v31  ;;  %2524 = vmatpush1.msra.mxu1 %v2393_v15  ;;  %v2652_v40 = vsel %vm1971_vm10, %v5105_v16, %v2651_v63  ;;  %v2628_v1 = vrot.slane %v1709_v24, %v4740_v23  ;;  %v2641_v39 = vsel %vm1963_vm6, %v4837_v5, %v4831_v59  ;;  %v2255_v16 = vld [vmem:[#allocation2 + $0x460] sm:$0xff]  ;;  %v2249_v24 = vld [vmem:[#allocation2 + $0x430] sm:$0xff]  ;;  %v2430_v54 = vld [vmem:[#allocation2 + $0x5a8] sm:$0xff] }
 0x1f7   :  { %2342 = vmatpush1.msra.mxu0 %v2211_v19  ;;  %2541 = vmatprep.subr.mxu1 %v2440_v61  ;;  %v2653_v43 = vsel %vm1973_vm11, %v5113_v28, %v2652_v40  ;;  %v2642_v46 = vsel %vm1965_vm7, %v4843_v25, %v2641_v39  ;;  %v1697_v53 = vadd.f32 %v4782_v38, %v4980_v36  ;;  %v2254_v25 = vld [vmem:[#allocation2 + $0x458] sm:$0xff]  ;;  %v2435_v28 = vld [vmem:[#allocation2 + $0x5d0] sm:$0xff]  ;;  %v2251_v31 = vld [vmem:[#allocation2 + $0x440] sm:$0xff] }
 0x1f8   :  { %2359 = vmatprep.subr.mxu0 %v2258_v4  ;;  %2542 = vmatpush2.msra.mxu1 %v2439_v17  ;;  %v5283_v42 = vsel %vm1975_vm12, %v2632_v21, %v2653_v43  ;;  %v2643_v59 = vsel %vm1967_vm8, %v4851_v30, %v2642_v46  ;;  %v2662_v5 = vsel %vm1963_vm6, %v4917_v47, %v4911_v44  ;;  %v2253_v30 = vld [vmem:[#allocation2 + $0x450] sm:$0xff]  ;;  %v2429_v61 = vld [vmem:[#allocation2 + $0x5a0] sm:$0xff]  ;;  %v2428_v60 = vld [vmem:[#allocation2 + $0x598] sm:$0xff]  ;;  %v5728_v43 = vmov 0.0  }
 0x1f9   :  { %2360 = vmatpush2.msra.mxu0 %v2257_v34  ;;  %2543 = vmatprep.subr.mxu1 %v2438_v52  ;;  %v2644_v38 = vsel %vm1969_vm9, %v4957_v56, %v2643_v59  ;;  %v1721_v36 = vmax.f32 %v1697_v53, 0.0  ;;  %v2663_v13 = vsel %vm1965_vm7, %v4923_v18, %v2662_v5  ;;  %v2655_v29 = vsel %vm1963_vm6, %v4914_v55, %v4908_v9  ;;  %v2252_v18 = vld [vmem:[#allocation2 + $0x448] sm:$0xff]  ;;  %v2246_v17 = vld [vmem:[#allocation2 + $0x418] sm:$0xff]  ;;  %v2245_v63 = vld [vmem:[#allocation2 + $0x410] sm:$0xff] }
 0x1fa   :  { %2361 = vmatprep.subr.mxu0 %v2256_v37  ;;  %2544 = vmatpush2.msra.mxu1 %v2437_v62  ;;  %v2645_v44 = vsel %vm1971_vm10, %v5123_v6, %v2644_v38  ;;  %v2664_v47 = vsel %vm1967_vm8, %v5011_v45, %v2663_v13  ;;  %v2656_v56 = vsel %vm1965_vm7, %v4920_v48, %v2655_v29  ;;  %v2432_v6 = vld [vmem:[#allocation2 + $0x5b8] sm:$0xff]  ;;  %v2426_v34 = vld [vmem:[#allocation2 + $0x588] sm:$0xff]  ;;  %v2425_v52 = vld [vmem:[#allocation2 + $0x580] sm:$0xff] }
 0x1fb   :  { %2362 = vmatpush2.msra.mxu0 %v2255_v16  ;;  %2545 = vmatprep.subr.mxu1 %v2436_v32  ;;  %v2646_v9 = vsel %vm1973_vm11, %v5130_v51, %v2645_v44  ;;  %v2665_v55 = vsel %vm1969_vm9, %v5023_v7, %v2664_v47  ;;  %v2640_v45 = vrot.slane %v1721_v36, %v4776_v14  ;;  %v2243_v40 = vld [vmem:[#allocation2 + $0x400] sm:$0xff]  ;;  %v2604_v39 = vld [vmem:[#allocation2 + $0x6e8] sm:$0xff]  ;;  %v2602_v62 = vld [vmem:[#allocation2 + $0x6d8] sm:$0xff] }
 0x1fc   :  { %2363 = vmatprep.subr.mxu0 %v2254_v25  ;;  %2546 = vmatpush2.msra.mxu1 %v2435_v28  ;;  %v5308_v15 = vsel %vm1975_vm12, %v2628_v1, %v2646_v9  ;;  %v2666_v48 = vsel %vm1971_vm10, %v5184_v3, %v2665_v55  ;;  %v2657_v7 = vsel %vm1967_vm8, %v5035_v35, %v2656_v56  ;;  %v2248_v3 = vld [vmem:[#allocation2 + $0x428] sm:$0xff]  ;;  %v2247_v35 = vld [vmem:[#allocation2 + $0x420] sm:$0xff]  ;;  %v2605_v1 = vld [vmem:[#allocation2 + $0x6f0] sm:$0xff] }
 0x1fd   :  { %2364 = vmatpush2.msra.mxu0 %v2253_v30  ;;  %2547 = vmatprep.subr.mxu1 %v2434_v20  ;;  %v2667_v51 = vsel %vm1973_vm11, %v5192_v26, %v2666_v48  ;;  %v2658_v14 = vsel %vm1969_vm9, %v5067_v50, %v2657_v7  ;;  %v2636_v41 = vrot.slane %v1721_v36, %v4740_v23  ;;  %v2427_v50 = vld [vmem:[#allocation2 + $0x590] sm:$0xff]  ;;  %v2603_v37 = vld [vmem:[#allocation2 + $0x6e0] sm:$0xff]  ;;  %v2600_v46 = vld [vmem:[#allocation2 + $0x6c8] sm:$0xff] }
 0x1fe   :  { %2365 = vmatprep.subr.mxu0 %v2252_v18  ;;  %2548 = vmatpush2.msra.mxu1 %v2433_v49  ;;  %v5318_v19 = vsel %vm1975_vm12, %v2640_v45, %v2667_v51  ;;  %v2659_v26 = vsel %vm1971_vm10, %v5203_v22, %v2658_v14  ;;  %v2244_v22 = vld [vmem:[#allocation2 + $0x408] sm:$0xff]  ;;  %v2595_v16 = vld [vmem:[#allocation2 + $0x6a0] sm:$0xff]  ;;  %v2593_v32 = vld [vmem:[#allocation2 + $0x690] sm:$0xff] }
 0x1ff   :  { %2366 = vmatpush2.msra.mxu0 %v2251_v31  ;;  %2549 = vmatprep.subr.mxu1 %v2432_v6  ;;  %v2660_v4 = vsel %vm1973_vm11, %v5210_v12, %v2659_v26  ;;  %v2606_v12 = vld [vmem:[#allocation2 + $0x6f8] sm:$0xff]  ;;  %v2596_v53 = vld [vmem:[#allocation2 + $0x6a8] sm:$0xff]  ;;  %v2589_v25 = vld [vmem:[#allocation2 + $0x670] sm:$0xff] }
 0x200   :  { %2367 = vmatprep.subr.mxu0 %v2250_v33  ;;  %2550 = vmatpush2.msra.mxu1 %v2431_v57  ;;  %v5328_v21 = vsel %vm1975_vm12, %v2636_v41, %v2660_v4  ;;  %v2592_v59 = vld [vmem:[#allocation2 + $0x688] sm:$0xff]  ;;  %v2590_v5 = vld [vmem:[#allocation2 + $0x678] sm:$0xff]  ;;  %v2587_v28 = vld [vmem:[#allocation2 + $0x660] sm:$0xff] }
 0x201   :  { %2368 = vmatpush2.msra.mxu0 %v2249_v24  ;;  %2551 = vmatprep.subr.mxu1 %v2430_v54  ;;  %v2586_v38 = vld [vmem:[#allocation2 + $0x658] sm:$0xff]  ;;  %v2585_v36 = vld [vmem:[#allocation2 + $0x650] sm:$0xff]  ;;  %v2584_v13 = vld [vmem:[#allocation2 + $0x648] sm:$0xff] }
 0x202   :  { %2369 = vmatprep.subr.mxu0 %v2248_v3  ;;  %2552 = vmatpush2.msra.mxu1 %v2429_v61  ;;  %v2583_v29 = vld [vmem:[#allocation2 + $0x640] sm:$0xff]  ;;  %v2582_v30 = vld [vmem:[#allocation2 + $0x638] sm:$0xff]  ;;  %v2581_v20 = vld [vmem:[#allocation2 + $0x630] sm:$0xff] }
 0x203   :  { %2370 = vmatpush2.msra.mxu0 %v2247_v35  ;;  %2553 = vmatprep.subr.mxu1 %v2428_v60  ;;  %v2580_v44 = vld [vmem:[#allocation2 + $0x628] sm:$0xff]  ;;  %v2579_v47 = vld [vmem:[#allocation2 + $0x620] sm:$0xff]  ;;  %v2578_v56 = vld [vmem:[#allocation2 + $0x618] sm:$0xff] }
 0x204   :  { %2371 = vmatprep.subr.mxu0 %v2246_v17  ;;  %2554 = vmatpush2.msra.mxu1 %v2427_v50  ;;  %v2577_v18 = vld [vmem:[#allocation2 + $0x610] sm:$0xff]  ;;  %v2576_v49 = vld [vmem:[#allocation2 + $0x608] sm:$0xff]  ;;  %v2575_v9 = vld [vmem:[#allocation2 + $0x600] sm:$0xff] }
 0x205   :  { %2372 = vmatpush2.msra.mxu0 %v2245_v63  ;;  %2555 = vmatprep.subr.mxu1 %v2426_v34  ;;  %v2622_v55 = vld [vmem:[#allocation2 + $0x778] sm:$0xff]  ;;  %v2621_v31 = vld [vmem:[#allocation2 + $0x770] sm:$0xff]  ;;  %v2620_v6 = vld [vmem:[#allocation2 + $0x768] sm:$0xff] }
 0x206   :  { %2373 = vmatprep.subr.mxu0 %v2244_v22  ;;  %2556 = vmatpush2.msra.mxu1 %v2425_v52  ;;  %v2619_v45 = vld [vmem:[#allocation2 + $0x760] sm:$0xff]  ;;  %v2618_v48 = vld [vmem:[#allocation2 + $0x758] sm:$0xff]  ;;  %v2617_v33 = vld [vmem:[#allocation2 + $0x750] sm:$0xff] }
 0x207   :  { %2374 = vmatpush2.msra.mxu0 %v2243_v40  ;;  %2558 = vmatmul.mubr.f32.vlgmr.msra.gmra.mxu1 %v5175_v10  ;;  %v2601_v10 = vld [vmem:[#allocation2 + $0x6d0] sm:$0xff]  ;;  %v2616_v57 = vld [vmem:[#allocation2 + $0x748] sm:$0xff]  ;;  %v2615_v51 = vld [vmem:[#allocation2 + $0x740] sm:$0xff] }
 0x208   :  { %2376 = vmatmul.mubr.f32.vlgmr.msra.gmra.mxu0 %v5179_v2  ;;  %3563 = vmatprep.mubr.msk.f32.mxu1 %vm1363_vm5, %v5214_v8  ;;  %v2599_v2 = vld [vmem:[#allocation2 + $0x6c0] sm:$0xff]  ;;  %v2598_v8 = vld [vmem:[#allocation2 + $0x6b8] sm:$0xff]  ;;  %v2613_v24 = vld [vmem:[#allocation2 + $0x730] sm:$0xff] }
 0x209   :  { %2675 = vmatprep.subr.mxu0 %v2606_v12  ;;  %3561 = vmatprep.mubr.msk.f32.mxu0 %vm1363_vm5, %v5230_v0  ;;  %v2597_v0 = vld [vmem:[#allocation2 + $0x6b0] sm:$0xff]  ;;  %v2614_v7 = vld [vmem:[#allocation2 + $0x738] sm:$0xff]  ;;  %v2612_v54 = vld [vmem:[#allocation2 + $0x728] sm:$0xff] }
 0x20a   :  { %2676 = vmatpush1.msra.mxu0 %v2605_v1  ;;  %3838 = vmatprep.subr.mxu1 %v5728_v43  ;;  %v2611_v14 = vld [vmem:[#allocation2 + $0x720] sm:$0xff]  ;;  %v2610_v3 = vld [vmem:[#allocation2 + $0x718] sm:$0xff]  ;;  %v2609_v61 = vld [vmem:[#allocation2 + $0x710] sm:$0xff] }
 0x20b   :  { %2677 = vmatprep.subr.mxu0 %v2604_v39  ;;  %2564 = vmatmul.mubr.f32.gmra.mxu1 %v5257_v58  ;;  %v2594_v58 = vld [vmem:[#allocation2 + $0x698] sm:$0xff]  ;;  %v2608_v41 = vld [vmem:[#allocation2 + $0x708] sm:$0xff]  ;;  %v2607_v26 = vld [vmem:[#allocation2 + $0x700] sm:$0xff] }
 0x20c   :  { %2678 = vmatpush1.msra.mxu0 %v2603_v37  ;;  %v3590_v35 = vld [vmem:[%s5719_s5 + $0xf8] sm:$0xff]  ;;  %v3589_v4 = vld [vmem:[%s5719_s5 + $0xf0] sm:$0xff]  ;;  %v3604_v17 = vld [vmem:[%s5719_s5 + $0x168] sm:$0xff]  ;;  %3870 = vmatprep.mubr.msk.f32.mxu1 %vm4059_vm13, %v5728_v43 }
 0x20d   :  { %2382 = vmatmul.mubr.f32.gmra.mxu0 %v5265_v27  ;;  %2679 = vmatprep.subr.mxu0 %v2602_v62  ;;  %v2591_v27 = vld [vmem:[#allocation2 + $0x680] sm:$0xff]  ;;  %v3606_v60 = vld [vmem:[%s5719_s5 + $0x178] sm:$0xff]  ;;  %v3585_v22 = vld [vmem:[%s5719_s5 + $0xd0] sm:$0xff] }
 0x20e   :  { %2680 = vmatpush1.msra.mxu0 %v2601_v10  ;;  %3564 = vmatprep.mubr.msk.f32.mxu0 %vm1363_vm5, %v5283_v42  ;;  %v2588_v42 = vld [vmem:[#allocation2 + $0x668] sm:$0xff]  ;;  %v3587_v50 = vld [vmem:[%s5719_s5 + $0xe0] sm:$0xff]  ;;  %v3586_v63 = vld [vmem:[%s5719_s5 + $0xd8] sm:$0xff] }
 0x20f   :  { %2681 = vmatprep.subr.mxu0 %v2600_v46  ;;  %3839 = vmatpush3.msra.mxu1 %v3590_v35  ;;  %v3602_v34 = vld [vmem:[%s5719_s5 + $0x158] sm:$0xff]  ;;  %v3601_v52 = vld [vmem:[%s5719_s5 + $0x150] sm:$0xff]  ;;  %v3584_v40 = vld [vmem:[%s5719_s5 + $0xc8] sm:$0xff] }
 0x210   :  { %2682 = vmatpush1.msra.mxu0 %v2599_v2  ;;  %3840 = vmatprep.subr.mxu1 %v5728_v43  ;;  %v3600_v12 = vld [vmem:[%s5719_s5 + $0x148] sm:$0xff]  ;;  %v3583_v1 = vld [vmem:[%s5719_s5 + $0xc0] sm:$0xff]  ;;  %v3582_v37 = vld [vmem:[%s5719_s5 + $0xb8] sm:$0xff] }
 0x211   :  { %2683 = vmatprep.subr.mxu0 %v2598_v8  ;;  %3841 = vmatpush3.msra.mxu1 %v3589_v4  ;;  %v3599_v39 = vld [vmem:[%s5719_s5 + $0x140] sm:$0xff]  ;;  %v3598_v62 = vld [vmem:[%s5719_s5 + $0x138] sm:$0xff]  ;;  %v3581_v10 = vld [vmem:[%s5719_s5 + $0xb0] sm:$0xff] }
 0x212   :  { %2684 = vmatpush1.msra.mxu0 %v2597_v0  ;;  %3842 = vmatprep.subr.mxu1 %v5728_v43  ;;  %v3597_v46 = vld [vmem:[%s5719_s5 + $0x130] sm:$0xff]  ;;  %v3580_v2 = vld [vmem:[%s5719_s5 + $0xa8] sm:$0xff]  ;;  %v3579_v0 = vld [vmem:[%s5719_s5 + $0xa0] sm:$0xff] }
 0x213   :  { %2685 = vmatprep.subr.mxu0 %v2596_v53  ;;  %v3596_v8 = vld [vmem:[%s5719_s5 + $0x128] sm:$0xff]  ;;  %v3595_v53 = vld [vmem:[%s5719_s5 + $0x120] sm:$0xff] }
 0x214   :  { %2686 = vmatpush1.msra.mxu0 %v2595_v16  ;;  %v3578_v16 = vld [vmem:[%s5719_s5 + $0x98] sm:$0xff] }
 0x215   :  { %2687 = vmatprep.subr.mxu0 %v2594_v58  ;;  %v3594_v58 = vld [vmem:[%s5719_s5 + $0x118] sm:$0xff] }
 0x216   :  { %2688 = vmatpush1.msra.mxu0 %v2593_v32  ;;  %v3577_v32 = vld [vmem:[%s5719_s5 + $0x90] sm:$0xff] }
 0x217   :  { %2689 = vmatprep.subr.mxu0 %v2592_v59  ;;  %v3593_v59 = vld [vmem:[%s5719_s5 + $0x110] sm:$0xff] }
 0x218   :  { %2690 = vmatpush1.msra.mxu0 %v2591_v27  ;;  %v3576_v27 = vld [vmem:[%s5719_s5 + $0x88] sm:$0xff] }
 0x219   :  { %2691 = vmatprep.subr.mxu0 %v2590_v5  ;;  %v3592_v5 = vld [vmem:[%s5719_s5 + $0x108] sm:$0xff] }
 0x21a   :  { %2692 = vmatpush1.msra.mxu0 %v2589_v25  ;;  %v3575_v25 = vld [vmem:[%s5719_s5 + $0x80] sm:$0xff] }
 0x21b   :  { %2693 = vmatprep.subr.mxu0 %v2588_v42  ;;  %v3591_v42 = vld [vmem:[%s5719_s5 + $0x100] sm:$0xff] }
 0x21c   :  { %2694 = vmatpush1.msra.mxu0 %v2587_v28 }
 0x21d   :  { %2695 = vmatprep.subr.mxu0 %v2586_v38 }
 0x21e   :  { %2696 = vmatpush1.msra.mxu0 %v2585_v36 }
 0x21f   :  { %2697 = vmatprep.subr.mxu0 %v2584_v13 }
 0x220   :  { %2698 = vmatpush1.msra.mxu0 %v2583_v29 }
 0x221   :  { %2699 = vmatprep.subr.mxu0 %v2582_v30 }
 0x222   :  { %2700 = vmatpush1.msra.mxu0 %v2581_v20 }
 0x223   :  { %2701 = vmatprep.subr.mxu0 %v2580_v44 }
 0x224   :  { %2702 = vmatpush1.msra.mxu0 %v2579_v47 }
 0x225   :  { %2703 = vmatprep.subr.mxu0 %v2578_v56 }
 0x226   :  { %2704 = vmatpush1.msra.mxu0 %v2577_v18 }
 0x227   :  { %2705 = vmatprep.subr.mxu0 %v2576_v49 }
 0x228   :  { %2706 = vmatpush1.msra.mxu0 %v2575_v9 }
 0x229   :  { %2723 = vmatprep.subr.mxu0 %v2622_v55 }
 0x22a   :  { %2724 = vmatpush2.msra.mxu0 %v2621_v31 }
 0x22b   :  { %2725 = vmatprep.subr.mxu0 %v2620_v6 }
 0x22c   :  { %2726 = vmatpush2.msra.mxu0 %v2619_v45 }
 0x22d   :  { %2727 = vmatprep.subr.mxu0 %v2618_v48 }
 0x22e   :  { %2728 = vmatpush2.msra.mxu0 %v2617_v33 }
 0x22f   :  { %2729 = vmatprep.subr.mxu0 %v2616_v57 }
 0x230   :  { %2730 = vmatpush2.msra.mxu0 %v2615_v51 }
 0x231   :  { %2731 = vmatprep.subr.mxu0 %v2614_v7 }
 0x232   :  { %2732 = vmatpush2.msra.mxu0 %v2613_v24 }
 0x233   :  { %2733 = vmatprep.subr.mxu0 %v2612_v54 }
 0x234   :  { %2734 = vmatpush2.msra.mxu0 %v2611_v14 }
 0x235   :  { %2735 = vmatprep.subr.mxu0 %v2610_v3 }
 0x236   :  { %2736 = vmatpush2.msra.mxu0 %v2609_v61 }
 0x237   :  { %2737 = vmatprep.subr.mxu0 %v2608_v41 }
 0x238   :  { %2738 = vmatpush2.msra.mxu0 %v2607_v26 }
 0x239   :  { %2740 = vmatmul.mubr.f32.vlgmr.msra.gmra.mxu0 %v5308_v15  ;;  %3908 = vmatprep.subr.mxu0 %v5728_v43  ;;  %v3605_v15 = vld [vmem:[%s5719_s5 + $0x170] sm:$0xff] }
 0x23a   :  { %3565 = vmatprep.mubr.msk.f32.mxu0 %vm1363_vm5, %v5318_v19  ;;  %3909 = vmatpush3.msra.mxu0 %v3606_v60  ;;  %v3588_v19 = vld [vmem:[%s5719_s5 + $0xe8] sm:$0xff] }
 0x23b   :  { %3910 = vmatprep.subr.mxu0 %v5728_v43  ;;  %3843 = vmatpush3.msra.mxu1 %v3588_v19 }
 0x23c   :  { %3911 = vmatpush3.msra.mxu0 %v3605_v15  ;;  %3844 = vmatprep.subr.mxu1 %v5728_v43 }
 0x23d   :  { %2746 = vmatmul.mubr.f32.gmra.mxu0 %v5328_v21  ;;  %3912 = vmatprep.subr.mxu0 %v5728_v43  ;;  %v3603_v21 = vld [vmem:[%s5719_s5 + $0x160] sm:$0xff] }
 0x23e   :  { %3913 = vmatpush3.msra.mxu0 %v3604_v17  ;;  %3845 = vmatpush3.msra.mxu1 %v3587_v50  ;;  %v3574_v17 = vld [vmem:[%s5718_s4] ss:$0 sm:$0xff] }
 0x23f   :  { %3914 = vmatprep.subr.mxu0 %v5728_v43  ;;  %3846 = vmatprep.subr.mxu1 %v5728_v43 }
 0x240   :  { %3915 = vmatpush3.msra.mxu0 %v3603_v21  ;;  %3847 = vmatpush3.msra.mxu1 %v3586_v63  ;;  %v2840_v21 = vcombine.high %v3574_v17, %v3574_v17 }
 0x241   :  { %3916 = vmatprep.subr.mxu0 %v5728_v43  ;;  %3848 = vmatprep.subr.mxu1 %v5728_v43 }
 0x242   :  { %3917 = vmatpush3.msra.mxu0 %v3602_v34  ;;  %3849 = vmatpush3.msra.mxu1 %v3585_v22 }
 0x243   :  { %3918 = vmatprep.subr.mxu0 %v5728_v43  ;;  %3850 = vmatprep.subr.mxu1 %v5728_v43 }
 0x244   :  { %3919 = vmatpush3.msra.mxu0 %v3601_v52  ;;  %3851 = vmatpush3.msra.mxu1 %v3584_v40  ;;  %v5485_v40 = vrot.slane %v3574_v17, %v4746_v11  ;;  %v2887_v17 = vld [vmem:[%s5719_s5 + $0x10] sm:$0xff] }
 0x245   :  { %3920 = vmatprep.subr.mxu0 %v5728_v43  ;;  %3852 = vmatprep.subr.mxu1 %v5728_v43 }
 0x246   :  { %3921 = vmatpush3.msra.mxu0 %v3600_v12  ;;  %3853 = vmatpush3.msra.mxu1 %v3583_v1 }
 0x247   :  { %3922 = vmatprep.subr.mxu0 %v5728_v43  ;;  %3854 = vmatprep.subr.mxu1 %v5728_v43 }
 0x248   :  { %3923 = vmatpush3.msra.mxu0 %v3599_v39  ;;  %3855 = vmatpush3.msra.mxu1 %v3582_v37 }
 0x249   :  { %3924 = vmatprep.subr.mxu0 %v5728_v43  ;;  %3856 = vmatprep.subr.mxu1 %v5728_v43 }
 0x24a   :  { %3925 = vmatpush3.msra.mxu0 %v3598_v62  ;;  %3857 = vmatpush3.msra.mxu1 %v3581_v10  ;;  %v5494_v10 = vrot.slane %v2840_v21, %v4746_v11  ;;  %v2886_v21 = vld [vmem:[%s5719_s5 + $0x8] sm:$0xff] }
 0x24b   :  { %3926 = vmatprep.subr.mxu0 %v5728_v43  ;;  %3858 = vmatprep.subr.mxu1 %v5728_v43 }
 0x24c   :  { %3927 = vmatpush3.msra.mxu0 %v3597_v46  ;;  %3859 = vmatpush3.msra.mxu1 %v3580_v2 }
 0x24d   :  { %3928 = vmatprep.subr.mxu0 %v5728_v43  ;;  %3860 = vmatprep.subr.mxu1 %v5728_v43 }
 0x24e   :  { %3929 = vmatpush3.msra.mxu0 %v3596_v8  ;;  %3861 = vmatpush3.msra.mxu1 %v3579_v0  ;;  %v2857_v8 = vrot.slane %v5485_v40, 1  ;;  %v5500_v0 = vcombine.high %v5485_v40, %v5485_v40 }
 0x24f   :  { %3930 = vmatprep.subr.mxu0 %v5728_v43  ;;  %3862 = vmatprep.subr.mxu1 %v5728_v43 }
 0x250   :  { %3931 = vmatpush3.msra.mxu0 %v3595_v53  ;;  %3863 = vmatpush3.msra.mxu1 %v3578_v16 }
 0x251   :  { %3932 = vmatprep.subr.mxu0 %v5728_v43  ;;  %3864 = vmatprep.subr.mxu1 %v5728_v43 }
 0x252   :  { %3933 = vmatpush3.msra.mxu0 %v3594_v58  ;;  %3865 = vmatpush3.msra.mxu1 %v3577_v32 }
 0x253   :  { %3934 = vmatprep.subr.mxu0 %v5728_v43  ;;  %3866 = vmatprep.subr.mxu1 %v5728_v43 }
 0x254   :  { %3935 = vmatpush3.msra.mxu0 %v3593_v59  ;;  %3867 = vmatpush3.msra.mxu1 %v3576_v27  ;;  %v2859_v59 = vrot.slane %v5494_v10, 1  ;;  %v5509_v27 = vcombine.high %v5494_v10, %v5494_v10 }
 0x255   :  { %3936 = vmatprep.subr.mxu0 %v5728_v43  ;;  %3868 = vmatprep.subr.mxu1 %v5728_v43 }
 0x256   :  { %3937 = vmatpush3.msra.mxu0 %v3592_v5  ;;  %3869 = vmatpush3.msra.mxu1 %v3575_v25 }
 0x257   :  { %3938 = vmatprep.subr.mxu0 %v5728_v43  ;;  %3873 = vmatprep.subr.mxu1 %v5728_v43 }
 0x258   :  { %3939 = vmatpush3.msra.mxu0 %v3591_v42  ;;  %3940 = vmatprep.mubr.msk.f32.mxu0 %vm4059_vm13, %v5728_v43 }
 0x259   :  { %3978 = vmatprep.subr.mxu0 %v5728_v43 }
 0x294   :  { %v2199_v36 = vpop.f32.mrf.mxu1 }
 0x295   :  { %v2070_v28 = vpop.f32.mrf.mxu0 }
 0x296   :  { %v2201_v29 = vpop.f32.mrf.mxu1  ;;  %v2200_v9 = vadd.f32 %v2199_v36, %v2070_v28 }
 0x297   :  { %v2072_v38 = vpop.f32.mrf.mxu0 }
 0x298   :  { %v2202_v55 = vadd.f32 %v2201_v29, %v2072_v38 }
 0x2a2   :  { %v2205_v20 = vpop.f32.mrf.mxu1 }
 0x2a3   :  { %v2076_v13 = vpop.f32.mrf.mxu0 }
 0x2a4   :  { %v2207_v47 = vpop.f32.mrf.mxu1  ;;  %v2206_v33 = vadd.f32 %v2205_v20, %v2076_v13 }
 0x2a5   :  { %v2078_v30 = vpop.f32.mrf.mxu0 }
 0x2a6   :  { %v2208_v57 = vadd.f32 %v2207_v47, %v2078_v30 }
 0x2c7   :  { %v2559_v18 = vpop.f32.mrf.mxu1 }
 0x2c8   :  { %v2377_v44 = vpop.f32.mrf.mxu0 }
 0x2c9   :  { %v2561_v31 = vpop.f32.mrf.mxu1  ;;  %v2388_v6 = vadd.f32 %v2377_v44, %v2200_v9  ;;  %v2900_v9 = vld [vmem:[%s5719_s5 + $0x78] sm:$0xff] }
 0x2ca   :  { %v2379_v56 = vpop.f32.mrf.mxu0 }
 0x2cb   :  { %v2389_v45 = vadd.f32 %v2379_v56, %v2202_v55  ;;  %v2565_v51 = vpop.f32.mrf.mxu1  ;;  %v2570_v14 = vadd.f32 %v2559_v18, %v2388_v6  ;;  %v2899_v6 = vld [vmem:[%s5719_s5 + $0x70] sm:$0xff] }
 0x2cd   :  { %v2383_v49 = vpop.f32.mrf.mxu0  ;;  %v2571_v3 = vadd.f32 %v2561_v31, %v2389_v45  ;;  %v2567_v35 = vpop.f32.mrf.mxu1  ;;  %v2898_v45 = vld [vmem:[%s5719_s5 + $0x68] sm:$0xff] }
 0x2ce   :  { %v2390_v24 = vadd.f32 %v2383_v49, %v2206_v33  ;;  %v2896_v33 = vld [vmem:[%s5719_s5 + $0x58] sm:$0xff] }
 0x2cf   :  { %v2385_v48 = vpop.f32.mrf.mxu0 }
 0x2d0   :  { %v2391_v54 = vadd.f32 %v2385_v48, %v2208_v57  ;;  %v2572_v15 = vadd.f32 %v2565_v51, %v2390_v24  ;;  %v2897_v48 = vld [vmem:[%s5719_s5 + $0x60] sm:$0xff]  ;;  %v2895_v57 = vld [vmem:[%s5719_s5 + $0x50] sm:$0xff]  ;;  %v2894_v51 = vld [vmem:[%s5719_s5 + $0x48] sm:$0xff] }
 0x2d1   :  { %v2893_v24 = vld [vmem:[%s5719_s5 + $0x40] sm:$0xff] }
 0x2d2   :  { %v2573_v19 = vadd.f32 %v2567_v35, %v2391_v54 }
 0x2f9   :  { %v2741_v7 = vpop.f32.mrf.mxu0 }
 0x2fa   :  { %v2752_v41 = vadd.f32 %v2741_v7, %v2570_v14  ;;  %v2892_v14 = vld [vmem:[%s5719_s5 + $0x38] sm:$0xff] }
 0x2fb   :  { %v2743_v61 = vpop.f32.mrf.mxu0 }
 0x2fc   :  { %v2753_v26 = vadd.f32 %v2743_v61, %v2571_v3  ;;  %v2891_v61 = vld [vmem:[%s5719_s5 + $0x30] sm:$0xff] }
 0x2fd   :  { %v2747_v60 = vpop.f32.mrf.mxu0 }
 0x2fe   :  { %v2756_v4 = vmax.f32 %v2752_v41, %v2753_v26  ;;  %v2754_v22 = vadd.f32 %v2747_v60, %v2572_v15  ;;  %v2890_v26 = vld [vmem:[%s5719_s5 + $0x28] sm:$0xff]  ;;  %v2889_v60 = vld [vmem:[%s5719_s5 + $0x20] sm:$0xff]  ;;  %v2888_v15 = vld [vmem:[%s5719_s5 + $0x18] sm:$0xff] }
 0x2ff   :  { %v2749_v50 = vpop.f32.mrf.mxu0 }
 0x300   :  { %v2760_v63 = vcombine.high %v2756_v4, %v2756_v4  ;;  %v5482_v34 = vrot.slane %v2756_v4, %v4746_v11  ;;  %v2755_v52 = vadd.f32 %v2749_v50, %v2573_v19 }
 0x302   :  { %v5488_v12 = vrot.slane %v2760_v63, %v4746_v11  ;;  %v2775_v1 = vcombine.high %v5482_v34, %v5482_v34  ;;  %v2757_v39 = vmax.f32 %v2754_v22, %v2755_v52  ;;  %v3566_v54 = vrot.slane %v5482_v34, 9  ;;  %v3622_v52 = vld [vmem:[%s5719_s5 + $0x1f8] sm:$0xff] }
 0x304   :  { %v3567_v37 = vrot.slane %v2775_v1, 9  ;;  %v3568_v62 = vrot.slane %v5488_v12, 9  ;;  %v2777_v46 = vcombine.high %v2757_v39, %v2757_v39  ;;  %v2784_v2 = vrot.slane %v2757_v39, %v4746_v11  ;;  %v3620_v39 = vld [vmem:[%s5719_s5 + $0x1e8] sm:$0xff] }
 0x305   :  { %v2826_v41 = vmax.f32 %v5482_v34, %v3566_v54  ;;  %v2885_v34 = vld [vmem:[%s5719_s5] sm:$0xff] }
 0x306   :  { %v2827_v53 = vmax.f32 %v2775_v1, %v3567_v37  ;;  %v2828_v16 = vmax.f32 %v5488_v12, %v3568_v62  ;;  %v5504_v58 = vrot.slane %v2777_v46, %v4746_v11  ;;  %v2792_v32 = vcombine.high %v2784_v2, %v2784_v2  ;;  %v3621_v1 = vld [vmem:[%s5719_s5 + $0x1f0] sm:$0xff]  ;;  %v3619_v37 = vld [vmem:[%s5719_s5 + $0x1e0] sm:$0xff]  ;;  %v3618_v62 = vld [vmem:[%s5719_s5 + $0x1d8] sm:$0xff] }
 0x307   :  { %v3570_v7 = vrot.slane %v2784_v2, 9  ;;  %v2869_v4 = vadd.f32 %v5485_v40, %v2826_v41  ;;  %v3617_v46 = vld [vmem:[%s5719_s5 + $0x1d0] sm:$0xff] }
 0x308   :  { %v3571_v5 = vrot.slane %v2792_v32, 9  ;;  %v3572_v25 = vrot.slane %v5504_v58, 9  ;;  %v2870_v42 = vadd.f32 %v2857_v8, %v2827_v53  ;;  %v2871_v28 = vadd.f32 %v5500_v0, %v2828_v16  ;;  %v3616_v8 = vld [vmem:[%s5719_s5 + $0x1c8] sm:$0xff]  ;;  %v3615_v16 = vld [vmem:[%s5719_s5 + $0x1c0] sm:$0xff] }
 0x309   :  { %v2830_v3 = vmax.f32 %v2784_v2, %v3570_v7  ;;  %v2877_v50 = vmax.f32 %v2869_v4, 0.0  ;;  %v2776_v2 = vcombine.high %v5488_v12, %v5488_v12  ;;  %v3614_v12 = vld [vmem:[%s5719_s5 + $0x1b8] sm:$0xff] }
 0x30a   :  { %v2831_v38 = vmax.f32 %v2792_v32, %v3571_v5  ;;  %v2832_v36 = vmax.f32 %v5504_v58, %v3572_v25  ;;  %v2878_v29 = vmax.f32 %v2870_v42, 0.0  ;;  %v2879_v30 = vmax.f32 %v2871_v28, 0.0  ;;  %v3613_v5 = vld [vmem:[%s5719_s5 + $0x1b0] sm:$0xff]  ;;  %v3612_v28 = vld [vmem:[%s5719_s5 + $0x1a8] sm:$0xff] }
 0x30b   :  { %v2873_v35 = vadd.f32 %v5494_v10, %v2830_v3  ;;  %v3005_v22 = vrot.slane %v2877_v50, %v4740_v23  ;;  %v2793_v10 = vcombine.high %v5504_v58, %v5504_v58  ;;  %v3569_v58 = vrot.slane %v2776_v2, 9 }
 0x30c   :  { %v2874_v13 = vadd.f32 %v2859_v59, %v2831_v38  ;;  %v2875_v11 = vadd.f32 %v5509_v27, %v2832_v36  ;;  %v2923_v47 = vrot.slane %v2878_v29, %v4740_v23  ;;  %v3104_v18 = vrot.slane %v2879_v30, %v4740_v23  ;;  %v3609_v29 = vld [vmem:[%s5719_s5 + $0x190] sm:$0xff]  ;;  %v3608_v30 = vld [vmem:[%s5719_s5 + $0x188] sm:$0xff] }
 0x30d   :  { %v2881_v19 = vmax.f32 %v2873_v35, 0.0  ;;  %v3573_v53 = vrot.slane %v2793_v10, 9  ;;  %v2860_v59 = vrot.slane %v5509_v27, 1  ;;  %v2829_v25 = vmax.f32 %v2776_v2, %v3569_v58  ;;  %v3611_v27 = vld [vmem:[%s5719_s5 + $0x1a0] sm:$0xff] }
 0x30e   :  { %v2882_v20 = vmax.f32 %v2874_v13, 0.0  ;;  %v2883_v44 = vmax.f32 %v2875_v11, 0.0  ;;  %v2858_v42 = vrot.slane %v5500_v0, 1  ;;  %v3610_v0 = vld [vmem:[%s5719_s5 + $0x198] sm:$0xff] }
 0x30f   :  { %v3009_v63 = vrot.slane %v2881_v19, %v4740_v23  ;;  %v2833_v32 = vmax.f32 %v2793_v10, %v3573_v53 }
 0x310   :  { %v2927_v56 = vrot.slane %v2882_v20, %v4740_v23  ;;  %v3108_v49 = vrot.slane %v2883_v44, %v4740_v23  ;;  %v2872_v36 = vadd.f32 %v2858_v42, %v2829_v25  ;;  %v3607_v44 = vld [vmem:[%s5719_s5 + $0x180] sm:$0xff] }
 0x311   :  { %v3010_v40 = vsel %vm1963_vm6, %v3009_v63, %v3005_v22  ;;  %v2876_v38 = vadd.f32 %v2860_v59, %v2833_v32 }
 0x312   :  { %v2928_v55 = vsel %vm1963_vm6, %v2927_v56, %v2923_v47  ;;  %v3109_v31 = vsel %vm1963_vm6, %v3108_v49, %v3104_v18  ;;  %v2880_v11 = vmax.f32 %v2872_v36, 0.0  ;;  %v3298_v18 = vld [vmem:[%s5721_s7 + $0x38] sm:$0xff]  ;;  %v3297_v49 = vld [vmem:[%s5721_s7 + $0x30] sm:$0xff] }
 0x313   :  { %3871 = vmatmul.mubr.f32.vlgmr.msra.gmra.mxu1 %v2928_v55  ;;  %3941 = vmatmul.mubr.f32.vlgmr.msra.gmra.mxu0 %v3109_v31  ;;  %v2884_v13 = vmax.f32 %v2876_v38, 0.0  ;;  %v3294_v55 = vld [vmem:[%s5721_s7 + $0x18] sm:$0xff]  ;;  %v3293_v31 = vld [vmem:[%s5721_s7 + $0x10] sm:$0xff] }
 0x314   :  { %3874 = vmatpush3.msra.mxu1 %v2900_v9  ;;  %3905 = vmatprep.mubr.msk.f32.mxu1 %vm4059_vm13, %v5728_v43  ;;  %v3204_v47 = vrot.slane %v2880_v11, %v4740_v23  ;;  %v3295_v9 = vld [vmem:[%s5721_s7 + $0x20] sm:$0xff] }
 0x315   :  { %3875 = vmatprep.subr.mxu1 %v5728_v43  ;;  %3994 = vmatprep.mubr.msk.f32.mxu0 %vm4059_vm13, %v5728_v43  ;;  %v3208_v20 = vrot.slane %v2884_v13, %v4740_v23  ;;  %v3296_v23 = vld [vmem:[%s5721_s7 + $0x28] sm:$0xff] }
 0x316   :  { %3876 = vmatpush3.msra.mxu1 %v2899_v6  ;;  %3979 = vmatpush3.msra.mxu0 %v3298_v18  ;;  %v3292_v6 = vld [vmem:[%s5721_s7 + $0x8] sm:$0xff] }
 0x317   :  { %3877 = vmatprep.subr.mxu1 %v5728_v43  ;;  %v3209_v56 = vsel %vm1963_vm6, %v3208_v20, %v3204_v47  ;;  %3980 = vmatprep.subr.mxu0 %v5728_v43 }
 0x318   :  { %3878 = vmatpush3.msra.mxu1 %v2898_v45  ;;  %3981 = vmatpush3.msra.mxu0 %v3297_v49  ;;  %v3291_v45 = vld [vmem:[%s5721_s7] sm:$0xff] }
 0x319   :  { %3879 = vmatprep.subr.mxu1 %v5728_v43  ;;  %3982 = vmatprep.subr.mxu0 %v5728_v43 }
 0x31a   :  { %3880 = vmatpush3.msra.mxu1 %v2897_v48  ;;  %3983 = vmatpush3.msra.mxu0 %v3296_v23 }
 0x31b   :  { %3881 = vmatprep.subr.mxu1 %v5728_v43  ;;  %3984 = vmatprep.subr.mxu0 %v5728_v43 }
 0x31c   :  { %3882 = vmatpush3.msra.mxu1 %v2896_v33  ;;  %3985 = vmatpush3.msra.mxu0 %v3295_v9 }
 0x31d   :  { %3883 = vmatprep.subr.mxu1 %v5728_v43  ;;  %3986 = vmatprep.subr.mxu0 %v5728_v43 }
 0x31e   :  { %3884 = vmatpush3.msra.mxu1 %v2895_v57  ;;  %3987 = vmatpush3.msra.mxu0 %v3294_v55 }
 0x31f   :  { %3885 = vmatprep.subr.mxu1 %v5728_v43  ;;  %3988 = vmatprep.subr.mxu0 %v5728_v43 }
 0x320   :  { %3886 = vmatpush3.msra.mxu1 %v2894_v51  ;;  %3989 = vmatpush3.msra.mxu0 %v3293_v31 }
 0x321   :  { %3887 = vmatprep.subr.mxu1 %v5728_v43  ;;  %3990 = vmatprep.subr.mxu0 %v5728_v43 }
 0x322   :  { %3888 = vmatpush3.msra.mxu1 %v2893_v24  ;;  %3991 = vmatpush3.msra.mxu0 %v3292_v6 }
 0x323   :  { %3889 = vmatprep.subr.mxu1 %v5728_v43  ;;  %3992 = vmatprep.subr.mxu0 %v5728_v43 }
 0x324   :  { %3890 = vmatpush3.msra.mxu1 %v2892_v14  ;;  %3993 = vmatpush3.msra.mxu0 %v3291_v45 }
 0x325   :  { %3891 = vmatprep.subr.mxu1 %v5728_v43 }
 0x326   :  { %3892 = vmatpush3.msra.mxu1 %v2891_v61  ;;  %v3623_v61 = vld [vmem:[%s5720_s6] ss:$0 sm:$0xff]  ;;  %s4060_s6 = smov [#allocation5]  }
 0x327   :  { %3893 = vmatprep.subr.mxu1 %v5728_v43 }
 0x328   :  { %3894 = vmatpush3.msra.mxu1 %v2890_v26 }
 0x329   :  { %3895 = vmatprep.subr.mxu1 %v5728_v43 }
 0x32a   :  { %3896 = vmatpush3.msra.mxu1 %v2889_v60 }
 0x32b   :  { %3897 = vmatprep.subr.mxu1 %v5728_v43 }
 0x32c   :  { %3898 = vmatpush3.msra.mxu1 %v2888_v15 }
 0x32d   :  { %3899 = vmatprep.subr.mxu1 %v5728_v43 }
 0x32e   :  { %3900 = vmatpush3.msra.mxu1 %v2887_v17 }
 0x32f   :  { %3901 = vmatprep.subr.mxu1 %v5728_v43 }
 0x330   :  { %3902 = vmatpush3.msra.mxu1 %v2886_v21 }
 0x331   :  { %3903 = vmatprep.subr.mxu1 %v5728_v43 }
 0x332   :  { %3904 = vmatpush3.msra.mxu1 %v2885_v34 }
 0x333   :  { %3906 = vmatmul.mubr.f32.vlgmr.msra.gmra.mxu1 %v3010_v40  ;;  %3943 = vmatprep.subr.mxu1 %v5728_v43 }
 0x334   :  { %3944 = vmatpush3.msra.mxu1 %v3622_v52  ;;  %3975 = vmatprep.mubr.msk.f32.mxu1 %vm4059_vm13, %v5728_v43 }
 0x335   :  { %3945 = vmatprep.subr.mxu1 %v5728_v43 }
 0x336   :  { %3946 = vmatpush3.msra.mxu1 %v3621_v1 }
 0x337   :  { %3947 = vmatprep.subr.mxu1 %v5728_v43 }
 0x338   :  { %3948 = vmatpush3.msra.mxu1 %v3620_v39 }
 0x339   :  { %3949 = vmatprep.subr.mxu1 %v5728_v43 }
 0x33a   :  { %3950 = vmatpush3.msra.mxu1 %v3619_v37 }
 0x33b   :  { %3951 = vmatprep.subr.mxu1 %v5728_v43 }
 0x33c   :  { %3952 = vmatpush3.msra.mxu1 %v3618_v62 }
 0x33d   :  { %3953 = vmatprep.subr.mxu1 %v5728_v43 }
 0x33e   :  { %3954 = vmatpush3.msra.mxu1 %v3617_v46 }
 0x33f   :  { %3955 = vmatprep.subr.mxu1 %v5728_v43 }
 0x340   :  { %3956 = vmatpush3.msra.mxu1 %v3616_v8 }
 0x341   :  { %3957 = vmatprep.subr.mxu1 %v5728_v43 }
 0x342   :  { %3958 = vmatpush3.msra.mxu1 %v3615_v16 }
 0x343   :  { %3959 = vmatprep.subr.mxu1 %v5728_v43 }
 0x344   :  { %3960 = vmatpush3.msra.mxu1 %v3614_v12 }
 0x345   :  { %3961 = vmatprep.subr.mxu1 %v5728_v43 }
 0x346   :  { %3962 = vmatpush3.msra.mxu1 %v3613_v5 }
 0x347   :  { %3963 = vmatprep.subr.mxu1 %v5728_v43 }
 0x348   :  { %3964 = vmatpush3.msra.mxu1 %v3612_v28 }
 0x349   :  { %3965 = vmatprep.subr.mxu1 %v5728_v43 }
 0x34a   :  { %3966 = vmatpush3.msra.mxu1 %v3611_v27 }
 0x34b   :  { %3967 = vmatprep.subr.mxu1 %v5728_v43 }
 0x34c   :  { %3968 = vmatpush3.msra.mxu1 %v3610_v0 }
 0x34d   :  { %3969 = vmatprep.subr.mxu1 %v5728_v43 }
 0x34e   :  { %3970 = vmatpush3.msra.mxu1 %v3609_v29 }
 0x34f   :  { %3971 = vmatprep.subr.mxu1 %v5728_v43 }
 0x350   :  { %3972 = vmatpush3.msra.mxu1 %v3608_v30 }
 0x351   :  { %3973 = vmatprep.subr.mxu1 %v5728_v43  ;;  %v3624_v43 = vld [vmem:[%s5722_s8] ss:$0 sm:$0xff]  ;;  %s3400_s8 = sshll.u32 %s4060_s6, 4  ;;  %s3401_s8 = int_to_ptr.vmem [resolvable:$true] %s3400_s8 }
 0x352   :  { %3974 = vmatpush3.msra.mxu1 %v3607_v44  ;;  %s4029_s13 = scalar_lea.vmem %s3401_s8, 32  ;;  %p4034_p6 = scmp.lt.s32.totalorder %s3401_s8, %s3401_s8 }
 0x353   :  { %3976 = vmatmul.mubr.f32.vlgmr.msra.gmra.mxu1 %v3209_v56  ;;  %p4030_p5 = scmp.ne.s32.totalorder %s3401_s8, %s4029_s13  ;;  %p4035_p7 = scmp.lt.s32.totalorder %s4029_s13, %s4029_s13 }
 0x355   :  { %p4036_p8 = por %p4035_p7, %p4034_p6 }
 0x357   :  { %p4037_p9 = pnand %p4036_p8, %p4030_p5 }
 0x3d3   :  { %v2996_v48 = vpop.f32.mrf.mxu1  ;;  %v3177_v33 = vpop.f32.mrf.mxu0 }
 0x3d5   :  { %v3872_v57 = vpop.f32.mrf.mxu1  ;;  %v3942_v51 = vpop.f32.mrf.mxu0 }
 0x3f3   :  { %v3078_v7 = vpop.f32.mrf.mxu1 }
 0x3f4   :  { %v3079_v54 = vadd.f32 %v3078_v7, %v2996_v48 }
 0x3f5   :  { %v3907_v24 = vpop.f32.mrf.mxu1 }
 0x3f6   :  { %v3181_v14 = vadd.f32 %v3177_v33, %v3079_v54 }
 0x413   :  { %v3277_v3 = vpop.f32.mrf.mxu1 }
 0x414   :  { %v3281_v41 = vadd.f32 %v3277_v3, %v3181_v14 }
 0x415   :  { %v3977_v26 = vpop.f32.mrf.mxu1 }
 0x416   :  { %v3289_v35 = vadd.f32 %v3623_v61, %v3281_v41 }
 0x418   :  { %v3290_v60 = vmax.f32 %v3289_v35, 0.0 }
 0x41a   :  { %3995 = vmatmul.mubr.msk.f32.vlgmr.msra.gmra.mxu0 %vm1363_vm5, %v3290_v60 }
 0x4da   :  { %v3375_v4 = vpop.f32.mrf.mxu0 }
 0x4db   :  { %v3376_v15 = vadd.f32 %v3624_v43, %v3375_v4 }
 0x4dc   :  { %v3996_v19 = vpop.f32.mrf.mxu0 }
 0x4dd   :  { %v3380_v17 = vsel %vm3379_vm14, %v3376_v15, -inf }
 0x4de   :  { %3381 = vmax.xlane.f32.xlu0 %v3380_v17 }
 0x567   :  { %v3382_v50 = vpop.xlane.xlu0 %3381 }
 0x568   :  { %v3383_v21 = vsub.f32 %v3376_v15, %v3382_v50 }
 0x56a   :  { %v3384_v63 = vmul.f32 1.442695, %v3383_v21 }
 0x56c   :  { %4005 = vpow2.f32 %v3384_v63 }
 0x579   :  { %v4006_v34 = vpop.eup %4005 }
 0x57a   :  { %v3386_v22 = vsel %vm3379_vm14, %v4006_v34, 0.0 }
 0x57b   :  { %3387 = vadd.xlane.f32.xlu1 %v3386_v22 }
 0x604   :  { %v3388_v52 = vpop.xlane.xlu1 %3387 }
 0x605   :  { %4007 = vlog2.f32 %v3388_v52 }
 0x612   :  { %v4008_v40 = vpop.eup %4007 }
 0x613   :  { %v3390_v1 = vmul.f32 0.6931472, %v4008_v40 }
 0x615   :  { %v3391_v39 = vadd.f32 %v3390_v1, %v3382_v50 }
 0x617   :  { %v3392_v37 = vsub.f32 %v3376_v15, %v3391_v39 }
 0x619   :  { %3393 = vst.msk [vmem:[#allocation5] sm:$0x3] %vm3379_vm14, %v3392_v37 }
 0x61a   :  { %4040 = shalt.err (!%p4037_p9)
}
 0x61b   :  { %3403 = dma.vmem_to_hbm [thread:$0]  %s3401_s8, 32, %s5723_s9, [#allocation4]  }
 0x61c   :  { %4051 = dma.done.wait [#allocation4], 32  }
 0x61d   :  { %4052 = vsyncadd [#allocation4], 4294967264 }
 0x61e   :  { %3407 = vsyncpa [#allocation3], 1 }
 0x61f   :  { %3408 = vsyncpa [#allocation4], 1 }

</bundles_post_ra>
